<compile_context>
chip_gen: v7x
topology: tpu7x:2x2x1
jax: 0.10.0
libtpu: 0.0.40
codegen_flags: <defaults>
</compile_context>

<pallas_src>
import numpy as np
import jax
import jax.numpy as jnp
from jax.experimental import pallas as pl
from jax.experimental.pallas import tpu as pltpu


C = 16        # output channels of every conv
K = 3         # conv kernel size
B_TILE = 8    # images processed per grid step


def _banded_weight(w, win, wout, dil, pad_w, out_total_w, out_off):
    """Build the Toeplitz-banded weight that applies one kh-slice of a 3x3
    conv to a whole flattened image row.

    Input  row layout : lane = j*Cin + ci,   j in [0, win)   (input width)
    Output row layout : lane = v*Cout + co,  v in [0, out_total_w)
    Valid outputs are placed at v = out_off .. out_off+wout-1 (the rest of the
    columns are exactly zero -> they become the width zero-padding the next
    layer reads).  Width taps: input col j = v + dil*kw - pad_w.
    """
    cout, cin, kh_, kw_ = w.shape
    sel = np.zeros((kw_, win, wout), np.float32)
    for kw in range(kw_):
        for v in range(wout):
            j = v + dil * kw - pad_w
            if 0 <= j < win:
                sel[kw, j, v] = 1.0
    # R[kh, j, ci, v, co] = sum_kw sel[kw, j, v] * w[co, ci, kh, kw]
    r = jnp.einsum('wjv,oihw->hjivo', jnp.asarray(sel), w,
                   precision=jax.lax.Precision.HIGHEST)
    r = jnp.pad(r, ((0, 0), (0, 0), (0, 0),
                    (out_off, out_total_w - wout - out_off), (0, 0)))
    return r.reshape(kh_, win * cin, out_total_w * cout)


def _make_kernel(B, H, W):
    RS = H + 2          # per-image row stride (height incl. +/-1 padding)
    RB = B * RS         # rows handled per grid step
    OH = H - 4          # conv2 / conv3 output height
    L1 = W * C          # y1 row width  (lanes)
    L2 = (W - 2) * C    # y2 (padded) row width
    L3 = (W - 4) * C    # output row width

    def kernel(x_ref, w1_ref, w2_ref, w3_ref, b1_ref, b2_ref, b3_ref,
               o_ref, xbuf, y1buf, y2buf):
        # ---- stage the B images into a row buffer with zero padding rows ----
        xbuf[...] = jnp.zeros_like(xbuf)                 # tiny: (RB+8, W)
        for b in range(B):
            xbuf[b * RS + 1: b * RS + 1 + H, :] = x_ref[b]
        # slack rows are only read while producing garbage rows of the last
        # image, but keep them finite/zero.
        y1buf[RB:, :] = jnp.zeros((8, L1), jnp.float32)
        y2buf[RB:, :] = jnp.zeros((8, L2), jnp.float32)

        # ---- conv1 (1->16, pad 1): 3 banded dots, K = W -----------------
        acc = b1_ref[...]                                 # (1, L1) bias row
        for kh in range(K):
            acc = acc + jnp.dot(xbuf[kh: kh + RB, :], w1_ref[kh],
                                preferred_element_type=jnp.float32)
        y1buf[0:RB, :] = acc                              # (RB, L1)

        # ---- conv2 (16->16, dil 2, valid): 3 banded dots, K = W*16 ------
        acc = b2_ref[...]                                 # (1, L2), pad lanes 0
        for kh in range(K):
            acc = acc + jnp.dot(y1buf[2 * kh: 2 * kh + RB, :], w2_ref[kh],
                                preferred_element_type=jnp.float32)
        # store with a +1 row offset so conv3 sees its top zero-pad row, then
        # re-zero the per-image height-padding rows that conv3 reads.
        y2buf[1: 1 + RB, :] = acc
        zrow = jnp.zeros((1, L2), jnp.float32)
        for b in range(B):
            y2buf[b * RS: b * RS + 1, :] = zrow                       # top pad
            y2buf[b * RS + 1 + OH: b * RS + 2 + OH, :] = zrow         # bottom pad

        # ---- conv3 (16->16, pad 1): 3 banded dots, K = (W-2)*16 ---------
        acc = b3_ref[...]                                 # (1, L3)
        for kh in range(K):
            acc = acc + jnp.dot(y2buf[kh: kh + RB, :], w3_ref[kh],
                                preferred_element_type=jnp.float32)
        o_ref[...] = acc                                  # lane-dense (RB, L3)

    return kernel


def net_pallas(x_nchw, params):
    """Fused conv1->conv2->conv3.  x_nchw: (N, 1, H, W) f32 -> (N,16,H-4,W-4)."""
    (w1, b1), (w2, b2), (w3, b3) = params                 # PyTorch layouts
    N, cin, H, W = x_nchw.shape
    assert cin == 1 and H >= 5 and W >= 5
    OH, OW = H - 4, W - 4
    B = B_TILE
    G = max(1, (N + B - 1) // B)
    Npad = G * B
    RS = H + 2
    RB = B * RS
    L1, L2, L3 = W * C, (W - 2) * C, (W - 4) * C

    x = x_nchw.reshape(N, H, W)                           # Cin==1: free reshape
    if Npad != N:
        x = jnp.concatenate([x, jnp.zeros((Npad - N, H, W), x.dtype)], axis=0)

    # Weight-only preprocessing (tiny, done by XLA outside the kernel).
    wb1 = _banded_weight(w1, W,     W,     1, 1, W,     0)   # (3, W,   L1)
    wb2 = _banded_weight(w2, W,     W - 4, 2, 0, W - 2, 1)   # (3, L1,  L2)
    wb3 = _banded_weight(w3, W - 2, W - 4, 1, 0, W - 4, 0)   # (3, L2,  L3)
    b1r = jnp.tile(b1, W)[None, :]                           # (1, L1)
    b2r = jnp.pad(jnp.tile(b2, W - 4), (C, C))[None, :]      # (1, L2), pads = 0
    b3r = jnp.tile(b3, W - 4)[None, :]                       # (1, L3)

    out = pl.pallas_call(
        _make_kernel(B, H, W),
        out_shape=jax.ShapeDtypeStruct((G * RB, L3), jnp.float32),
        grid_spec=pltpu.PrefetchScalarGridSpec(
            num_scalar_prefetch=0,
            grid=(G,),
            in_specs=[
                pl.BlockSpec((B, H, W), lambda g: (g, 0, 0)),
                pl.BlockSpec((K, W, L1), lambda g: (0, 0, 0)),
                pl.BlockSpec((K, L1, L2), lambda g: (0, 0, 0)),
                pl.BlockSpec((K, L2, L3), lambda g: (0, 0, 0)),
                pl.BlockSpec((1, L1), lambda g: (0, 0)),
                pl.BlockSpec((1, L2), lambda g: (0, 0)),
                pl.BlockSpec((1, L3), lambda g: (0, 0)),
            ],
            out_specs=pl.BlockSpec((RB, L3), lambda g: (g, 0)),
            scratch_shapes=[
                pltpu.VMEM((RB + 8, W), jnp.float32),    # padded input rows
                pltpu.VMEM((RB + 8, L1), jnp.float32),   # conv1 output rows
                pltpu.VMEM((RB + 8, L2), jnp.float32),   # conv2 output (padded)
            ],
        ),
        compiler_params=pltpu.CompilerParams(
            dimension_semantics=("parallel",)),
    )(x, wb1, wb2, wb3, b1r, b2r, b3r)

    # (G*RB, L3) rows = (image, padded-row), lanes = (out col, channel).
    out = out.reshape(Npad, RS, OW, C)[:N, :OH]           # crop pad rows/images
    return jnp.transpose(out, (0, 3, 1, 2))               # NHWC-ish -> NCHW


net_forward = jax.jit(net_pallas)


def init_params(key):
    """Deterministic synthetic params in PyTorch Conv2d layout (Cout,Cin,K,K)."""
    ks = jax.random.split(key, 6)

    def conv_init(kw_key, kb_key, cin, cout, k):
        fan_in = cin * k * k
        bound = 1.0 / jnp.sqrt(fan_in)
        w = jax.random.uniform(kw_key, (cout, cin, k, k), jnp.float32,
                               -bound, bound)
        b = jax.random.uniform(kb_key, (cout,), jnp.float32, -bound, bound)
        return w, b

    w1, b1 = conv_init(ks[0], ks[1], 1, C, K)
    w2, b2 = conv_init(ks[2], ks[3], C, C, K)
    w3, b3 = conv_init(ks[4], ks[5], C, C, K)
    return (w1, b1), (w2, b2), (w3, b3)


def ref_forward(x_nchw, params):
    (w1, b1), (w2, b2), (w3, b3) = params

    def conv(x, w, b, pad, dil):
        y = jax.lax.conv_general_dilated(
            x, w, window_strides=(1, 1),
            padding=((pad, pad), (pad, pad)),
            rhs_dilation=(dil, dil),
            dimension_numbers=("NCHW", "OIHW", "NCHW"),
            precision=jax.lax.Precision.HIGHEST)
        return y + b.reshape(1, -1, 1, 1)

    x_ = conv(x_nchw, w1, b1, 1, 1)
    x_ = conv(x_, w2, b2, 0, 2)
    x_ = conv(x_, w3, b3, 1, 1)
    return x_


if __name__ == "__main__":
    key = jax.random.PRNGKey(0)
    k_x, k_p = jax.random.split(key)

    x = jax.random.normal(k_x, (16, 1, 16, 16), dtype=jnp.float32)
    params = init_params(k_p)

    out = jax.block_until_ready(net_forward(x, params))
    assert out.shape == (16, 16, 12, 12), out.shape
    assert out.dtype == jnp.float32

    expected = jax.block_until_ready(ref_forward(x, params))
    max_err = float(jnp.max(jnp.abs(out - expected)))
    assert jnp.allclose(out, expected, atol=2e-3, rtol=2e-3), max_err

    print("KERNEL_OK")
</pallas_src>

<mosaic_0001>
module attributes {stable_mosaic.version = 11 : i64} {
  func.func @kernel(%arg0: i32, %arg1: memref<8x16x16xf32, #tpu.memory_space<vmem>>, %arg2: memref<3x16x256xf32, #tpu.memory_space<vmem>>, %arg3: memref<3x256x224xf32, #tpu.memory_space<vmem>>, %arg4: memref<3x224x192xf32, #tpu.memory_space<vmem>>, %arg5: memref<1x256xf32, #tpu.memory_space<vmem>>, %arg6: memref<1x224xf32, #tpu.memory_space<vmem>>, %arg7: memref<1x192xf32, #tpu.memory_space<vmem>>, %arg8: memref<144x192xf32, #tpu.memory_space<vmem>>, %arg9: memref<152x16xf32, #tpu.memory_space<vmem>>, %arg10: memref<152x256xf32, #tpu.memory_space<vmem>>, %arg11: memref<152x224xf32, #tpu.memory_space<vmem>>) attributes {dimension_semantics = [#tpu.dimension_semantics<parallel>], iteration_bounds = array<i64: 2>, scalar_prefetch = 0 : i64, scratch_operands = 3 : i64, tpu.core_type = #tpu.core_type<tc>, window_params = [{transform_indices = @transform_0, window_bounds = array<i64: 8, 16, 16>}, {pipeline_mode = #tpu.pipeline_mode<synchronous>, transform_indices = @transform_1, window_bounds = array<i64: 3, 16, 256>}, {pipeline_mode = #tpu.pipeline_mode<synchronous>, transform_indices = @transform_2, window_bounds = array<i64: 3, 256, 224>}, {pipeline_mode = #tpu.pipeline_mode<synchronous>, transform_indices = @transform_3, window_bounds = array<i64: 3, 224, 192>}, {pipeline_mode = #tpu.pipeline_mode<synchronous>, transform_indices = @transform_4, window_bounds = array<i64: 1, 256>}, {pipeline_mode = #tpu.pipeline_mode<synchronous>, transform_indices = @transform_5, window_bounds = array<i64: 1, 224>}, {pipeline_mode = #tpu.pipeline_mode<synchronous>, transform_indices = @transform_6, window_bounds = array<i64: 1, 192>}, {transform_indices = @transform_7, window_bounds = array<i64: 144, 192>}]} {
    %cst = arith.constant 0.000000e+00 : f32
    %0 = vector.broadcast %cst : f32 to vector<152x16xf32>
    %c0 = arith.constant 0 : index
    %c0_0 = arith.constant 0 : index
    %1 = vector.load %arg9[%c0, %c0_0] : memref<152x16xf32, #tpu.memory_space<vmem>>, vector<152x16xf32>
    tpu.vector_store %arg9[%c0, %c0_0], %0 {strides = array<i32>} : memref<152x16xf32, #tpu.memory_space<vmem>>, vector<152x16xf32>,
    %c0_1 = arith.constant 0 : index
    %c0_2 = arith.constant 0 : index
    %c0_3 = arith.constant 0 : index
    %2 = vector.load %arg1[%c0_1, %c0_2, %c0_3] : memref<8x16x16xf32, #tpu.memory_space<vmem>>, vector<1x16x16xf32>
    %3 = vector.shape_cast %2 : vector<1x16x16xf32> to vector<16x16xf32>
    %c1 = arith.constant 1 : index
    %c0_4 = arith.constant 0 : index
    %4 = vector.load %arg9[%c1, %c0_4] : memref<152x16xf32, #tpu.memory_space<vmem>>, vector<16x16xf32>
    tpu.vector_store %arg9[%c1, %c0_4], %3 {strides = array<i32>} : memref<152x16xf32, #tpu.memory_space<vmem>>, vector<16x16xf32>,
    %c1_5 = arith.constant 1 : index
    %c0_6 = arith.constant 0 : index
    %c0_7 = arith.constant 0 : index
    %5 = vector.load %arg1[%c1_5, %c0_6, %c0_7] : memref<8x16x16xf32, #tpu.memory_space<vmem>>, vector<1x16x16xf32>
    %6 = vector.shape_cast %5 : vector<1x16x16xf32> to vector<16x16xf32>
    %c19 = arith.constant 19 : index
    %c0_8 = arith.constant 0 : index
    %7 = vector.load %arg9[%c19, %c0_8] : memref<152x16xf32, #tpu.memory_space<vmem>>, vector<16x16xf32>
    tpu.vector_store %arg9[%c19, %c0_8], %6 {strides = array<i32>} : memref<152x16xf32, #tpu.memory_space<vmem>>, vector<16x16xf32>,
    %c2 = arith.constant 2 : index
    %c0_9 = arith.constant 0 : index
    %c0_10 = arith.constant 0 : index
    %8 = vector.load %arg1[%c2, %c0_9, %c0_10] : memref<8x16x16xf32, #tpu.memory_space<vmem>>, vector<1x16x16xf32>
    %9 = vector.shape_cast %8 : vector<1x16x16xf32> to vector<16x16xf32>
    %c37 = arith.constant 37 : index
    %c0_11 = arith.constant 0 : index
    %10 = vector.load %arg9[%c37, %c0_11] : memref<152x16xf32, #tpu.memory_space<vmem>>, vector<16x16xf32>
    tpu.vector_store %arg9[%c37, %c0_11], %9 {strides = array<i32>} : memref<152x16xf32, #tpu.memory_space<vmem>>, vector<16x16xf32>,
    %c3 = arith.constant 3 : index
    %c0_12 = arith.constant 0 : index
    %c0_13 = arith.constant 0 : index
    %11 = vector.load %arg1[%c3, %c0_12, %c0_13] : memref<8x16x16xf32, #tpu.memory_space<vmem>>, vector<1x16x16xf32>
    %12 = vector.shape_cast %11 : vector<1x16x16xf32> to vector<16x16xf32>
    %c55 = arith.constant 55 : index
    %c0_14 = arith.constant 0 : index
    %13 = vector.load %arg9[%c55, %c0_14] : memref<152x16xf32, #tpu.memory_space<vmem>>, vector<16x16xf32>
    tpu.vector_store %arg9[%c55, %c0_14], %12 {strides = array<i32>} : memref<152x16xf32, #tpu.memory_space<vmem>>, vector<16x16xf32>,
    %c4 = arith.constant 4 : index
    %c0_15 = arith.constant 0 : index
    %c0_16 = arith.constant 0 : index
    %14 = vector.load %arg1[%c4, %c0_15, %c0_16] : memref<8x16x16xf32, #tpu.memory_space<vmem>>, vector<1x16x16xf32>
    %15 = vector.shape_cast %14 : vector<1x16x16xf32> to vector<16x16xf32>
    %c73 = arith.constant 73 : index
    %c0_17 = arith.constant 0 : index
    %16 = vector.load %arg9[%c73, %c0_17] : memref<152x16xf32, #tpu.memory_space<vmem>>, vector<16x16xf32>
    tpu.vector_store %arg9[%c73, %c0_17], %15 {strides = array<i32>} : memref<152x16xf32, #tpu.memory_space<vmem>>, vector<16x16xf32>,
    %c5 = arith.constant 5 : index
    %c0_18 = arith.constant 0 : index
    %c0_19 = arith.constant 0 : index
    %17 = vector.load %arg1[%c5, %c0_18, %c0_19] : memref<8x16x16xf32, #tpu.memory_space<vmem>>, vector<1x16x16xf32>
    %18 = vector.shape_cast %17 : vector<1x16x16xf32> to vector<16x16xf32>
    %c91 = arith.constant 91 : index
    %c0_20 = arith.constant 0 : index
    %19 = vector.load %arg9[%c91, %c0_20] : memref<152x16xf32, #tpu.memory_space<vmem>>, vector<16x16xf32>
    tpu.vector_store %arg9[%c91, %c0_20], %18 {strides = array<i32>} : memref<152x16xf32, #tpu.memory_space<vmem>>, vector<16x16xf32>,
    %c6 = arith.constant 6 : index
    %c0_21 = arith.constant 0 : index
    %c0_22 = arith.constant 0 : index
    %20 = vector.load %arg1[%c6, %c0_21, %c0_22] : memref<8x16x16xf32, #tpu.memory_space<vmem>>, vector<1x16x16xf32>
    %21 = vector.shape_cast %20 : vector<1x16x16xf32> to vector<16x16xf32>
    %c109 = arith.constant 109 : index
    %c0_23 = arith.constant 0 : index
    %22 = vector.load %arg9[%c109, %c0_23] : memref<152x16xf32, #tpu.memory_space<vmem>>, vector<16x16xf32>
    tpu.vector_store %arg9[%c109, %c0_23], %21 {strides = array<i32>} : memref<152x16xf32, #tpu.memory_space<vmem>>, vector<16x16xf32>,
    %c7 = arith.constant 7 : index
    %c0_24 = arith.constant 0 : index
    %c0_25 = arith.constant 0 : index
    %23 = vector.load %arg1[%c7, %c0_24, %c0_25] : memref<8x16x16xf32, #tpu.memory_space<vmem>>, vector<1x16x16xf32>
    %24 = vector.shape_cast %23 : vector<1x16x16xf32> to vector<16x16xf32>
    %c127 = arith.constant 127 : index
    %c0_26 = arith.constant 0 : index
    %25 = vector.load %arg9[%c127, %c0_26] : memref<152x16xf32, #tpu.memory_space<vmem>>, vector<16x16xf32>
    tpu.vector_store %arg9[%c127, %c0_26], %24 {strides = array<i32>} : memref<152x16xf32, #tpu.memory_space<vmem>>, vector<16x16xf32>,
    %cst_27 = arith.constant 0.000000e+00 : f32
    %26 = vector.broadcast %cst_27 : f32 to vector<8x256xf32>
    %c144 = arith.constant 144 : index
    %c0_28 = arith.constant 0 : index
    %27 = vector.load %arg10[%c144, %c0_28] : memref<152x256xf32, #tpu.memory_space<vmem>>, vector<8x256xf32>
    tpu.vector_store %arg10[%c144, %c0_28], %26 {strides = array<i32>} : memref<152x256xf32, #tpu.memory_space<vmem>>, vector<8x256xf32>,
    %cst_29 = arith.constant 0.000000e+00 : f32
    %28 = vector.broadcast %cst_29 : f32 to vector<8x224xf32>
    %c144_30 = arith.constant 144 : index
    %c0_31 = arith.constant 0 : index
    %29 = vector.load %arg11[%c144_30, %c0_31] : memref<152x224xf32, #tpu.memory_space<vmem>>, vector<8x224xf32>
    tpu.vector_store %arg11[%c144_30, %c0_31], %28 {strides = array<i32>} : memref<152x224xf32, #tpu.memory_space<vmem>>, vector<8x224xf32>,
    %c0_32 = arith.constant 0 : index
    %c0_33 = arith.constant 0 : index
    %30 = vector.load %arg5[%c0_32, %c0_33] : memref<1x256xf32, #tpu.memory_space<vmem>>, vector<1x256xf32>
    %c0_34 = arith.constant 0 : index
    %c0_35 = arith.constant 0 : index
    %31 = vector.load %arg9[%c0_34, %c0_35] : memref<152x16xf32, #tpu.memory_space<vmem>>, vector<144x16xf32>
    %c0_36 = arith.constant 0 : index
    %c0_37 = arith.constant 0 : index
    %c0_38 = arith.constant 0 : index
    %32 = vector.load %arg2[%c0_36, %c0_37, %c0_38] : memref<3x16x256xf32, #tpu.memory_space<vmem>>, vector<1x16x256xf32>
    %33 = vector.shape_cast %32 : vector<1x16x256xf32> to vector<16x256xf32>
    %cst_39 = arith.constant dense<0.000000e+00> : vector<144x256xf32>
    %34 = tpu.matmul %31, %33, %cst_39 {dimension_numbers = #tpu.dot_dimension_numbers<[1], [0], [0], [1], [0, 0, 1, 1], [], []>} : vector<144x16xf32>, vector<16x256xf32>, vector<144x256xf32> -> vector<144x256xf32>
    %35 = vector.broadcast %30 : vector<1x256xf32> to vector<144x256xf32>
    %36 = arith.addf %35, %34 : vector<144x256xf32>
    %c1_40 = arith.constant 1 : index
    %c0_41 = arith.constant 0 : index
    %37 = vector.load %arg9[%c1_40, %c0_41] : memref<152x16xf32, #tpu.memory_space<vmem>>, vector<144x16xf32>
    %c1_42 = arith.constant 1 : index
    %c0_43 = arith.constant 0 : index
    %c0_44 = arith.constant 0 : index
    %38 = vector.load %arg2[%c1_42, %c0_43, %c0_44] : memref<3x16x256xf32, #tpu.memory_space<vmem>>, vector<1x16x256xf32>
    %39 = vector.shape_cast %38 : vector<1x16x256xf32> to vector<16x256xf32>
    %cst_45 = arith.constant dense<0.000000e+00> : vector<144x256xf32>
    %40 = tpu.matmul %37, %39, %cst_45 {dimension_numbers = #tpu.dot_dimension_numbers<[1], [0], [0], [1], [0, 0, 1, 1], [], []>} : vector<144x16xf32>, vector<16x256xf32>, vector<144x256xf32> -> vector<144x256xf32>
    %41 = arith.addf %36, %40 : vector<144x256xf32>
    %c2_46 = arith.constant 2 : index
    %c0_47 = arith.constant 0 : index
    %42 = vector.load %arg9[%c2_46, %c0_47] : memref<152x16xf32, #tpu.memory_space<vmem>>, vector<144x16xf32>
    %c2_48 = arith.constant 2 : index
    %c0_49 = arith.constant 0 : index
    %c0_50 = arith.constant 0 : index
    %43 = vector.load %arg2[%c2_48, %c0_49, %c0_50] : memref<3x16x256xf32, #tpu.memory_space<vmem>>, vector<1x16x256xf32>
    %44 = vector.shape_cast %43 : vector<1x16x256xf32> to vector<16x256xf32>
    %cst_51 = arith.constant dense<0.000000e+00> : vector<144x256xf32>
    %45 = tpu.matmul %42, %44, %cst_51 {dimension_numbers = #tpu.dot_dimension_numbers<[1], [0], [0], [1], [0, 0, 1, 1], [], []>} : vector<144x16xf32>, vector<16x256xf32>, vector<144x256xf32> -> vector<144x256xf32>
    %46 = arith.addf %41, %45 : vector<144x256xf32>
    %c0_52 = arith.constant 0 : index
    %c0_53 = arith.constant 0 : index
    %47 = vector.load %arg10[%c0_52, %c0_53] : memref<152x256xf32, #tpu.memory_space<vmem>>, vector<144x256xf32>
    tpu.vector_store %arg10[%c0_52, %c0_53], %46 {strides = array<i32>} : memref<152x256xf32, #tpu.memory_space<vmem>>, vector<144x256xf32>,
    %c0_54 = arith.constant 0 : index
    %c0_55 = arith.constant 0 : index
    %48 = vector.load %arg6[%c0_54, %c0_55] : memref<1x224xf32, #tpu.memory_space<vmem>>, vector<1x224xf32>
    %c0_56 = arith.constant 0 : index
    %c0_57 = arith.constant 0 : index
    %49 = vector.load %arg10[%c0_56, %c0_57] : memref<152x256xf32, #tpu.memory_space<vmem>>, vector<144x256xf32>
    %c0_58 = arith.constant 0 : index
    %c0_59 = arith.constant 0 : index
    %c0_60 = arith.constant 0 : index
    %50 = vector.load %arg3[%c0_58, %c0_59, %c0_60] : memref<3x256x224xf32, #tpu.memory_space<vmem>>, vector<1x256x224xf32>
    %51 = vector.shape_cast %50 : vector<1x256x224xf32> to vector<256x224xf32>
    %cst_61 = arith.constant dense<0.000000e+00> : vector<144x224xf32>
    %52 = tpu.matmul %49, %51, %cst_61 {dimension_numbers = #tpu.dot_dimension_numbers<[1], [0], [0], [1], [0, 0, 1, 1], [], []>} : vector<144x256xf32>, vector<256x224xf32>, vector<144x224xf32> -> vector<144x224xf32>
    %53 = vector.broadcast %48 : vector<1x224xf32> to vector<144x224xf32>
    %54 = arith.addf %53, %52 : vector<144x224xf32>
    %c2_62 = arith.constant 2 : index
    %c0_63 = arith.constant 0 : index
    %55 = vector.load %arg10[%c2_62, %c0_63] : memref<152x256xf32, #tpu.memory_space<vmem>>, vector<144x256xf32>
    %c1_64 = arith.constant 1 : index
    %c0_65 = arith.constant 0 : index
    %c0_66 = arith.constant 0 : index
    %56 = vector.load %arg3[%c1_64, %c0_65, %c0_66] : memref<3x256x224xf32, #tpu.memory_space<vmem>>, vector<1x256x224xf32>
    %57 = vector.shape_cast %56 : vector<1x256x224xf32> to vector<256x224xf32>
    %cst_67 = arith.constant dense<0.000000e+00> : vector<144x224xf32>
    %58 = tpu.matmul %55, %57, %cst_67 {dimension_numbers = #tpu.dot_dimension_numbers<[1], [0], [0], [1], [0, 0, 1, 1], [], []>} : vector<144x256xf32>, vector<256x224xf32>, vector<144x224xf32> -> vector<144x224xf32>
    %59 = arith.addf %54, %58 : vector<144x224xf32>
    %c4_68 = arith.constant 4 : index
    %c0_69 = arith.constant 0 : index
    %60 = vector.load %arg10[%c4_68, %c0_69] : memref<152x256xf32, #tpu.memory_space<vmem>>, vector<144x256xf32>
    %c2_70 = arith.constant 2 : index
    %c0_71 = arith.constant 0 : index
    %c0_72 = arith.constant 0 : index
    %61 = vector.load %arg3[%c2_70, %c0_71, %c0_72] : memref<3x256x224xf32, #tpu.memory_space<vmem>>, vector<1x256x224xf32>
    %62 = vector.shape_cast %61 : vector<1x256x224xf32> to vector<256x224xf32>
    %cst_73 = arith.constant dense<0.000000e+00> : vector<144x224xf32>
    %63 = tpu.matmul %60, %62, %cst_73 {dimension_numbers = #tpu.dot_dimension_numbers<[1], [0], [0], [1], [0, 0, 1, 1], [], []>} : vector<144x256xf32>, vector<256x224xf32>, vector<144x224xf32> -> vector<144x224xf32>
    %64 = arith.addf %59, %63 : vector<144x224xf32>
    %c1_74 = arith.constant 1 : index
    %c0_75 = arith.constant 0 : index
    %65 = vector.load %arg11[%c1_74, %c0_75] : memref<152x224xf32, #tpu.memory_space<vmem>>, vector<144x224xf32>
    tpu.vector_store %arg11[%c1_74, %c0_75], %64 {strides = array<i32>} : memref<152x224xf32, #tpu.memory_space<vmem>>, vector<144x224xf32>,
    %cst_76 = arith.constant 0.000000e+00 : f32
    %66 = vector.broadcast %cst_76 : f32 to vector<1x224xf32>
    %c0_77 = arith.constant 0 : index
    %c0_78 = arith.constant 0 : index
    %67 = vector.load %arg11[%c0_77, %c0_78] : memref<152x224xf32, #tpu.memory_space<vmem>>, vector<1x224xf32>
    tpu.vector_store %arg11[%c0_77, %c0_78], %66 {strides = array<i32>} : memref<152x224xf32, #tpu.memory_space<vmem>>, vector<1x224xf32>,
    %c13 = arith.constant 13 : index
    %c0_79 = arith.constant 0 : index
    %68 = vector.load %arg11[%c13, %c0_79] : memref<152x224xf32, #tpu.memory_space<vmem>>, vector<1x224xf32>
    tpu.vector_store %arg11[%c13, %c0_79], %66 {strides = array<i32>} : memref<152x224xf32, #tpu.memory_space<vmem>>, vector<1x224xf32>,
    %c18 = arith.constant 18 : index
    %c0_80 = arith.constant 0 : index
    %69 = vector.load %arg11[%c18, %c0_80] : memref<152x224xf32, #tpu.memory_space<vmem>>, vector<1x224xf32>
    tpu.vector_store %arg11[%c18, %c0_80], %66 {strides = array<i32>} : memref<152x224xf32, #tpu.memory_space<vmem>>, vector<1x224xf32>,
    %c31 = arith.constant 31 : index
    %c0_81 = arith.constant 0 : index
    %70 = vector.load %arg11[%c31, %c0_81] : memref<152x224xf32, #tpu.memory_space<vmem>>, vector<1x224xf32>
    tpu.vector_store %arg11[%c31, %c0_81], %66 {strides = array<i32>} : memref<152x224xf32, #tpu.memory_space<vmem>>, vector<1x224xf32>,
    %c36 = arith.constant 36 : index
    %c0_82 = arith.constant 0 : index
    %71 = vector.load %arg11[%c36, %c0_82] : memref<152x224xf32, #tpu.memory_space<vmem>>, vector<1x224xf32>
    tpu.vector_store %arg11[%c36, %c0_82], %66 {strides = array<i32>} : memref<152x224xf32, #tpu.memory_space<vmem>>, vector<1x224xf32>,
    %c49 = arith.constant 49 : index
    %c0_83 = arith.constant 0 : index
    %72 = vector.load %arg11[%c49, %c0_83] : memref<152x224xf32, #tpu.memory_space<vmem>>, vector<1x224xf32>
    tpu.vector_store %arg11[%c49, %c0_83], %66 {strides = array<i32>} : memref<152x224xf32, #tpu.memory_space<vmem>>, vector<1x224xf32>,
    %c54 = arith.constant 54 : index
    %c0_84 = arith.constant 0 : index
    %73 = vector.load %arg11[%c54, %c0_84] : memref<152x224xf32, #tpu.memory_space<vmem>>, vector<1x224xf32>
    tpu.vector_store %arg11[%c54, %c0_84], %66 {strides = array<i32>} : memref<152x224xf32, #tpu.memory_space<vmem>>, vector<1x224xf32>,
    %c67 = arith.constant 67 : index
    %c0_85 = arith.constant 0 : index
    %74 = vector.load %arg11[%c67, %c0_85] : memref<152x224xf32, #tpu.memory_space<vmem>>, vector<1x224xf32>
    tpu.vector_store %arg11[%c67, %c0_85], %66 {strides = array<i32>} : memref<152x224xf32, #tpu.memory_space<vmem>>, vector<1x224xf32>,
    %c72 = arith.constant 72 : index
    %c0_86 = arith.constant 0 : index
    %75 = vector.load %arg11[%c72, %c0_86] : memref<152x224xf32, #tpu.memory_space<vmem>>, vector<1x224xf32>
    tpu.vector_store %arg11[%c72, %c0_86], %66 {strides = array<i32>} : memref<152x224xf32, #tpu.memory_space<vmem>>, vector<1x224xf32>,
    %c85 = arith.constant 85 : index
    %c0_87 = arith.constant 0 : index
    %76 = vector.load %arg11[%c85, %c0_87] : memref<152x224xf32, #tpu.memory_space<vmem>>, vector<1x224xf32>
    tpu.vector_store %arg11[%c85, %c0_87], %66 {strides = array<i32>} : memref<152x224xf32, #tpu.memory_space<vmem>>, vector<1x224xf32>,
    %c90 = arith.constant 90 : index
    %c0_88 = arith.constant 0 : index
    %77 = vector.load %arg11[%c90, %c0_88] : memref<152x224xf32, #tpu.memory_space<vmem>>, vector<1x224xf32>
    tpu.vector_store %arg11[%c90, %c0_88], %66 {strides = array<i32>} : memref<152x224xf32, #tpu.memory_space<vmem>>, vector<1x224xf32>,
    %c103 = arith.constant 103 : index
    %c0_89 = arith.constant 0 : index
    %78 = vector.load %arg11[%c103, %c0_89] : memref<152x224xf32, #tpu.memory_space<vmem>>, vector<1x224xf32>
    tpu.vector_store %arg11[%c103, %c0_89], %66 {strides = array<i32>} : memref<152x224xf32, #tpu.memory_space<vmem>>, vector<1x224xf32>,
    %c108 = arith.constant 108 : index
    %c0_90 = arith.constant 0 : index
    %79 = vector.load %arg11[%c108, %c0_90] : memref<152x224xf32, #tpu.memory_space<vmem>>, vector<1x224xf32>
    tpu.vector_store %arg11[%c108, %c0_90], %66 {strides = array<i32>} : memref<152x224xf32, #tpu.memory_space<vmem>>, vector<1x224xf32>,
    %c121 = arith.constant 121 : index
    %c0_91 = arith.constant 0 : index
    %80 = vector.load %arg11[%c121, %c0_91] : memref<152x224xf32, #tpu.memory_space<vmem>>, vector<1x224xf32>
    tpu.vector_store %arg11[%c121, %c0_91], %66 {strides = array<i32>} : memref<152x224xf32, #tpu.memory_space<vmem>>, vector<1x224xf32>,
    %c126 = arith.constant 126 : index
    %c0_92 = arith.constant 0 : index
    %81 = vector.load %arg11[%c126, %c0_92] : memref<152x224xf32, #tpu.memory_space<vmem>>, vector<1x224xf32>
    tpu.vector_store %arg11[%c126, %c0_92], %66 {strides = array<i32>} : memref<152x224xf32, #tpu.memory_space<vmem>>, vector<1x224xf32>,
    %c139 = arith.constant 139 : index
    %c0_93 = arith.constant 0 : index
    %82 = vector.load %arg11[%c139, %c0_93] : memref<152x224xf32, #tpu.memory_space<vmem>>, vector<1x224xf32>
    tpu.vector_store %arg11[%c139, %c0_93], %66 {strides = array<i32>} : memref<152x224xf32, #tpu.memory_space<vmem>>, vector<1x224xf32>,
    %c0_94 = arith.constant 0 : index
    %c0_95 = arith.constant 0 : index
    %83 = vector.load %arg7[%c0_94, %c0_95] : memref<1x192xf32, #tpu.memory_space<vmem>>, vector<1x192xf32>
    %c0_96 = arith.constant 0 : index
    %c0_97 = arith.constant 0 : index
    %84 = vector.load %arg11[%c0_96, %c0_97] : memref<152x224xf32, #tpu.memory_space<vmem>>, vector<144x224xf32>
    %c0_98 = arith.constant 0 : index
    %c0_99 = arith.constant 0 : index
    %c0_100 = arith.constant 0 : index
    %85 = vector.load %arg4[%c0_98, %c0_99, %c0_100] : memref<3x224x192xf32, #tpu.memory_space<vmem>>, vector<1x224x192xf32>
    %86 = vector.shape_cast %85 : vector<1x224x192xf32> to vector<224x192xf32>
    %cst_101 = arith.constant dense<0.000000e+00> : vector<144x192xf32>
    %87 = tpu.matmul %84, %86, %cst_101 {dimension_numbers = #tpu.dot_dimension_numbers<[1], [0], [0], [1], [0, 0, 1, 1], [], []>} : vector<144x224xf32>, vector<224x192xf32>, vector<144x192xf32> -> vector<144x192xf32>
    %88 = vector.broadcast %83 : vector<1x192xf32> to vector<144x192xf32>
    %89 = arith.addf %88, %87 : vector<144x192xf32>
    %c1_102 = arith.constant 1 : index
    %c0_103 = arith.constant 0 : index
    %90 = vector.load %arg11[%c1_102, %c0_103] : memref<152x224xf32, #tpu.memory_space<vmem>>, vector<144x224xf32>
    %c1_104 = arith.constant 1 : index
    %c0_105 = arith.constant 0 : index
    %c0_106 = arith.constant 0 : index
    %91 = vector.load %arg4[%c1_104, %c0_105, %c0_106] : memref<3x224x192xf32, #tpu.memory_space<vmem>>, vector<1x224x192xf32>
    %92 = vector.shape_cast %91 : vector<1x224x192xf32> to vector<224x192xf32>
    %cst_107 = arith.constant dense<0.000000e+00> : vector<144x192xf32>
    %93 = tpu.matmul %90, %92, %cst_107 {dimension_numbers = #tpu.dot_dimension_numbers<[1], [0], [0], [1], [0, 0, 1, 1], [], []>} : vector<144x224xf32>, vector<224x192xf32>, vector<144x192xf32> -> vector<144x192xf32>
    %94 = arith.addf %89, %93 : vector<144x192xf32>
    %c2_108 = arith.constant 2 : index
    %c0_109 = arith.constant 0 : index
    %95 = vector.load %arg11[%c2_108, %c0_109] : memref<152x224xf32, #tpu.memory_space<vmem>>, vector<144x224xf32>
    %c2_110 = arith.constant 2 : index
    %c0_111 = arith.constant 0 : index
    %c0_112 = arith.constant 0 : index
    %96 = vector.load %arg4[%c2_110, %c0_111, %c0_112] : memref<3x224x192xf32, #tpu.memory_space<vmem>>, vector<1x224x192xf32>
    %97 = vector.shape_cast %96 : vector<1x224x192xf32> to vector<224x192xf32>
    %cst_113 = arith.constant dense<0.000000e+00> : vector<144x192xf32>
    %98 = tpu.matmul %95, %97, %cst_113 {dimension_numbers = #tpu.dot_dimension_numbers<[1], [0], [0], [1], [0, 0, 1, 1], [], []>} : vector<144x224xf32>, vector<224x192xf32>, vector<144x192xf32> -> vector<144x192xf32>
    %99 = arith.addf %94, %98 : vector<144x192xf32>
    %c0_114 = arith.constant 0 : index
    %c0_115 = arith.constant 0 : index
    %100 = vector.load %arg8[%c0_114, %c0_115] : memref<144x192xf32, #tpu.memory_space<vmem>>, vector<144x192xf32>
    tpu.vector_store %arg8[%c0_114, %c0_115], %99 {strides = array<i32>} : memref<144x192xf32, #tpu.memory_space<vmem>>, vector<144x192xf32>,
    return
  }
  func.func @transform_0(%arg0: i32) -> (i32, i32, i32) {
    %c0_i32 = arith.constant 0 : i32
    %c0_i32_0 = arith.constant 0 : i32
    %c0_i32_1 = arith.constant 0 : i32
    return %arg0, %c0_i32, %c0_i32_0 : i32, i32, i32
  }
  func.func @transform_1(%arg0: i32) -> (i32, i32, i32) {
    %c0_i32 = arith.constant 0 : i32
    %c0_i32_0 = arith.constant 0 : i32
    %c0_i32_1 = arith.constant 0 : i32
    %c0_i32_2 = arith.constant 0 : i32
    return %c0_i32, %c0_i32_0, %c0_i32_1 : i32, i32, i32
  }
  func.func @transform_2(%arg0: i32) -> (i32, i32, i32) {
    %c0_i32 = arith.constant 0 : i32
    %c0_i32_0 = arith.constant 0 : i32
    %c0_i32_1 = arith.constant 0 : i32
    %c0_i32_2 = arith.constant 0 : i32
    return %c0_i32, %c0_i32_0, %c0_i32_1 : i32, i32, i32
  }
  func.func @transform_3(%arg0: i32) -> (i32, i32, i32) {
    %c0_i32 = arith.constant 0 : i32
    %c0_i32_0 = arith.constant 0 : i32
    %c0_i32_1 = arith.constant 0 : i32
    %c0_i32_2 = arith.constant 0 : i32
    return %c0_i32, %c0_i32_0, %c0_i32_1 : i32, i32, i32
  }
  func.func @transform_4(%arg0: i32) -> (i32, i32) {
    %c0_i32 = arith.constant 0 : i32
    %c0_i32_0 = arith.constant 0 : i32
    %c0_i32_1 = arith.constant 0 : i32
    return %c0_i32, %c0_i32_0 : i32, i32
  }
  func.func @transform_5(%arg0: i32) -> (i32, i32) {
    %c0_i32 = arith.constant 0 : i32
    %c0_i32_0 = arith.constant 0 : i32
    %c0_i32_1 = arith.constant 0 : i32
    return %c0_i32, %c0_i32_0 : i32, i32
  }
  func.func @transform_6(%arg0: i32) -> (i32, i32) {
    %c0_i32 = arith.constant 0 : i32
    %c0_i32_0 = arith.constant 0 : i32
    %c0_i32_1 = arith.constant 0 : i32
    return %c0_i32, %c0_i32_0 : i32, i32
  }
  func.func @transform_7(%arg0: i32) -> (i32, i32) {
    %c0_i32 = arith.constant 0 : i32
    %c0_i32_0 = arith.constant 0 : i32
    return %arg0, %c0_i32 : i32, i32
  }
}

</mosaic_0001>

<bundles_post_ra>
// kernel: tile.23
= control target key start
LH: loop header
LB: loop body
LE: loop exit
PB: predicated region body
PF: predicated region fallthrough
CT: control target
= control target key end

     0   :  { %s28_s0 = inlined_call_operand.vmem [shape: f32[16], index: 0, kind: input, shape index: {}]   ;;  %s29_s1 = inlined_call_operand.vmem [shape: f32[12,16], index: 1, kind: output, shape index: {}]  }
   0x1   :  { %v4_v0 = vld [vmem:[%s28_s0] ss:$0 sm:$0xff] }
   0x2   :  { %5 = vst [vmem:[%s29_s1] sm:$0xff] %v4_v0  ;;  %8 = vst [vmem:[%s29_s1 + $0x8] sm:$0xff] %v4_v0 }

// kernel: tile.24
= control target key start
LH: loop header
LB: loop body
LE: loop exit
PB: predicated region body
PF: predicated region fallthrough
CT: control target
= control target key end

     0   :  { %s71_s10 = smov 112   ;;  %s72_s11 = smov 80   ;;  %vm4_vm0 = vcmask 130048   ;;  %vm10_vm1 = vcmask 1048448   ;;  %vm16_vm2 = vcmask 917248   ;;  %vm22_vm3 = vcmask 786048   ;;  %s115_s0 = inlined_call_operand.vmem [shape: f32[12,16], index: 0, kind: input, shape index: {}]   ;;  %s116_s1 = inlined_call_operand.vmem [shape: f32[192], index: 1, kind: output, shape index: {}]  }
   0x1   :  { %v57_v0 = vld [vmem:[%s115_s0 + $0x7] sm:$0x1]   ;;  %v59_v1 = vld [vmem:[%s115_s0 + $0x5] sm:$0x1]   ;;  %v58_v2 = vld [vmem:[%s115_s0 + $0x6] sm:$0x1]  }
   0x2   :  { %8 = vrot.lane.b32.xlu0 %v57_v0, %s71_s10  ;;  %20 = vrot.lane.b32.xlu1 %v59_v1, %s72_s11  ;;  %v60_v3 = vld [vmem:[%s115_s0 + $0x4] sm:$0x1]   ;;  %s31_s16 = smov 3  ;;  %s38_s17 = smov 3  ;;  %vm28_vm4 = vcmask 654848   ;;  %vm35_vm5 = vcmask 523648  }
   0x3   :  { %s73_s18 = smov 96   ;;  %s74_s19 = smov 64   ;;  %v61_v4 = vld [vmem:[%s115_s0 + $0x3] ss:$8 sm:%s31_s16]   ;;  %v62_v5 = vld [vmem:[%s115_s0 + $0x2] ss:$8 sm:%s38_s17]  }
   0x4   :  { %s2_s22 = smov 3  ;;  %s45_s27 = smov 3  ;;  %vm42_vm6 = vcmask 392448   ;;  %vm49_vm7 = vcmask 261248  }
   0x5   :  { %v3_v6 = vld [vmem:[%s115_s0] ss:$8 sm:%s2_s22]   ;;  %s75_s28 = smov 48   ;;  %s76_s29 = smov 32   ;;  %v63_v7 = vld [vmem:[%s115_s0 + $0x1] ss:$8 sm:%s45_s27]  }
   0x6   :  { %14 = vrot.lane.b32.xlu0 %v58_v2, %s73_s18  ;;  %26 = vrot.lane.b32.xlu1 %v60_v3, %s74_s19  ;;  %5 = vst.msk [vmem:[#allocation0] sm:$0x3] %vm4_vm0, %v3_v6   ;;  %s77_s0 = smov 16  }
   0xa   :  { %33 = vrot.lane.b32.xlu0 %v61_v4, %s75_s28  ;;  %40 = vrot.lane.b32.xlu1 %v62_v5, %s76_s29 }
   0xe   :  { %47 = vrot.lane.b32.xlu0 %v63_v7, %s77_s0 }
  0x74   :  { %v9_v8 = vpop.permute.xlu0 %8   ;;  %v21_v9 = vpop.permute.xlu1 %20  }
  0x75   :  { %11 = vst.msk [vmem:[#allocation0] sm:$0x1] %vm10_vm1, %v9_v8  }
  0x78   :  { %v15_v10 = vpop.permute.xlu0 %14   ;;  %v27_v11 = vpop.permute.xlu1 %26  }
  0x79   :  { %17 = vst.msk [vmem:[#allocation0] sm:$0x1] %vm16_vm2, %v15_v10  }
  0x7a   :  { %23 = vst.msk [vmem:[#allocation0] sm:$0x1] %vm22_vm3, %v21_v9  }
  0x7b   :  { %29 = vst.msk [vmem:[#allocation0] sm:$0x1] %vm28_vm4, %v27_v11  }
  0x7c   :  { %v34_v12 = vpop.permute.xlu0 %33   ;;  %v41_v13 = vpop.permute.xlu1 %40  }
  0x7d   :  { %36 = vst.msk [vmem:[#allocation0] sm:$0x3] %vm35_vm5, %v34_v12  }
  0x7e   :  { %43 = vst.msk [vmem:[#allocation0] sm:$0x3] %vm42_vm6, %v41_v13  }
  0x80   :  { %v48_v14 = vpop.permute.xlu0 %47  }
  0x81   :  { %50 = vst.msk [vmem:[#allocation0] sm:$0x3] %vm49_vm7, %v48_v14  }
  0x88   :  { %v54_v15 = vld [vmem:[#allocation0] sm:$0x3] }
  0x89   :  { %56 = vst [vmem:[%s116_s1] sm:$0x3] %v54_v15 }

// kernel: tile.18
= control target key start
LH: loop header
LB: loop body
LE: loop exit
PB: predicated region body
PF: predicated region fallthrough
CT: control target
= control target key end

     0   :  { %s28_s0 = inlined_call_operand.vmem [shape: f32[16], index: 0, kind: input, shape index: {}]   ;;  %s29_s1 = inlined_call_operand.vmem [shape: f32[16,16], index: 1, kind: output, shape index: {}]  }
   0x1   :  { %v4_v0 = vld [vmem:[%s28_s0] ss:$0 sm:$0xff] }
   0x2   :  { %5 = vst [vmem:[%s29_s1] sm:$0xff] %v4_v0  ;;  %8 = vst [vmem:[%s29_s1 + $0x8] sm:$0xff] %v4_v0 }

// kernel: tile.19
= control target key start
LH: loop header
LB: loop body
LE: loop exit
PB: predicated region body
PF: predicated region fallthrough
CT: control target
= control target key end

     0   :  { %s7_s6 = smov 3  ;;  %s21_s9 = smov 3  ;;  %vm4_vm0 = vcmask 130048   ;;  %vm11_vm1 = vcmask 1048448   ;;  %vm18_vm2 = vcmask 917248   ;;  %vm25_vm3 = vcmask 786048   ;;  %s128_s0 = inlined_call_operand.vmem [shape: f32[16,16], index: 0, kind: input, shape index: {}]   ;;  %s129_s1 = inlined_call_operand.vmem [shape: f32[1,256], index: 1, kind: output, shape index: {}]  }
   0x1   :  { %v66_v0 = vld [vmem:[%s128_s0 + $0x7] ss:$8 sm:%s7_s6]   ;;  %s81_s10 = smov 112   ;;  %v68_v1 = vld [vmem:[%s128_s0 + $0x5] ss:$8 sm:%s21_s9]   ;;  %s14_s13 = smov 3 }
   0x2   :  { %9 = vrot.lane.b32.xlu0 %v66_v0, %s81_s10  ;;  %s82_s14 = smov 80   ;;  %v67_v2 = vld [vmem:[%s128_s0 + $0x6] ss:$8 sm:%s14_s13]   ;;  %s28_s17 = smov 3  ;;  %vm32_vm4 = vcmask 654848   ;;  %vm39_vm5 = vcmask 523648  }
   0x3   :  { %23 = vrot.lane.b32.xlu1 %v68_v1, %s82_s14  ;;  %v69_v3 = vld [vmem:[%s128_s0 + $0x4] ss:$8 sm:%s28_s17]   ;;  %s35_s20 = smov 3  ;;  %s42_s21 = smov 3  ;;  %vm46_vm6 = vcmask 392448   ;;  %vm53_vm7 = vcmask 261248  }
   0x4   :  { %s83_s22 = smov 96   ;;  %s84_s23 = smov 64   ;;  %v70_v4 = vld [vmem:[%s128_s0 + $0x3] ss:$8 sm:%s35_s20]   ;;  %v71_v5 = vld [vmem:[%s128_s0 + $0x2] ss:$8 sm:%s42_s21]  }
   0x5   :  { %s2_s26 = smov 3  ;;  %s49_s29 = smov 3 }
   0x6   :  { %16 = vrot.lane.b32.xlu0 %v67_v2, %s83_s22  ;;  %v3_v6 = vld [vmem:[%s128_s0] ss:$8 sm:%s2_s26]   ;;  %s85_s3 = smov 48   ;;  %s86_s4 = smov 32  }
   0x7   :  { %30 = vrot.lane.b32.xlu1 %v69_v3, %s84_s23  ;;  %5 = vst.msk [vmem:[#allocation0] ss:$8 sm:$0x3] %vm4_vm0, %v3_v6   ;;  %v72_v7 = vld [vmem:[%s128_s0 + $0x1] ss:$8 sm:%s49_s29]   ;;  %s87_s0 = smov 16  }
   0xa   :  { %37 = vrot.lane.b32.xlu0 %v70_v4, %s85_s3 }
   0xb   :  { %44 = vrot.lane.b32.xlu1 %v71_v5, %s86_s4 }
   0xe   :  { %51 = vrot.lane.b32.xlu0 %v72_v7, %s87_s0 }
  0x74   :  { %v10_v8 = vpop.permute.xlu0 %9  }
  0x75   :  { %12 = vst.msk [vmem:[#allocation0] ss:$8 sm:$0x3] %vm11_vm1, %v10_v8   ;;  %v24_v9 = vpop.permute.xlu1 %23  }
  0x78   :  { %v17_v10 = vpop.permute.xlu0 %16  }
  0x79   :  { %19 = vst.msk [vmem:[#allocation0] ss:$8 sm:$0x3] %vm18_vm2, %v17_v10   ;;  %v31_v11 = vpop.permute.xlu1 %30  }
  0x7a   :  { %26 = vst.msk [vmem:[#allocation0] ss:$8 sm:$0x3] %vm25_vm3, %v24_v9  }
  0x7b   :  { %33 = vst.msk [vmem:[#allocation0] ss:$8 sm:$0x3] %vm32_vm4, %v31_v11  }
  0x7c   :  { %v38_v12 = vpop.permute.xlu0 %37  }
  0x7d   :  { %40 = vst.msk [vmem:[#allocation0] ss:$8 sm:$0x3] %vm39_vm5, %v38_v12   ;;  %v45_v13 = vpop.permute.xlu1 %44  }
  0x7e   :  { %47 = vst.msk [vmem:[#allocation0] ss:$8 sm:$0x3] %vm46_vm6, %v45_v13  }
  0x80   :  { %v52_v14 = vpop.permute.xlu0 %51  }
  0x81   :  { %54 = vst.msk [vmem:[#allocation0] ss:$8 sm:$0x3] %vm53_vm7, %v52_v14  }
  0x88   :  { %v58_v15 = vld [vmem:[#allocation0] sm:$0x1]  ;;  %v62_v16 = vld [vmem:[#allocation0 + $0x8] sm:$0x1] }
  0x89   :  { %60 = vst [vmem:[%s129_s1] sm:$0x1] %v58_v15  ;;  %73 = vst [vmem:[%s129_s1 + $0x1] sm:$0x1] %v62_v16 }

// kernel: tile.29
= control target key start
LH: loop header
LB: loop body
LE: loop exit
PB: predicated region body
PF: predicated region fallthrough
CT: control target
= control target key end

     0   :  { %s77_s10 = smov 112   ;;  %s78_s11 = smov 80   ;;  %vm4_vm0 = vcmask 130048   ;;  %vm10_vm1 = vcmask 1048448   ;;  %vm16_vm2 = vcmask 917248   ;;  %vm22_vm3 = vcmask 786048   ;;  %s124_s0 = inlined_call_operand.vmem [shape: f32[12,16], index: 0, kind: input, shape index: {}]   ;;  %s125_s1 = inlined_call_operand.vmem [shape: f32[1,192], index: 1, kind: output, shape index: {}]  }
   0x1   :  { %v62_v0 = vld [vmem:[%s124_s0 + $0x7] sm:$0x1]   ;;  %v64_v1 = vld [vmem:[%s124_s0 + $0x5] sm:$0x1]   ;;  %v63_v2 = vld [vmem:[%s124_s0 + $0x6] sm:$0x1]  }
   0x2   :  { %8 = vrot.lane.b32.xlu0 %v62_v0, %s77_s10  ;;  %20 = vrot.lane.b32.xlu1 %v64_v1, %s78_s11  ;;  %v65_v3 = vld [vmem:[%s124_s0 + $0x4] sm:$0x1]   ;;  %s31_s16 = smov 3  ;;  %s38_s17 = smov 3  ;;  %vm28_vm4 = vcmask 654848   ;;  %vm35_vm5 = vcmask 523648  }
   0x3   :  { %s79_s18 = smov 96   ;;  %s80_s19 = smov 64   ;;  %v66_v4 = vld [vmem:[%s124_s0 + $0x3] ss:$8 sm:%s31_s16]   ;;  %v67_v5 = vld [vmem:[%s124_s0 + $0x2] ss:$8 sm:%s38_s17]  }
   0x4   :  { %s2_s22 = smov 3  ;;  %s45_s27 = smov 3  ;;  %vm42_vm6 = vcmask 392448   ;;  %vm49_vm7 = vcmask 261248  }
   0x5   :  { %v3_v6 = vld [vmem:[%s124_s0] ss:$8 sm:%s2_s22]   ;;  %s81_s28 = smov 48   ;;  %s82_s29 = smov 32   ;;  %v68_v7 = vld [vmem:[%s124_s0 + $0x1] ss:$8 sm:%s45_s27]  }
   0x6   :  { %14 = vrot.lane.b32.xlu0 %v63_v2, %s79_s18  ;;  %26 = vrot.lane.b32.xlu1 %v65_v3, %s80_s19  ;;  %5 = vst.msk [vmem:[#allocation0] ss:$8 sm:$0x3] %vm4_vm0, %v3_v6   ;;  %s83_s0 = smov 16  }
   0xa   :  { %33 = vrot.lane.b32.xlu0 %v66_v4, %s81_s28  ;;  %40 = vrot.lane.b32.xlu1 %v67_v5, %s82_s29 }
   0xe   :  { %47 = vrot.lane.b32.xlu0 %v68_v7, %s83_s0 }
  0x74   :  { %v9_v8 = vpop.permute.xlu0 %8   ;;  %v21_v9 = vpop.permute.xlu1 %20  }
  0x75   :  { %11 = vst.msk [vmem:[#allocation0] sm:$0x1] %vm10_vm1, %v9_v8  }
  0x78   :  { %v15_v10 = vpop.permute.xlu0 %14   ;;  %v27_v11 = vpop.permute.xlu1 %26  }
  0x79   :  { %17 = vst.msk [vmem:[#allocation0] sm:$0x1] %vm16_vm2, %v15_v10  }
  0x7a   :  { %23 = vst.msk [vmem:[#allocation0] sm:$0x1] %vm22_vm3, %v21_v9  }
  0x7b   :  { %29 = vst.msk [vmem:[#allocation0] sm:$0x1] %vm28_vm4, %v27_v11  }
  0x7c   :  { %v34_v12 = vpop.permute.xlu0 %33   ;;  %v41_v13 = vpop.permute.xlu1 %40  }
  0x7d   :  { %36 = vst.msk [vmem:[#allocation0] ss:$8 sm:$0x3] %vm35_vm5, %v34_v12  }
  0x7e   :  { %43 = vst.msk [vmem:[#allocation0] ss:$8 sm:$0x3] %vm42_vm6, %v41_v13  }
  0x80   :  { %v48_v14 = vpop.permute.xlu0 %47  }
  0x81   :  { %50 = vst.msk [vmem:[#allocation0] ss:$8 sm:$0x3] %vm49_vm7, %v48_v14  }
  0x88   :  { %v54_v15 = vld [vmem:[#allocation0] sm:$0x1]  ;;  %v58_v16 = vld [vmem:[#allocation0 + $0x8] sm:$0x1] }
  0x89   :  { %56 = vst [vmem:[%s125_s1] sm:$0x1] %v54_v15  ;;  %69 = vst [vmem:[%s125_s1 + $0x1] sm:$0x1] %v58_v16 }

// kernel: net_pallas.1
= control target key start
LH: loop header
LB: loop body
LE: loop exit
PB: predicated region body
PF: predicated region fallthrough
CT: control target
= control target key end

     0   :  { %s5170_s24 = smov 0   ;;  %s7734_s0 = inlined_call_operand.vmem [shape: f32[16,16,16], index: 0, kind: input, shape index: {}]   ;;  %s7735_s1 = inlined_call_operand.vmem [shape: f32[3,16,256], index: 1, kind: input, shape index: {}]   ;;  %s7736_s2 = inlined_call_operand.vmem [shape: f32[3,256,224], index: 2, kind: input, shape index: {}]   ;;  %s7737_s3 = inlined_call_operand.vmem [shape: f32[3,224,192], index: 3, kind: input, shape index: {}]   ;;  %s7738_s4 = inlined_call_operand.vmem [shape: f32[1,256], index: 4, kind: input, shape index: {}]   ;;  %s7739_s5 = inlined_call_operand.vmem [shape: f32[1,224], index: 5, kind: input, shape index: {}]   ;;  %s7740_s6 = inlined_call_operand.vmem [shape: f32[1,192], index: 6, kind: input, shape index: {}]   ;;  %s7741_s7 = inlined_call_operand.vmem [shape: f32[288,192], index: 7, kind: output, shape index: {}]  }
   0x1 LB: > { %s4002_s25 = sadd.s32 4294967295, %s5127_s24   ;;  %p4006_p0 = scmp.ge.s32.totalorder %s5127_s24, 1  ;;  %s5127_s24 = sphi %s5170_s24, %s17_s24  }
   0x2   : > { %p239_p1 = scmp.lt.s32.totalorder %s5127_s24, 3 }
   0x4   : > { %p240_p2 = pnand %p4006_p0, %p239_p1 }
   0x6   : > { %243 = sbr.rel (%p240_p2) target bundleno = 1087 (0x43f), region = 48 }
   0xd   : > { %v4045_v0 = vld [vmem:[%s7735_s1 + $0x28] sm:$0xff]  ;;  %v4047_v1 = vld [vmem:[%s7735_s1 + $0x38] sm:$0xff]  ;;  %v4044_v2 = vld [vmem:[%s7735_s1 + $0x20] sm:$0xff]  ;;  %s5189_s9 = sshll.u32 %s4002_s25, 3  ;;  %vm287_vm0 = vcmask 130048   ;;  %v5129_v5 = vmov 0.0  }
   0xe   : > { %v4390_v3 = vpack.c.bf16 %v4047_v1, %v4045_v0  ;;  %v4046_v4 = vld [vmem:[%s7735_s1 + $0x30] sm:$0xff]  ;;  %789 = vmatprep.mubr.f32.mxu0 %v5129_v5  ;;  %346 = vst [vmem:[#allocation3 + $0x120] sm:$0xff] %v5129_v5  ;;  %347 = vst [vmem:[#allocation3 + $0x128] sm:$0xff] %v5129_v5  ;;  %v4067_v6 = vld [vmem:[%s7735_s1 + $0x48] sm:$0xff]  ;;  %p274_p3 = scmp.lt.s32.totalorder %s5189_s9, 15  ;;  %492 = vmatprep.mubr.f32.mxu1 %v5129_v5  ;;  %vm1718_vm1 = vcmask 1045504  }
   0xf   : > { %348 = vst [vmem:[#allocation4 + $0x120] sm:$0xff] %v5129_v5  ;;  %v4069_v7 = vld [vmem:[%s7735_s1 + $0x58] sm:$0xff]  ;;  %288 = vst.msk [vmem:[#allocation2] sm:$0xff] %vm287_vm0, %v5129_v5  ;;  %v4392_v8 = vpack.c.bf16 %v4046_v4, %v4044_v2  ;;  %v371_v10 = vld [vmem:[%s7735_s1 + $0x8] sm:$0xff]  ;;  %vm2111_vm2 = vcmask 1043456   ;;  %vm349_vm4 = vcmask 785408  }
  0x10   : > { %289 = vst.msk [vmem:[#allocation2 + $0x8] sm:$0xff] %vm287_vm0, %v5129_v5  ;;  %290 = vst.msk [vmem:[#allocation2 + $0x10] sm:$0xff] %vm287_vm0, %v5129_v5  ;;  %v4394_v9 = vpack.c.bf16 %v4069_v7, %v4067_v6  ;;  %4391 = vmatprep.subr.bf16.mxu0 %v4390_v3  ;;  %s7905_s9 = smov (!%p274_p3, %s5189_s9), 15  ;;  %v373_v11 = vld [vmem:[%s7735_s1 + $0x18] sm:$0xff]  ;;  %v370_v12 = vld [vmem:[%s7735_s1] sm:$0xff]  ;;  %vm2577_vm5 = vcmask 785409  }
  0x11   : > { %291 = vst.msk [vmem:[#allocation2 + $0x18] sm:$0xff] %vm287_vm0, %v5129_v5  ;;  %292 = vst.msk [vmem:[#allocation2 + $0x20] sm:$0xff] %vm287_vm0, %v5129_v5  ;;  %v372_v13 = vld [vmem:[%s7735_s1 + $0x10] sm:$0xff]  ;;  %4393 = vmatpush1.bf16.msra.mxu0 %v4392_v8  ;;  %v4386_v14 = vpack.c.bf16 %v373_v11, %v371_v10  ;;  %s4384_s26 = sshll.u32 %s7905_s9, 4  ;;  %v4066_v19 = vld [vmem:[%s7735_s1 + $0x40] sm:$0xff]  ;;  %vm2467_vm6 = vcmask 1040384  }
  0x12   : > { %293 = vst.msk [vmem:[#allocation2 + $0x28] sm:$0xff] %vm287_vm0, %v5129_v5  ;;  %294 = vst.msk [vmem:[#allocation2 + $0x30] sm:$0xff] %vm287_vm0, %v5129_v5  ;;  %v4388_v15 = vpack.c.bf16 %v372_v13, %v370_v12  ;;  %4395 = vmatprep.subr.bf16.mxu0 %v4394_v9  ;;  %s5262_s29 = scalar_lea.vmem %s7734_s0, %s4384_s26  ;;  %v4068_v20 = vld [vmem:[%s7735_s1 + $0x50] sm:$0xff]  ;;  %v1294_v46 = vld [vmem:[%s7736_s2 + $0x8] sm:$0xff]  ;;  %vm3167_vm7 = vcmask 1046528   ;;  %vm2614_vm8 = vcmask 778240  }
  0x13   : > { %295 = vst.msk [vmem:[#allocation2 + $0x38] sm:$0xff] %vm287_vm0, %v5129_v5  ;;  %296 = vst.msk [vmem:[#allocation2 + $0x40] sm:$0xff] %vm287_vm0, %v5129_v5  ;;  %4387 = vmatprep.subr.bf16.mxu1 %v4386_v14  ;;  %v307_v16 = vld [vmem:[%s5262_s29] sm:$0xff]  ;;  %v308_v17 = vld [vmem:[%s5262_s29 + $0x8] sm:$0xff]  ;;  %v4396_v34 = vpack.c.bf16 %v4068_v20, %v4066_v19  ;;  %s280_s21 = smul.u32 18, %s4002_s25  ;;  %vm3908_vm9 = vcmask 523264  }
  0x14   : > { %297 = vst.msk [vmem:[#allocation2 + $0x48] sm:$0xff] %vm287_vm0, %v5129_v5  ;;  %298 = vst.msk [vmem:[#allocation2 + $0x50] sm:$0xff] %vm287_vm0, %v5129_v5  ;;  %v4012_v18 = vld [vmem:[%s5262_s29 + $0x10] sm:$0xff]  ;;  %4389 = vmatpush1.bf16.msra.mxu1 %v4388_v15  ;;  %v4013_v21 = vld [vmem:[%s5262_s29 + $0x18] sm:$0xff] }
  0x15   : > { %299 = vst.msk [vmem:[#allocation2 + $0x58] sm:$0xff] %vm287_vm0, %v5129_v5  ;;  %300 = vst.msk [vmem:[#allocation2 + $0x60] sm:$0xff] %vm287_vm0, %v5129_v5  ;;  %v4014_v22 = vld [vmem:[%s5262_s29 + $0x20] sm:$0xff]  ;;  %v4015_v23 = vld [vmem:[%s5262_s29 + $0x28] sm:$0xff]  ;;  %p281_p4 = scmp.lt.s32.totalorder %s280_s21, 35 }
  0x16   : > { %301 = vst.msk [vmem:[#allocation2 + $0x68] sm:$0xff] %vm287_vm0, %v5129_v5  ;;  %302 = vst.msk [vmem:[#allocation2 + $0x70] sm:$0xff] %vm287_vm0, %v5129_v5  ;;  %v4016_v24 = vld [vmem:[%s5262_s29 + $0x30] sm:$0xff]  ;;  %v4017_v25 = vld [vmem:[%s5262_s29 + $0x38] sm:$0xff] }
  0x17   : > { %303 = vst.msk [vmem:[#allocation2 + $0x78] sm:$0xff] %vm287_vm0, %v5129_v5  ;;  %304 = vst.msk [vmem:[#allocation2 + $0x80] sm:$0xff] %vm287_vm0, %v5129_v5  ;;  %v4018_v26 = vld [vmem:[%s5262_s29 + $0x40] sm:$0xff]  ;;  %v4019_v27 = vld [vmem:[%s5262_s29 + $0x48] sm:$0xff]  ;;  %s7907_s21 = smov (!%p281_p4, %s280_s21), 35 }
  0x18   : > { %305 = vst.msk [vmem:[#allocation2 + $0x88] sm:$0xff] %vm287_vm0, %v5129_v5  ;;  %306 = vst.msk [vmem:[#allocation2 + $0x90] sm:$0xff] %vm287_vm0, %v5129_v5  ;;  %v4020_v28 = vld [vmem:[%s5262_s29 + $0x50] sm:$0xff]  ;;  %v4021_v29 = vld [vmem:[%s5262_s29 + $0x58] sm:$0xff]  ;;  %s4385_s26 = sshll.u32 %s7907_s21, 4 }
  0x19   : > { %309 = vst.msk [vmem:[#allocation2 + $0x1] sm:$0xff] %vm287_vm0, %v307_v16  ;;  %310 = vst.msk [vmem:[#allocation2 + $0x9] sm:$0xff] %vm287_vm0, %v308_v17  ;;  %v4022_v30 = vld [vmem:[%s5262_s29 + $0x60] sm:$0xff]  ;;  %v4023_v31 = vld [vmem:[%s5262_s29 + $0x68] sm:$0xff]  ;;  %s7634_s25 = scalar_lea.vmem %s7741_s7, %s4385_s26 }
  0x1a   : > { %314 = vst.msk [vmem:[#allocation2 + $0x13] sm:$0xff] %vm287_vm0, %v4012_v18  ;;  %315 = vst.msk [vmem:[#allocation2 + $0x1b] sm:$0xff] %vm287_vm0, %v4013_v21  ;;  %v4024_v32 = vld [vmem:[%s5262_s29 + $0x70] sm:$0xff]  ;;  %v4025_v33 = vld [vmem:[%s5262_s29 + $0x78] sm:$0xff] }
  0x1b   : > { %319 = vst.msk [vmem:[#allocation2 + $0x25] sm:$0xff] %vm287_vm0, %v4014_v22  ;;  %320 = vst.msk [vmem:[#allocation2 + $0x2d] sm:$0xff] %vm287_vm0, %v4015_v23  ;;  %v1296_v47 = vld [vmem:[%s7736_s2 + $0x18] sm:$0xff]  ;;  %v1293_v48 = vld [vmem:[%s7736_s2] sm:$0xff] }
  0x1c   : > { %324 = vst.msk [vmem:[#allocation2 + $0x37] sm:$0xff] %vm287_vm0, %v4016_v24  ;;  %325 = vst.msk [vmem:[#allocation2 + $0x3f] sm:$0xff] %vm287_vm0, %v4017_v25  ;;  %v4398_v49 = vpack.c.bf16 %v1296_v47, %v1294_v46  ;;  %v1295_v50 = vld [vmem:[%s7736_s2 + $0x10] sm:$0xff]  ;;  %v1298_v51 = vld [vmem:[%s7736_s2 + $0x28] sm:$0xff] }
  0x1d   : > { %329 = vst.msk [vmem:[#allocation2 + $0x49] sm:$0xff] %vm287_vm0, %v4018_v26  ;;  %330 = vst.msk [vmem:[#allocation2 + $0x51] sm:$0xff] %vm287_vm0, %v4019_v27  ;;  %v1300_v52 = vld [vmem:[%s7736_s2 + $0x38] sm:$0xff]  ;;  %v4400_v53 = vpack.c.bf16 %v1295_v50, %v1293_v48  ;;  %v1297_v55 = vld [vmem:[%s7736_s2 + $0x20] sm:$0xff] }
  0x1e   : > { %334 = vst.msk [vmem:[#allocation2 + $0x5b] sm:$0xff] %vm287_vm0, %v4020_v28  ;;  %335 = vst.msk [vmem:[#allocation2 + $0x63] sm:$0xff] %vm287_vm0, %v4021_v29  ;;  %v4402_v54 = vpack.c.bf16 %v1300_v52, %v1298_v51  ;;  %v1299_v56 = vld [vmem:[%s7736_s2 + $0x30] sm:$0xff]  ;;  %v1302_v57 = vld [vmem:[%s7736_s2 + $0x48] sm:$0xff]  ;;  %4399 = vmatprep.subr.bf16.mxu1 %v4398_v49 }
  0x1f   : > { %339 = vst.msk [vmem:[#allocation2 + $0x6d] sm:$0xff] %vm287_vm0, %v4022_v30  ;;  %340 = vst.msk [vmem:[#allocation2 + $0x75] sm:$0xff] %vm287_vm0, %v4023_v31  ;;  %v1304_v58 = vld [vmem:[%s7736_s2 + $0x58] sm:$0xff]  ;;  %v4404_v60 = vpack.c.bf16 %v1299_v56, %v1297_v55  ;;  %v1301_v62 = vld [vmem:[%s7736_s2 + $0x40] sm:$0xff] }
  0x20   : > { %344 = vst.msk [vmem:[#allocation2 + $0x7f] sm:$0xff] %vm287_vm0, %v4024_v32  ;;  %345 = vst.msk [vmem:[#allocation2 + $0x87] sm:$0xff] %vm287_vm0, %v4025_v33  ;;  %v648_v35 = vld [vmem:[#allocation2 + $0x1] sm:$0xff]  ;;  %v649_v36 = vld [vmem:[#allocation2 + $0x9] sm:$0xff]  ;;  %v4406_v61 = vpack.c.bf16 %v1304_v58, %v1302_v57 }
  0x21   : > { %4048 = vmatmul.mubr.msk.f32.vlgmr.msra.gmra.mrb[0].mxu0 %vm287_vm0, %v648_v35  ;;  %v650_v37 = vld [vmem:[#allocation2 + $0x11] sm:$0xff]  ;;  %v352_v38 = vld [vmem:[#allocation2] sm:$0xff]  ;;  %v353_v39 = vld [vmem:[#allocation2 + $0x8] sm:$0xff] }
  0x22   : > { %4397 = vmatpush1.bf16.msra.mxu0 %v4396_v34  ;;  %795 = vmatprep.mubr.f32.mxu0 %v5129_v5  ;;  %v651_v40 = vld [vmem:[#allocation2 + $0x19] sm:$0xff]  ;;  %v354_v41 = vld [vmem:[#allocation2 + $0x10] sm:$0xff]  ;;  %v652_v42 = vld [vmem:[#allocation2 + $0x21] sm:$0xff] }
  0x23   : > { %4026 = vmatmul.mubr.msk.f32.vlgmr.msra.gmra.mrb[0].mxu1 %vm287_vm0, %v352_v38  ;;  %v355_v43 = vld [vmem:[#allocation2 + $0x18] sm:$0xff]  ;;  %v653_v44 = vld [vmem:[#allocation2 + $0x29] sm:$0xff]  ;;  %v356_v45 = vld [vmem:[#allocation2 + $0x20] sm:$0xff] }
  0x24   : > { %498 = vmatprep.mubr.f32.mxu1 %v5129_v5  ;;  %v654_v59 = vld [vmem:[#allocation2 + $0x31] sm:$0xff]  ;;  %4401 = vmatpush1.bf16.msra.mxu1 %v4400_v53  ;;  %v357_v0 = vld [vmem:[#allocation2 + $0x28] sm:$0xff]  ;;  %v655_v3 = vld [vmem:[#allocation2 + $0x39] sm:$0xff] }
  0x25   : > { %4049 = vmatmul.mubr.msk.f32.gmra.mrb[2].mxu0 %vm287_vm0, %v649_v36  ;;  %4403 = vmatprep.subr.bf16.mxu1 %v4402_v54  ;;  %v1303_v63 = vld [vmem:[%s7736_s2 + $0x50] sm:$0xff]  ;;  %v1306_v1 = vld [vmem:[%s7736_s2 + $0x68] sm:$0xff]  ;;  %v1308_v2 = vld [vmem:[%s7736_s2 + $0x78] sm:$0xff] }
  0x26   : > { %801 = vmatprep.mubr.f32.mxu0 %v5129_v5  ;;  %v4408_v4 = vpack.c.bf16 %v1303_v63, %v1301_v62  ;;  %v4410_v6 = vpack.c.bf16 %v1308_v2, %v1306_v1  ;;  %v1305_v7 = vld [vmem:[%s7736_s2 + $0x60] sm:$0xff]  ;;  %v1307_v8 = vld [vmem:[%s7736_s2 + $0x70] sm:$0xff]  ;;  %v1310_v10 = vld [vmem:[%s7736_s2 + $0x88] sm:$0xff] }
  0x27   : > { %4027 = vmatmul.mubr.msk.f32.gmra.mrb[2].mxu1 %vm287_vm0, %v353_v39  ;;  %v358_v9 = vld [vmem:[#allocation2 + $0x30] sm:$0xff]  ;;  %v1312_v11 = vld [vmem:[%s7736_s2 + $0x98] sm:$0xff]  ;;  %v656_v12 = vld [vmem:[#allocation2 + $0x41] sm:$0xff]  ;;  %v4412_v13 = vpack.c.bf16 %v1307_v8, %v1305_v7 }
  0x28   : > { %504 = vmatprep.mubr.f32.mxu1 %v5129_v5  ;;  %4405 = vmatpush1.bf16.msra.mxu1 %v4404_v60  ;;  %v4414_v14 = vpack.c.bf16 %v1312_v11, %v1310_v10  ;;  %v1309_v15 = vld [vmem:[%s7736_s2 + $0x80] sm:$0xff]  ;;  %v1311_v16 = vld [vmem:[%s7736_s2 + $0x90] sm:$0xff]  ;;  %v359_v17 = vld [vmem:[#allocation2 + $0x38] sm:$0xff] }
  0x29   : > { %4050 = vmatmul.mubr.msk.f32.gmra.mrb[4].mxu0 %vm287_vm0, %v650_v37  ;;  %4407 = vmatprep.subr.bf16.mxu1 %v4406_v61  ;;  %v1314_v18 = vld [vmem:[%s7736_s2 + $0xa8] sm:$0xff]  ;;  %v1316_v19 = vld [vmem:[%s7736_s2 + $0xb8] sm:$0xff]  ;;  %v4416_v21 = vpack.c.bf16 %v1311_v16, %v1309_v15  ;;  %v1313_v23 = vld [vmem:[%s7736_s2 + $0xa0] sm:$0xff] }
  0x2a   : > { %807 = vmatprep.mubr.f32.mxu0 %v5129_v5  ;;  %v657_v20 = vld [vmem:[#allocation2 + $0x49] sm:$0xff]  ;;  %v4418_v22 = vpack.c.bf16 %v1316_v19, %v1314_v18  ;;  %v360_v25 = vld [vmem:[#allocation2 + $0x40] sm:$0xff]  ;;  %v1320_v27 = vld [vmem:[%s7736_s2 + $0xd8] sm:$0xff] }
  0x2b   : > { %4028 = vmatmul.mubr.msk.f32.gmra.mrb[4].mxu1 %vm287_vm0, %v354_v41  ;;  %v1315_v24 = vld [vmem:[%s7736_s2 + $0xb0] sm:$0xff]  ;;  %v1318_v26 = vld [vmem:[%s7736_s2 + $0xc8] sm:$0xff]  ;;  %v1317_v31 = vld [vmem:[%s7736_s2 + $0xc0] sm:$0xff] }
  0x2c   : > { %510 = vmatprep.mubr.f32.mxu1 %v5129_v5  ;;  %4409 = vmatpush1.bf16.msra.mxu1 %v4408_v4  ;;  %v658_v28 = vld [vmem:[#allocation2 + $0x51] sm:$0xff]  ;;  %v4420_v29 = vpack.c.bf16 %v1315_v24, %v1313_v23  ;;  %v4422_v30 = vpack.c.bf16 %v1320_v27, %v1318_v26  ;;  %v361_v33 = vld [vmem:[#allocation2 + $0x48] sm:$0xff]  ;;  %v659_v36 = vld [vmem:[#allocation2 + $0x59] sm:$0xff] }
  0x2d   : > { %4051 = vmatmul.mubr.msk.f32.gmra.mrb[6].mxu0 %vm287_vm0, %v651_v40  ;;  %4411 = vmatprep.subr.bf16.mxu1 %v4410_v6  ;;  %v1319_v32 = vld [vmem:[%s7736_s2 + $0xd0] sm:$0xff]  ;;  %v1322_v34 = vld [vmem:[%s7736_s2 + $0xe8] sm:$0xff]  ;;  %v1324_v35 = vld [vmem:[%s7736_s2 + $0xf8] sm:$0xff] }
  0x2e   : > { %813 = vmatprep.mubr.f32.mxu0 %v5129_v5  ;;  %v4424_v37 = vpack.c.bf16 %v1319_v32, %v1317_v31  ;;  %v4426_v38 = vpack.c.bf16 %v1324_v35, %v1322_v34  ;;  %v1321_v39 = vld [vmem:[%s7736_s2 + $0xe0] sm:$0xff]  ;;  %v1323_v40 = vld [vmem:[%s7736_s2 + $0xf0] sm:$0xff]  ;;  %v363_v49 = vld [vmem:[#allocation2 + $0x58] sm:$0xff] }
  0x2f   : > { %4029 = vmatmul.mubr.msk.f32.gmra.mrb[6].mxu1 %vm287_vm0, %v355_v43  ;;  %v362_v41 = vld [vmem:[#allocation2 + $0x50] sm:$0xff]  ;;  %v1328_v43 = vld [vmem:[%s7736_s2 + $0x118] sm:$0xff]  ;;  %v1325_v47 = vld [vmem:[%s7736_s2 + $0x100] sm:$0xff] }
  0x30   : > { %516 = vmatprep.mubr.f32.mxu1 %v5129_v5  ;;  %4413 = vmatpush1.bf16.msra.mxu1 %v4412_v13  ;;  %v1327_v48 = vld [vmem:[%s7736_s2 + $0x110] sm:$0xff]  ;;  %v1330_v50 = vld [vmem:[%s7736_s2 + $0x128] sm:$0xff]  ;;  %v1332_v51 = vld [vmem:[%s7736_s2 + $0x138] sm:$0xff] }
  0x31   : > { %4052 = vmatmul.mubr.msk.f32.gmra.mrb[8].mxu0 %vm287_vm0, %v652_v42  ;;  %4415 = vmatprep.subr.bf16.mxu1 %v4414_v14  ;;  %v1326_v42 = vld [vmem:[%s7736_s2 + $0x108] sm:$0xff]  ;;  %v4432_v53 = vpack.c.bf16 %v1327_v48, %v1325_v47  ;;  %v4434_v54 = vpack.c.bf16 %v1332_v51, %v1330_v50  ;;  %v1329_v55 = vld [vmem:[%s7736_s2 + $0x120] sm:$0xff]  ;;  %v1331_v56 = vld [vmem:[%s7736_s2 + $0x130] sm:$0xff] }
  0x32   : > { %819 = vmatprep.mubr.f32.mxu0 %v5129_v5  ;;  %v4430_v46 = vpack.c.bf16 %v1328_v43, %v1326_v42  ;;  %v661_v52 = vld [vmem:[#allocation2 + $0x69] sm:$0xff]  ;;  %v364_v57 = vld [vmem:[#allocation2 + $0x60] sm:$0xff]  ;;  %v662_v60 = vld [vmem:[#allocation2 + $0x71] sm:$0xff]  ;;  %v4436_v61 = vpack.c.bf16 %v1331_v56, %v1329_v55 }
  0x33   : > { %4030 = vmatmul.mubr.msk.f32.gmra.mrb[8].mxu1 %vm287_vm0, %v356_v45  ;;  %v4428_v45 = vpack.c.bf16 %v1323_v40, %v1321_v39  ;;  %v1334_v58 = vld [vmem:[%s7736_s2 + $0x148] sm:$0xff]  ;;  %v1333_v63 = vld [vmem:[%s7736_s2 + $0x140] sm:$0xff]  ;;  %v366_v10 = vld [vmem:[#allocation2 + $0x70] sm:$0xff] }
  0x34   : > { %522 = vmatprep.mubr.f32.mxu1 %v5129_v5  ;;  %4417 = vmatpush1.bf16.msra.mxu1 %v4416_v21  ;;  %v365_v1 = vld [vmem:[#allocation2 + $0x68] sm:$0xff]  ;;  %v663_v4 = vld [vmem:[#allocation2 + $0x79] sm:$0xff]  ;;  %v1351_v50 = vld [vmem:[%s7736_s2 + $0x1d0] sm:$0xff] }
  0x35   : > { %4053 = vmatmul.mubr.msk.f32.gmra.mrb[10].mxu0 %vm287_vm0, %v653_v44  ;;  %4419 = vmatprep.subr.bf16.mxu1 %v4418_v22  ;;  %v660_v44 = vld [vmem:[#allocation2 + $0x61] sm:$0xff]  ;;  %v367_v18 = vld [vmem:[#allocation2 + $0x78] sm:$0xff]  ;;  %v665_v19 = vld [vmem:[#allocation2 + $0x89] sm:$0xff] }
  0x36   : > { %825 = vmatprep.mubr.f32.mxu0 %v5129_v5  ;;  %v1338_v2 = vld [vmem:[%s7736_s2 + $0x168] sm:$0xff]  ;;  %v1337_v8 = vld [vmem:[%s7736_s2 + $0x160] sm:$0xff]  ;;  %v940_v32 = vld [vmem:[#allocation2 + $0x32] sm:$0xff] }
  0x37   : > { %4031 = vmatmul.mubr.msk.f32.gmra.mrb[10].mxu1 %vm287_vm0, %v357_v0  ;;  %v1335_v0 = vld [vmem:[%s7736_s2 + $0x150] sm:$0xff]  ;;  %v1342_v11 = vld [vmem:[%s7736_s2 + $0x188] sm:$0xff]  ;;  %v1341_v16 = vld [vmem:[%s7736_s2 + $0x180] sm:$0xff] }
  0x38   : > { %528 = vmatprep.mubr.f32.mxu1 %v5129_v5  ;;  %4421 = vmatpush1.bf16.msra.mxu1 %v4420_v29  ;;  %v4440_v6 = vpack.c.bf16 %v1335_v0, %v1333_v63  ;;  %v664_v13 = vld [vmem:[#allocation2 + $0x81] sm:$0xff]  ;;  %v935_v24 = vld [vmem:[#allocation2 + $0xa] sm:$0xff]  ;;  %v948_v40 = vld [vmem:[#allocation2 + $0x72] sm:$0xff] }
  0x39   : > { %4054 = vmatmul.mubr.msk.f32.gmra.mrb[12].mxu0 %vm287_vm0, %v654_v59  ;;  %4423 = vmatprep.subr.bf16.mxu1 %v4422_v30  ;;  %v1336_v59 = vld [vmem:[%s7736_s2 + $0x158] sm:$0xff]  ;;  %v368_v21 = vld [vmem:[#allocation2 + $0x80] sm:$0xff]  ;;  %v369_v23 = vld [vmem:[#allocation2 + $0x88] sm:$0xff] }
  0x3a   : > { %831 = vmatprep.mubr.f32.mxu0 %v5129_v5  ;;  %v4438_v62 = vpack.c.bf16 %v1336_v59, %v1334_v58  ;;  %v934_v22 = vld [vmem:[#allocation2 + $0x2] sm:$0xff]  ;;  %v937_v26 = vld [vmem:[#allocation2 + $0x1a] sm:$0xff]  ;;  %v943_v35 = vld [vmem:[#allocation2 + $0x4a] sm:$0xff] }
  0x3b   : > { %4032 = vmatmul.mubr.msk.f32.gmra.mrb[12].mxu1 %vm287_vm0, %v358_v9  ;;  %v1339_v9 = vld [vmem:[%s7736_s2 + $0x170] sm:$0xff]  ;;  %v938_v27 = vld [vmem:[#allocation2 + $0x22] sm:$0xff]  ;;  %v1348_v30 = vld [vmem:[%s7736_s2 + $0x1b8] sm:$0xff] }
  0x3c   : > { %534 = vmatprep.mubr.f32.mxu1 %v5129_v5  ;;  %4425 = vmatpush1.bf16.msra.mxu1 %v4424_v37  ;;  %v4444_v14 = vpack.c.bf16 %v1339_v9, %v1337_v8  ;;  %v1346_v29 = vld [vmem:[%s7736_s2 + $0x1a8] sm:$0xff]  ;;  %v945_v37 = vld [vmem:[#allocation2 + $0x5a] sm:$0xff]  ;;  %v1355_v56 = vld [vmem:[%s7736_s2 + $0x1f0] sm:$0xff] }
  0x3d   : > { %4055 = vmatmul.mubr.msk.f32.gmra.mrb[14].mxu0 %vm287_vm0, %v655_v3  ;;  %4427 = vmatprep.subr.bf16.mxu1 %v4426_v38  ;;  %v1340_v3 = vld [vmem:[%s7736_s2 + $0x178] sm:$0xff]  ;;  %v4450_v31 = vpack.c.bf16 %v1348_v30, %v1346_v29  ;;  %v942_v34 = vld [vmem:[#allocation2 + $0x42] sm:$0xff]  ;;  %v947_v39 = vld [vmem:[#allocation2 + $0x6a] sm:$0xff] }
  0x3e   : > { %837 = vmatprep.mubr.f32.mxu0 %v5129_v5  ;;  %v4442_v7 = vpack.c.bf16 %v1340_v3, %v1338_v2  ;;  %v946_v38 = vld [vmem:[#allocation2 + $0x62] sm:$0xff]  ;;  %v951_v43 = vld [vmem:[#allocation2 + $0x8a] sm:$0xff]  ;;  %v4091_v59 = vld [vmem:[%s7736_s2 + $0x218] sm:$0xff] }
  0x3f   : > { %4033 = vmatmul.mubr.msk.f32.gmra.mrb[14].mxu1 %vm287_vm0, %v359_v17  ;;  %v1343_v17 = vld [vmem:[%s7736_s2 + $0x190] sm:$0xff]  ;;  %v950_v42 = vld [vmem:[#allocation2 + $0x82] sm:$0xff]  ;;  %v351_v29 = vld [vmem:[%s7738_s4] sm:$0x3] }
  0x40   : > { %540 = vmatprep.mubr.f32.mxu1 %v5129_v5  ;;  %4429 = vmatpush1.bf16.msra.mxu1 %v4428_v45  ;;  %v1347_v45 = vld [vmem:[%s7736_s2 + $0x1b0] sm:$0xff]  ;;  %v1350_v47 = vld [vmem:[%s7736_s2 + $0x1c8] sm:$0xff]  ;;  %v1353_v55 = vld [vmem:[%s7736_s2 + $0x1e0] sm:$0xff] }
  0x41   : > { %4056 = vmatmul.mubr.msk.f32.gmra.mrb[16].mxu0 %vm287_vm0, %v656_v12  ;;  %4431 = vmatprep.subr.bf16.mxu1 %v4430_v46  ;;  %v1344_v12 = vld [vmem:[%s7736_s2 + $0x198] sm:$0xff]  ;;  %v4089_v58 = vld [vmem:[%s7736_s2 + $0x208] sm:$0xff] }
  0x42   : > { %843 = vmatprep.mubr.f32.mxu0 %v5129_v5  ;;  %v4446_v15 = vpack.c.bf16 %v1344_v12, %v1342_v11 }
  0x43   : > { %4034 = vmatmul.mubr.msk.f32.gmra.mrb[16].mxu1 %vm287_vm0, %v360_v25  ;;  %v936_v25 = vld [vmem:[#allocation2 + $0x12] sm:$0xff] }
  0x44   : > { %546 = vmatprep.mubr.f32.mxu1 %v5129_v5  ;;  %4433 = vmatpush1.bf16.msra.mxu1 %v4432_v53  ;;  %v1356_v53 = vld [vmem:[%s7736_s2 + $0x1f8] sm:$0xff] }
  0x45   : > { %4057 = vmatmul.mubr.msk.f32.gmra.mrb[18].mxu0 %vm287_vm0, %v657_v20  ;;  %4435 = vmatprep.subr.bf16.mxu1 %v4434_v54  ;;  %v4448_v20 = vpack.c.bf16 %v1343_v17, %v1341_v16 }
  0x46   : > { %849 = vmatprep.mubr.f32.mxu0 %v5129_v5 }
  0x47   : > { %4035 = vmatmul.mubr.msk.f32.gmra.mrb[18].mxu1 %vm287_vm0, %v361_v33  ;;  %v941_v33 = vld [vmem:[#allocation2 + $0x3a] sm:$0xff] }
  0x48   : > { %552 = vmatprep.mubr.f32.mxu1 %v5129_v5  ;;  %4437 = vmatpush1.bf16.msra.mxu1 %v4436_v61 }
  0x49   : > { %4058 = vmatmul.mubr.msk.f32.gmra.mrb[20].mxu0 %vm287_vm0, %v658_v28  ;;  %4439 = vmatprep.subr.bf16.mxu1 %v4438_v62  ;;  %v939_v28 = vld [vmem:[#allocation2 + $0x2a] sm:$0xff] }
  0x4a   : > { %855 = vmatprep.mubr.f32.mxu0 %v5129_v5 }
  0x4b   : > { %4036 = vmatmul.mubr.msk.f32.gmra.mrb[20].mxu1 %vm287_vm0, %v362_v41  ;;  %v949_v41 = vld [vmem:[#allocation2 + $0x7a] sm:$0xff] }
  0x4c   : > { %558 = vmatprep.mubr.f32.mxu1 %v5129_v5  ;;  %4441 = vmatpush1.bf16.msra.mxu1 %v4440_v6 }
  0x4d   : > { %4059 = vmatmul.mubr.msk.f32.gmra.mrb[22].mxu0 %vm287_vm0, %v659_v36  ;;  %4443 = vmatprep.subr.bf16.mxu1 %v4442_v7  ;;  %v944_v36 = vld [vmem:[#allocation2 + $0x52] sm:$0xff] }
  0x4e   : > { %861 = vmatprep.mubr.f32.mxu0 %v5129_v5 }
  0x4f   : > { %4037 = vmatmul.mubr.msk.f32.gmra.mrb[22].mxu1 %vm287_vm0, %v363_v49  ;;  %v1349_v49 = vld [vmem:[%s7736_s2 + $0x1c0] sm:$0xff] }
  0x50   : > { %564 = vmatprep.mubr.f32.mxu1 %v5129_v5  ;;  %4445 = vmatpush1.bf16.msra.mxu1 %v4444_v14  ;;  %v4456_v51 = vpack.c.bf16 %v1351_v50, %v1349_v49 }
  0x51   : > { %4060 = vmatmul.mubr.msk.f32.gmra.mrb[24].mxu0 %vm287_vm0, %v660_v44  ;;  %4447 = vmatprep.subr.bf16.mxu1 %v4446_v15  ;;  %v1345_v44 = vld [vmem:[%s7736_s2 + $0x1a0] sm:$0xff] }
  0x52   : > { %867 = vmatprep.mubr.f32.mxu0 %v5129_v5  ;;  %v4452_v46 = vpack.c.bf16 %v1347_v45, %v1345_v44  ;;  %v4093_v44 = vld [vmem:[%s7736_s2 + $0x228] sm:$0xff]  ;;  %v4095_v45 = vld [vmem:[%s7736_s2 + $0x238] sm:$0xff] }
  0x53   : > { %4038 = vmatmul.mubr.msk.f32.gmra.mrb[24].mxu1 %vm287_vm0, %v364_v57  ;;  %v4460_v57 = vpack.c.bf16 %v1355_v56, %v1353_v55 }
  0x54   : > { %570 = vmatprep.mubr.f32.mxu1 %v5129_v5  ;;  %4449 = vmatpush1.bf16.msra.mxu1 %v4448_v20 }
  0x55   : > { %4061 = vmatmul.mubr.msk.f32.gmra.mrb[26].mxu0 %vm287_vm0, %v661_v52  ;;  %4451 = vmatprep.subr.bf16.mxu1 %v4450_v31  ;;  %v1354_v52 = vld [vmem:[%s7736_s2 + $0x1e8] sm:$0xff] }
  0x56   : > { %873 = vmatprep.mubr.f32.mxu0 %v5129_v5  ;;  %v4458_v54 = vpack.c.bf16 %v1356_v53, %v1354_v52  ;;  %v4466_v52 = vpack.c.bf16 %v4095_v45, %v4093_v44  ;;  %v4092_v53 = vld [vmem:[%s7736_s2 + $0x220] sm:$0xff]  ;;  %v4102_v45 = vld [vmem:[%s7736_s2 + $0x270] sm:$0xff] }
  0x57   : > { %4039 = vmatmul.mubr.msk.f32.gmra.mrb[26].mxu1 %vm287_vm0, %v365_v1  ;;  %v4100_v44 = vld [vmem:[%s7736_s2 + $0x260] sm:$0xff] }
  0x58   : > { %576 = vmatprep.mubr.f32.mxu1 %v5129_v5  ;;  %4453 = vmatpush1.bf16.msra.mxu1 %v4452_v46 }
  0x59   : > { %4062 = vmatmul.mubr.msk.f32.gmra.mrb[28].mxu0 %vm287_vm0, %v662_v60  ;;  %v4462_v60 = vpack.c.bf16 %v4091_v59, %v4089_v58  ;;  %v4099_v58 = vld [vmem:[%s7736_s2 + $0x258] sm:$0xff] }
  0x5a   : > { %879 = vmatprep.mubr.f32.mxu0 %v5129_v5 }
  0x5b   : > { %4040 = vmatmul.mubr.msk.f32.gmra.mrb[28].mxu1 %vm287_vm0, %v366_v10 }
  0x5c   : > { %582 = vmatprep.mubr.f32.mxu1 %v5129_v5 }
  0x5d   : > { %4063 = vmatmul.mubr.msk.f32.gmra.mrb[30].mxu0 %vm287_vm0, %v663_v4 }
  0x5e   : > { %885 = vmatprep.mubr.f32.mxu0 %v5129_v5 }
  0x5f   : > { %4041 = vmatmul.mubr.msk.f32.gmra.mrb[30].mxu1 %vm287_vm0, %v367_v18 }
  0x60   : > { %588 = vmatprep.mubr.f32.mxu1 %v5129_v5 }
  0x61   : > { %4064 = vmatmul.mubr.msk.f32.gmra.mrb[32].mxu0 %vm287_vm0, %v664_v13 }
  0x62   : > { %891 = vmatprep.mubr.f32.mxu0 %v5129_v5 }
  0x63   : > { %4042 = vmatmul.mubr.msk.f32.gmra.mrb[32].mxu1 %vm287_vm0, %v368_v21 }
  0x64   : > { %594 = vmatprep.mubr.f32.mxu1 %v5129_v5 }
  0x65   : > { %4065 = vmatmul.mubr.msk.f32.gmra.mrb[34].mxu0 %vm287_vm0, %v665_v19 }
  0x66   : > { %1075 = vmatprep.mubr.f32.mxu0 %v5129_v5 }
  0x67   : > { %4043 = vmatmul.mubr.msk.f32.gmra.mrb[34].mxu1 %vm287_vm0, %v369_v23 }
  0x69   : > { %4070 = vmatmul.mubr.msk.f32.vlgmr.msra.gmra.mrb[0].mxu0 %vm287_vm0, %v934_v22  ;;  %v7742_v22 = vlaneseq }
  0x6a   : > { %1081 = vmatprep.mubr.f32.mxu0 %v5129_v5 }
  0x6d   : > { %4071 = vmatmul.mubr.msk.f32.gmra.mrb[2].mxu0 %vm287_vm0, %v935_v24 }
  0x6e   : > { %1087 = vmatprep.mubr.f32.mxu0 %v5129_v5 }
  0x71   : > { %4072 = vmatmul.mubr.msk.f32.gmra.mrb[4].mxu0 %vm287_vm0, %v936_v25  ;;  %v603_v25 = vshrl.u32 %v7742_v22, 7 }
  0x72   : > { %1093 = vmatprep.mubr.f32.mxu0 %v5129_v5 }
  0x73   : > { %v5658_v30 = vsub.s32 1, %v603_v25 }
  0x75   : > { %4073 = vmatmul.mubr.msk.f32.gmra.mrb[6].mxu0 %vm287_vm0, %v937_v26  ;;  %7769 = vst [vmem:[#allocation6_spill] sm:$0xff] %v5658_v30 }
  0x76   : > { %1099 = vmatprep.mubr.f32.mxu0 %v5129_v5 }
  0x79   : > { %4074 = vmatmul.mubr.msk.f32.gmra.mrb[8].mxu0 %vm287_vm0, %v938_v27 }
  0x7a   : > { %1105 = vmatprep.mubr.f32.mxu0 %v5129_v5 }
  0x7d   : > { %4075 = vmatmul.mubr.msk.f32.gmra.mrb[10].mxu0 %vm287_vm0, %v939_v28  ;;  %v5653_v28 = vsub.s32 0, %v603_v25 }
  0x7e   : > { %1111 = vmatprep.mubr.f32.mxu0 %v5129_v5 }
  0x7f   : > { %7768 = vst [vmem:[#allocation5_spill] sm:$0xff] %v5653_v28 }
  0x81   : > { %4076 = vmatmul.mubr.msk.f32.gmra.mrb[12].mxu0 %vm287_vm0, %v940_v32 }
  0x82   : > { %1117 = vmatprep.mubr.f32.mxu0 %v5129_v5 }
  0x85   : > { %4077 = vmatmul.mubr.msk.f32.gmra.mrb[14].mxu0 %vm287_vm0, %v941_v33  ;;  %v5665_v33 = vrot.slane %v351_v29, %v5653_v28 }
  0x86   : > { %1123 = vmatprep.mubr.f32.mxu0 %v5129_v5 }
  0x89   : > { %4078 = vmatmul.mubr.msk.f32.gmra.mrb[16].mxu0 %vm287_vm0, %v942_v34  ;;  %v5668_v34 = vrot.slane %v351_v29, %v5658_v30  ;;  %v4096_v29 = vld [vmem:[%s7736_s2 + $0x240] sm:$0xff] }
  0x8a   : > { %1129 = vmatprep.mubr.f32.mxu0 %v5129_v5 }
  0x8d   : > { %4079 = vmatmul.mubr.msk.f32.gmra.mrb[18].mxu0 %vm287_vm0, %v943_v35 }
  0x8e   : > { %1135 = vmatprep.mubr.f32.mxu0 %v5129_v5 }
  0x91   : > { %4080 = vmatmul.mubr.msk.f32.gmra.mrb[20].mxu0 %vm287_vm0, %v944_v36 }
  0x92   : > { %1141 = vmatprep.mubr.f32.mxu0 %v5129_v5 }
  0x95   : > { %4081 = vmatmul.mubr.msk.f32.gmra.mrb[22].mxu0 %vm287_vm0, %v945_v37 }
  0x96   : > { %1147 = vmatprep.mubr.f32.mxu0 %v5129_v5 }
  0x99   : > { %4082 = vmatmul.mubr.msk.f32.gmra.mrb[24].mxu0 %vm287_vm0, %v946_v38 }
  0x9a   : > { %1153 = vmatprep.mubr.f32.mxu0 %v5129_v5 }
  0x9d   : > { %4083 = vmatmul.mubr.msk.f32.gmra.mrb[26].mxu0 %vm287_vm0, %v947_v39 }
  0x9e   : > { %1159 = vmatprep.mubr.f32.mxu0 %v5129_v5 }
  0xa1   : > { %4084 = vmatmul.mubr.msk.f32.gmra.mrb[28].mxu0 %vm287_vm0, %v948_v40  ;;  %v4088_v40 = vld [vmem:[%s7736_s2 + $0x200] sm:$0xff] }
  0xa2   : > { %1165 = vmatprep.mubr.f32.mxu0 %v5129_v5 }
  0xa5   : > { %4085 = vmatmul.mubr.msk.f32.gmra.mrb[30].mxu0 %vm287_vm0, %v949_v41  ;;  %v4090_v41 = vld [vmem:[%s7736_s2 + $0x210] sm:$0xff] }
  0xa6   : > { %1171 = vmatprep.mubr.f32.mxu0 %v5129_v5  ;;  %v4464_v50 = vpack.c.bf16 %v4090_v41, %v4088_v40 }
  0xa9   : > { %4086 = vmatmul.mubr.msk.f32.gmra.mrb[32].mxu0 %vm287_vm0, %v950_v42 }
  0xaa   : > { %1177 = vmatprep.mubr.f32.mxu0 %v5129_v5  ;;  %v1352_v5 = vld [vmem:[%s7736_s2 + $0x1d8] sm:$0xff] }
  0xab   : > { %v4454_v48 = vpack.c.bf16 %v1352_v5, %v1350_v47 }
  0xad   : > { %4087 = vmatmul.mubr.msk.f32.gmra.mrb[34].mxu0 %vm287_vm0, %v951_v43  ;;  %4455 = vmatprep.subr.bf16.mxu1 %v4454_v48 }
  0xae   : > { %4457 = vmatpush1.bf16.msra.mxu1 %v4456_v51 }
  0xaf   : > { %4459 = vmatprep.subr.bf16.mxu1 %v4458_v54  ;;  %v4094_v54 = vld [vmem:[%s7736_s2 + $0x230] sm:$0xff] }
  0xb2   : > { %4461 = vmatpush1.bf16.msra.mxu1 %v4460_v57  ;;  %v4097_v57 = vld [vmem:[%s7736_s2 + $0x248] sm:$0xff] }
  0xb3   : > { %4463 = vmatprep.subr.bf16.mxu1 %v4462_v60  ;;  %v4470_v25 = vpack.c.bf16 %v4099_v58, %v4097_v57  ;;  %v5764_v57 = vld [vmem:[%s7736_s2 + $0x2a8] sm:$0xff]  ;;  %v5769_v58 = vld [vmem:[%s7736_s2 + $0x2b8] sm:$0xff] }
  0xf6   : > { %v494_v61 = vpop.f32.mrb[0].mxu1 }
  0xf7   : > { %v496_v62 = vpop.f32.mrb[1].mxu1  ;;  %v612_v37 = vadd.f32 %v5665_v33, %v494_v61 }
  0xf8   : > { %v613_v38 = vadd.f32 %v5668_v34, %v496_v62 }
  0xfa   : > { %v500_v63 = vpop.f32.mrb[2].mxu1 }
  0xfb   : > { %v502_v0 = vpop.f32.mrb[3].mxu1  ;;  %v614_v47 = vadd.f32 %v5665_v33, %v500_v63 }
  0xfc   : > { %v615_v49 = vadd.f32 %v5668_v34, %v502_v0  ;;  %v4468_v0 = vpack.c.bf16 %v4094_v54, %v4092_v53 }
  0xfe   : > { %v506_v1 = vpop.f32.mrb[4].mxu1 }
  0xff   : > { %v5606_v2 = vpop.f32.mrb[5].mxu1  ;;  %v616_v60 = vadd.f32 %v5665_v33, %v506_v1 }
 0x100   : > { %v617_v63 = vadd.f32 %v5668_v34, %v5606_v2  ;;  %v4103_v2 = vld [vmem:[%s7736_s2 + $0x278] sm:$0xff] }
 0x102   : > { %v5608_v3 = vpop.f32.mrb[6].mxu1 }
 0x103   : > { %v5610_v4 = vpop.f32.mrb[7].mxu1  ;;  %v618_v41 = vadd.f32 %v5665_v33, %v5608_v3  ;;  %v4105_v3 = vld [vmem:[%s7736_s2 + $0x288] sm:$0xff] }
 0x106   : > { %v5612_v6 = vpop.f32.mrb[8].mxu1 }
 0x107   : > { %v5614_v7 = vpop.f32.mrb[9].mxu1 }
 0x10a   : > { %v5616_v8 = vpop.f32.mrb[10].mxu1 }
 0x10b   : > { %v5618_v9 = vpop.f32.mrb[11].mxu1 }
 0x10e   : > { %v5620_v10 = vpop.f32.mrb[12].mxu1 }
 0x10f   : > { %v5622_v11 = vpop.f32.mrb[13].mxu1 }
 0x112   : > { %v5624_v12 = vpop.f32.mrb[14].mxu1 }
 0x113   : > { %v5626_v13 = vpop.f32.mrb[15].mxu1 }
 0x116   : > { %v5628_v14 = vpop.f32.mrb[16].mxu1 }
 0x117   : > { %v5630_v15 = vpop.f32.mrb[17].mxu1 }
 0x11a   : > { %v5632_v16 = vpop.f32.mrb[18].mxu1 }
 0x11b   : > { %v5634_v17 = vpop.f32.mrb[19].mxu1 }
 0x11e   : > { %v5636_v18 = vpop.f32.mrb[20].mxu1 }
 0x11f   : > { %v5638_v19 = vpop.f32.mrb[21].mxu1 }
 0x122   : > { %v5640_v20 = vpop.f32.mrb[22].mxu1 }
 0x123   : > { %v5642_v21 = vpop.f32.mrb[23].mxu1 }
 0x126   : > { %v5644_v23 = vpop.f32.mrb[24].mxu1 }
 0x127   : > { %v5646_v24 = vpop.f32.mrb[25].mxu1 }
 0x12a   : > { %v5649_v26 = vpop.f32.mrb[26].mxu1 }
 0x12b   : > { %v5651_v27 = vpop.f32.mrb[27].mxu1 }
 0x12e   : > { %v5660_v31 = vpop.f32.mrb[28].mxu1 }
 0x12f   : > { %v5662_v32 = vpop.f32.mrb[29].mxu1 }
 0x132   : > { %v5670_v35 = vpop.f32.mrb[30].mxu1 }
 0x133   : > { %v5672_v36 = vpop.f32.mrb[31].mxu1 }
 0x136   : > { %v5676_v39 = vpop.f32.mrb[32].mxu1 }
 0x137   : > { %v5684_v42 = vpop.f32.mrb[33].mxu1 }
 0x13a   : > { %v5694_v51 = vpop.f32.mrb[34].mxu1 }
 0x13b   : > { %v5702_v55 = vpop.f32.mrb[35].mxu1 }
 0x13c   : > { %v1077_v43 = vpop.f32.mrb[0].mxu0 }
 0x13d   : > { %v4787_v46 = vadd.f32 %v1077_v43, %v612_v37  ;;  %v1079_v5 = vpop.f32.mrb[1].mxu0  ;;  %v4098_v37 = vld [vmem:[%s7736_s2 + $0x250] sm:$0xff] }
 0x13e   : > { %v4789_v48 = vadd.f32 %v1079_v5, %v613_v38  ;;  %v4101_v38 = vld [vmem:[%s7736_s2 + $0x268] sm:$0xff]  ;;  %v4472_v5 = vpack.c.bf16 %v4098_v37, %v4096_v29 }
 0x13f   : > { %1220 = vst [vmem:[#allocation3] sm:$0xff] %v4787_v46 }
 0x140   : > { %1221 = vst [vmem:[#allocation3 + $0x8] sm:$0xff] %v4789_v48  ;;  %v1083_v56 = vpop.f32.mrb[2].mxu0  ;;  %1421 = vmatprep.mubr.f32.mxu1 %v4789_v48  ;;  %v4474_v48 = vpack.c.bf16 %v4103_v2, %v4101_v38  ;;  %v621_v2 = vadd.f32 %v5668_v34, %v5614_v7 }
 0x141   : > { %v5710_v59 = vadd.f32 %v1083_v56, %v614_v47  ;;  %v1085_v61 = vpop.f32.mrb[3].mxu0  ;;  %1422 = vmatmul.mubr.f32.vlgmr.msra.gmra.mrb[36].mxu1 %v4787_v46  ;;  %v619_v47 = vadd.f32 %v5668_v34, %v5610_v4  ;;  %v5757_v4 = vld [vmem:[%s7736_s2 + $0x290] sm:$0xff]  ;;  %v4476_v56 = vpack.c.bf16 %v4102_v45, %v4100_v44  ;;  %v4482_v44 = vpack.c.bf16 %v5769_v58, %v5764_v57 }
 0x142   : > { %v5713_v62 = vadd.f32 %v1085_v61, %v615_v49  ;;  %4465 = vmatpush1.bf16.msra.mxu1 %v4464_v50  ;;  %v4107_v49 = vld [vmem:[%s7736_s2 + $0x298] sm:$0xff]  ;;  %v5752_v50 = vld [vmem:[%s7736_s2 + $0x280] sm:$0xff] }
 0x143   : > { %4467 = vmatprep.subr.bf16.mxu1 %v4466_v52  ;;  %v7745_v52 = vrot.slane %v5710_v59, 2 }
 0x144   : > { %v1089_v1 = vpop.f32.mrb[4].mxu0  ;;  %1427 = vmatprep.mubr.f32.mxu1 %v5713_v62 }
 0x145   : > { %v5730_v40 = vadd.f32 %v1089_v1, %v616_v60  ;;  %v1091_v43 = vpop.f32.mrb[5].mxu0  ;;  %1428 = vmatmul.mubr.f32.gmra.mrb[38].mxu1 %v5710_v59  ;;  %v7746_v60 = vrot.slane %v5713_v62, 2  ;;  %v7744_v1 = vrot.slane %v5713_v62, 4 }
 0x146   : > { %v4797_v46 = vadd.f32 %v1091_v43, %v617_v63  ;;  %4469 = vmatpush1.bf16.msra.mxu1 %v4468_v0  ;;  %v4478_v43 = vpack.c.bf16 %v4107_v49, %v4105_v3  ;;  %v7743_v3 = vrot.slane %v5710_v59, 4 }
 0x147   : > { %4471 = vmatprep.subr.bf16.mxu1 %v4470_v25  ;;  %v1725_v53 = vrot.slane %v5730_v40, 2  ;;  %v620_v25 = vadd.f32 %v5665_v33, %v5612_v6 }
 0x148   : > { %v1095_v54 = vpop.f32.mrb[6].mxu0  ;;  %1433 = vmatprep.mubr.f32.mxu1 %v4797_v46  ;;  %v1727_v61 = vrot.slane %v4797_v46, 2  ;;  %v2120_v63 = vrot.slane %v4797_v46, 4 }
 0x149   : > { %v4799_v0 = vadd.f32 %v1095_v54, %v618_v41  ;;  %v1097_v29 = vpop.f32.mrb[7].mxu0  ;;  %1434 = vmatmul.mubr.f32.gmra.mrb[40].mxu1 %v5730_v40  ;;  %v5778_v37 = vsel %vm1718_vm1, %v7745_v52, %v1725_v53  ;;  %v4480_v41 = vpack.c.bf16 %v5757_v4, %v5752_v50  ;;  %v4108_v4 = vld [vmem:[%s7736_s2 + $0x2a0] sm:$0xff]  ;;  %v4110_v54 = vld [vmem:[%s7736_s2 + $0x2b0] sm:$0xff] }
 0x14a   : > { %v4801_v38 = vadd.f32 %v1097_v29, %v619_v47  ;;  %4473 = vmatpush1.bf16.msra.mxu1 %v4472_v5  ;;  %v5786_v6 = vsel %vm1718_vm1, %v7746_v60, %v1727_v61  ;;  %v5795_v46 = vsel %vm2111_vm2, %v7744_v1, %v2120_v63  ;;  %v622_v47 = vadd.f32 %v5665_v33, %v5616_v8 }
 0x14b   : > { %4475 = vmatprep.subr.bf16.mxu1 %v4474_v48  ;;  %v1729_v45 = vrot.slane %v4799_v0, 2  ;;  %v2118_v48 = vrot.slane %v5730_v40, 4  ;;  %v2122_v58 = vrot.slane %v4799_v0, 4  ;;  %v623_v40 = vadd.f32 %v5668_v34, %v5618_v9 }
 0x14c   : > { %v1101_v7 = vpop.f32.mrb[8].mxu0  ;;  %1439 = vmatprep.mubr.f32.mxu1 %v4801_v38  ;;  %v1731_v5 = vrot.slane %v4801_v38, 2  ;;  %v2124_v8 = vrot.slane %v4801_v38, 4  ;;  %v4484_v9 = vpack.c.bf16 %v4110_v54, %v4108_v4  ;;  %v4112_v4 = vld [vmem:[%s7736_s2 + $0x2c0] sm:$0xff]  ;;  %v4114_v54 = vld [vmem:[%s7736_s2 + $0x2d0] sm:$0xff] }
 0x14d   : > { %v4803_v49 = vadd.f32 %v1101_v7, %v620_v25  ;;  %v1103_v50 = vpop.f32.mrb[9].mxu0  ;;  %1440 = vmatmul.mubr.f32.gmra.mrb[42].mxu1 %v4799_v0  ;;  %v5808_v57 = vsel %vm1718_vm1, %v1725_v53, %v1729_v45  ;;  %v5818_v7 = vsel %vm2111_vm2, %v7743_v3, %v2118_v48  ;;  %v5824_v0 = vsel %vm2111_vm2, %v2118_v48, %v2122_v58 }
 0x14e   : > { %v4805_v29 = vadd.f32 %v1103_v50, %v621_v2  ;;  %4477 = vmatpush1.bf16.msra.mxu1 %v4476_v56  ;;  %v5813_v25 = vsel %vm1718_vm1, %v1727_v61, %v1731_v5  ;;  %v5821_v53 = vsel %vm2111_vm2, %v2120_v63, %v2124_v8  ;;  %v4113_v56 = vld [vmem:[%s7736_s2 + $0x2c8] sm:$0xff]  ;;  %v4115_v61 = vld [vmem:[%s7736_s2 + $0x2d8] sm:$0xff]  ;;  %v624_v63 = vadd.f32 %v5665_v33, %v5620_v10 }
 0x14f   : > { %4479 = vmatprep.subr.bf16.mxu1 %v4478_v43  ;;  %v1733_v22 = vrot.slane %v4803_v49, 2  ;;  %v2126_v38 = vrot.slane %v4803_v49, 4  ;;  %v625_v10 = vadd.f32 %v5668_v34, %v5622_v11  ;;  %v4488_v28 = vpack.c.bf16 %v4114_v54, %v4112_v4  ;;  %v4119_v11 = vld [vmem:[%s7736_s2 + $0x2f8] sm:$0xff] }
 0x150   : > { %v1107_v2 = vpop.f32.mrb[10].mxu0  ;;  %1445 = vmatprep.mubr.f32.mxu1 %v4805_v29  ;;  %v1735_v43 = vrot.slane %v4805_v29, 2  ;;  %v2128_v50 = vrot.slane %v4805_v29, 4 }
 0x151   : > { %v4807_v3 = vadd.f32 %v1107_v2, %v622_v47  ;;  %v1109_v48 = vpop.f32.mrb[11].mxu0  ;;  %1446 = vmatmul.mubr.f32.gmra.mrb[44].mxu1 %v4803_v49  ;;  %v5841_v1 = vsel %vm1718_vm1, %v1729_v45, %v1733_v22  ;;  %v5844_v52 = vsel %vm2111_vm2, %v2122_v58, %v2126_v38  ;;  %v4486_v2 = vpack.c.bf16 %v4115_v61, %v4113_v56  ;;  %v4117_v58 = vld [vmem:[%s7736_s2 + $0x2e8] sm:$0xff]  ;;  %v4116_v56 = vld [vmem:[%s7736_s2 + $0x2e0] sm:$0xff]  ;;  %v4118_v61 = vld [vmem:[%s7736_s2 + $0x2f0] sm:$0xff] }
 0x152   : > { %7770 = vst [vmem:[#allocation7_spill] sm:$0xff] %v5844_v52  ;;  %v4809_v47 = vadd.f32 %v1109_v48, %v623_v40  ;;  %4481 = vmatpush1.bf16.msra.mxu1 %v4480_v41  ;;  %v5849_v49 = vsel %vm1718_vm1, %v1731_v5, %v1735_v43  ;;  %v5852_v29 = vsel %vm2111_vm2, %v2124_v8, %v2128_v50 }
 0x153   : > { %7771 = vst [vmem:[#allocation8_spill] sm:$0xff] %v5852_v29  ;;  %4483 = vmatprep.subr.bf16.mxu1 %v4482_v44  ;;  %v1737_v60 = vrot.slane %v4807_v3, 2  ;;  %v2130_v30 = vrot.slane %v4807_v3, 4  ;;  %v626_v44 = vadd.f32 %v5665_v33, %v5624_v12  ;;  %v627_v12 = vadd.f32 %v5668_v34, %v5626_v13  ;;  %v4123_v13 = vld [vmem:[%s7736_s2 + $0x318] sm:$0xff] }
 0x154   : > { %v1113_v45 = vpop.f32.mrb[12].mxu0  ;;  %1451 = vmatprep.mubr.f32.mxu1 %v4809_v47  ;;  %v1739_v41 = vrot.slane %v4809_v47, 2  ;;  %v2132_v5 = vrot.slane %v4809_v47, 4  ;;  %v4490_v47 = vpack.c.bf16 %v4119_v11, %v4117_v58  ;;  %v4492_v29 = vpack.c.bf16 %v4118_v61, %v4116_v56  ;;  %v4120_v58 = vld [vmem:[%s7736_s2 + $0x300] sm:$0xff]  ;;  %v4122_v11 = vld [vmem:[%s7736_s2 + $0x310] sm:$0xff] }
 0x155   : > { %v4811_v40 = vadd.f32 %v1113_v45, %v624_v63  ;;  %v1115_v8 = vpop.f32.mrb[13].mxu0  ;;  %1452 = vmatmul.mubr.f32.gmra.mrb[46].mxu1 %v4807_v3  ;;  %v5869_v48 = vsel %vm1718_vm1, %v1733_v22, %v1737_v60  ;;  %v5872_v4 = vsel %vm2111_vm2, %v2126_v38, %v2130_v30  ;;  %v4121_v38 = vld [vmem:[%s7736_s2 + $0x308] sm:$0xff] }
 0x156   : > { %7772 = vst [vmem:[#allocation9_spill] sm:$0xff] %v5872_v4  ;;  %v4813_v63 = vadd.f32 %v1115_v8, %v625_v10  ;;  %4485 = vmatpush1.bf16.msra.mxu1 %v4484_v9  ;;  %v5877_v3 = vsel %vm1718_vm1, %v1735_v43, %v1739_v41  ;;  %v5880_v54 = vsel %vm2111_vm2, %v2128_v50, %v2132_v5 }
 0x157   : > { %7773 = vst [vmem:[#allocation10_spill] sm:$0xff] %v5880_v54  ;;  %4487 = vmatprep.subr.bf16.mxu1 %v4486_v2  ;;  %v1741_v45 = vrot.slane %v4811_v40, 2  ;;  %v2134_v52 = vrot.slane %v4811_v40, 4  ;;  %v628_v50 = vadd.f32 %v5665_v33, %v5628_v14  ;;  %v629_v14 = vadd.f32 %v5668_v34, %v5630_v15  ;;  %v4127_v15 = vld [vmem:[%s7736_s2 + $0x338] sm:$0xff] }
 0x158   : > { %v1119_v22 = vpop.f32.mrb[14].mxu0  ;;  %1457 = vmatprep.mubr.f32.mxu1 %v4813_v63  ;;  %v1743_v9 = vrot.slane %v4813_v63, 2  ;;  %v2136_v43 = vrot.slane %v4813_v63, 4  ;;  %v4494_v63 = vpack.c.bf16 %v4123_v13, %v4121_v38  ;;  %v4496_v54 = vpack.c.bf16 %v4122_v11, %v4120_v58  ;;  %v4124_v38 = vld [vmem:[%s7736_s2 + $0x320] sm:$0xff]  ;;  %v4126_v13 = vld [vmem:[%s7736_s2 + $0x330] sm:$0xff] }
 0x159   : > { %v4815_v10 = vadd.f32 %v1119_v22, %v626_v44  ;;  %v1121_v2 = vpop.f32.mrb[15].mxu0  ;;  %1458 = vmatmul.mubr.f32.gmra.mrb[48].mxu1 %v4811_v40  ;;  %v5897_v8 = vsel %vm1718_vm1, %v1737_v60, %v1741_v45  ;;  %v5900_v56 = vsel %vm2111_vm2, %v2130_v30, %v2134_v52  ;;  %v4125_v30 = vld [vmem:[%s7736_s2 + $0x328] sm:$0xff] }
 0x15a   : > { %7774 = vst [vmem:[#allocation11_spill] sm:$0xff] %v5900_v56  ;;  %v4817_v44 = vadd.f32 %v1121_v2, %v627_v12  ;;  %4489 = vmatpush1.bf16.msra.mxu1 %v4488_v28  ;;  %v5905_v40 = vsel %vm1718_vm1, %v1739_v41, %v1743_v9  ;;  %v5908_v61 = vsel %vm2111_vm2, %v2132_v5, %v2136_v43 }
 0x15b   : > { %7775 = vst [vmem:[#allocation12_spill] sm:$0xff] %v5908_v61  ;;  %4491 = vmatprep.subr.bf16.mxu1 %v4490_v47  ;;  %v1745_v22 = vrot.slane %v4815_v10, 2  ;;  %v2138_v4 = vrot.slane %v4815_v10, 4  ;;  %v630_v5 = vadd.f32 %v5665_v33, %v5632_v16  ;;  %v631_v16 = vadd.f32 %v5668_v34, %v5634_v17  ;;  %v4131_v17 = vld [vmem:[%s7736_s2 + $0x358] sm:$0xff] }
 0x15c   : > { %v1125_v60 = vpop.f32.mrb[16].mxu0  ;;  %1463 = vmatprep.mubr.f32.mxu1 %v4817_v44  ;;  %v1747_v28 = vrot.slane %v4817_v44, 2  ;;  %v2140_v41 = vrot.slane %v4817_v44, 4  ;;  %v4498_v44 = vpack.c.bf16 %v4127_v15, %v4125_v30  ;;  %v4500_v61 = vpack.c.bf16 %v4126_v13, %v4124_v38  ;;  %v4128_v30 = vld [vmem:[%s7736_s2 + $0x340] sm:$0xff]  ;;  %v4130_v15 = vld [vmem:[%s7736_s2 + $0x350] sm:$0xff] }
 0x15d   : > { %v4819_v12 = vadd.f32 %v1125_v60, %v628_v50  ;;  %v1127_v47 = vpop.f32.mrb[17].mxu0  ;;  %1464 = vmatmul.mubr.f32.gmra.mrb[50].mxu1 %v4815_v10  ;;  %v5925_v2 = vsel %vm1718_vm1, %v1741_v45, %v1745_v22  ;;  %v5928_v58 = vsel %vm2111_vm2, %v2134_v52, %v2138_v4  ;;  %v4129_v52 = vld [vmem:[%s7736_s2 + $0x348] sm:$0xff] }
 0x15e   : > { %7776 = vst [vmem:[#allocation13_spill] sm:$0xff] %v5928_v58  ;;  %v4821_v50 = vadd.f32 %v1127_v47, %v629_v14  ;;  %4493 = vmatpush1.bf16.msra.mxu1 %v4492_v29  ;;  %v5933_v10 = vsel %vm1718_vm1, %v1743_v9, %v1747_v28  ;;  %v5936_v11 = vsel %vm2111_vm2, %v2136_v43, %v2140_v41 }
 0x15f   : > { %7777 = vst [vmem:[#allocation14_spill] sm:$0xff] %v5936_v11  ;;  %4495 = vmatprep.subr.bf16.mxu1 %v4494_v63  ;;  %v1749_v60 = vrot.slane %v4819_v12, 2  ;;  %v2142_v56 = vrot.slane %v4819_v12, 4  ;;  %v632_v43 = vadd.f32 %v5665_v33, %v5636_v18  ;;  %v633_v18 = vadd.f32 %v5668_v34, %v5638_v19  ;;  %v4135_v19 = vld [vmem:[%s7736_s2 + $0x378] sm:$0xff] }
 0x160   : > { %v1131_v45 = vpop.f32.mrb[18].mxu0  ;;  %1469 = vmatprep.mubr.f32.mxu1 %v4821_v50  ;;  %v1751_v29 = vrot.slane %v4821_v50, 2  ;;  %v2144_v9 = vrot.slane %v4821_v50, 4  ;;  %v4502_v50 = vpack.c.bf16 %v4131_v17, %v4129_v52  ;;  %v4504_v11 = vpack.c.bf16 %v4130_v15, %v4128_v30  ;;  %v4132_v52 = vld [vmem:[%s7736_s2 + $0x360] sm:$0xff]  ;;  %v4134_v17 = vld [vmem:[%s7736_s2 + $0x370] sm:$0xff] }
 0x161   : > { %v4823_v14 = vadd.f32 %v1131_v45, %v630_v5  ;;  %v1133_v63 = vpop.f32.mrb[19].mxu0  ;;  %1470 = vmatmul.mubr.f32.gmra.mrb[52].mxu1 %v4819_v12  ;;  %v5953_v47 = vsel %vm1718_vm1, %v1745_v22, %v1749_v60  ;;  %v5956_v38 = vsel %vm2111_vm2, %v2138_v4, %v2142_v56  ;;  %v4133_v4 = vld [vmem:[%s7736_s2 + $0x368] sm:$0xff] }
 0x162   : > { %7778 = vst [vmem:[#allocation15_spill] sm:$0xff] %v5956_v38  ;;  %v4825_v5 = vadd.f32 %v1133_v63, %v631_v16  ;;  %4497 = vmatpush1.bf16.msra.mxu1 %v4496_v54  ;;  %v5961_v12 = vsel %vm1718_vm1, %v1747_v28, %v1751_v29  ;;  %v5964_v13 = vsel %vm2111_vm2, %v2140_v41, %v2144_v9 }
 0x163   : > { %7779 = vst [vmem:[#allocation16_spill] sm:$0xff] %v5964_v13  ;;  %4499 = vmatprep.subr.bf16.mxu1 %v4498_v44  ;;  %v1753_v45 = vrot.slane %v4823_v14, 2  ;;  %v2146_v58 = vrot.slane %v4823_v14, 4  ;;  %v634_v41 = vadd.f32 %v5665_v33, %v5640_v20  ;;  %v635_v20 = vadd.f32 %v5668_v34, %v5642_v21  ;;  %v4139_v21 = vld [vmem:[%s7736_s2 + $0x398] sm:$0xff] }
 0x164   : > { %v1137_v22 = vpop.f32.mrb[20].mxu0  ;;  %1475 = vmatprep.mubr.f32.mxu1 %v4825_v5  ;;  %v1755_v54 = vrot.slane %v4825_v5, 2  ;;  %v2148_v28 = vrot.slane %v4825_v5, 4  ;;  %v4506_v5 = vpack.c.bf16 %v4135_v19, %v4133_v4  ;;  %v4508_v13 = vpack.c.bf16 %v4134_v17, %v4132_v52  ;;  %v4136_v4 = vld [vmem:[%s7736_s2 + $0x380] sm:$0xff]  ;;  %v4138_v19 = vld [vmem:[%s7736_s2 + $0x390] sm:$0xff] }
 0x165   : > { %v4827_v16 = vadd.f32 %v1137_v22, %v632_v43  ;;  %v1139_v44 = vpop.f32.mrb[21].mxu0  ;;  %1476 = vmatmul.mubr.f32.gmra.mrb[54].mxu1 %v4823_v14  ;;  %v5981_v63 = vsel %vm1718_vm1, %v1749_v60, %v1753_v45  ;;  %v5984_v30 = vsel %vm2111_vm2, %v2142_v56, %v2146_v58  ;;  %v4137_v56 = vld [vmem:[%s7736_s2 + $0x388] sm:$0xff] }
 0x166   : > { %7780 = vst [vmem:[#allocation17_spill] sm:$0xff] %v5984_v30  ;;  %v4829_v43 = vadd.f32 %v1139_v44, %v633_v18  ;;  %4501 = vmatpush1.bf16.msra.mxu1 %v4500_v61  ;;  %v5989_v14 = vsel %vm1718_vm1, %v1751_v29, %v1755_v54  ;;  %v5992_v15 = vsel %vm2111_vm2, %v2144_v9, %v2148_v28 }
 0x167   : > { %7781 = vst [vmem:[#allocation18_spill] sm:$0xff] %v5992_v15  ;;  %4503 = vmatprep.subr.bf16.mxu1 %v4502_v50  ;;  %v1757_v22 = vrot.slane %v4827_v16, 2  ;;  %v2150_v38 = vrot.slane %v4827_v16, 4  ;;  %v636_v9 = vadd.f32 %v5665_v33, %v5644_v23  ;;  %v637_v23 = vadd.f32 %v5668_v34, %v5646_v24  ;;  %v4143_v24 = vld [vmem:[%s7736_s2 + $0x3b8] sm:$0xff] }
 0x168   : > { %v1143_v60 = vpop.f32.mrb[22].mxu0  ;;  %1481 = vmatprep.mubr.f32.mxu1 %v4829_v43  ;;  %v1759_v61 = vrot.slane %v4829_v43, 2  ;;  %v2152_v29 = vrot.slane %v4829_v43, 4  ;;  %v4510_v43 = vpack.c.bf16 %v4139_v21, %v4137_v56  ;;  %v4512_v15 = vpack.c.bf16 %v4138_v19, %v4136_v4  ;;  %v4140_v56 = vld [vmem:[%s7736_s2 + $0x3a0] sm:$0xff]  ;;  %v4142_v21 = vld [vmem:[%s7736_s2 + $0x3b0] sm:$0xff] }
 0x169   : > { %v4831_v18 = vadd.f32 %v1143_v60, %v634_v41  ;;  %v1145_v50 = vpop.f32.mrb[23].mxu0  ;;  %1482 = vmatmul.mubr.f32.gmra.mrb[56].mxu1 %v4827_v16  ;;  %v6009_v44 = vsel %vm1718_vm1, %v1753_v45, %v1757_v22  ;;  %v6012_v52 = vsel %vm2111_vm2, %v2146_v58, %v2150_v38  ;;  %v4141_v58 = vld [vmem:[%s7736_s2 + $0x3a8] sm:$0xff] }
 0x16a   : > { %7782 = vst [vmem:[#allocation19_spill] sm:$0xff] %v6012_v52  ;;  %v4833_v41 = vadd.f32 %v1145_v50, %v635_v20  ;;  %4505 = vmatpush1.bf16.msra.mxu1 %v4504_v11  ;;  %v6017_v16 = vsel %vm1718_vm1, %v1755_v54, %v1759_v61  ;;  %v6020_v17 = vsel %vm2111_vm2, %v2148_v28, %v2152_v29 }
 0x16b   : > { %7783 = vst [vmem:[#allocation20_spill] sm:$0xff] %v6020_v17  ;;  %4507 = vmatprep.subr.bf16.mxu1 %v4506_v5  ;;  %v1761_v60 = vrot.slane %v4831_v18, 2  ;;  %v2154_v30 = vrot.slane %v4831_v18, 4  ;;  %v638_v28 = vadd.f32 %v5665_v33, %v5649_v26  ;;  %v639_v26 = vadd.f32 %v5668_v34, %v5651_v27  ;;  %v4147_v27 = vld [vmem:[%s7736_s2 + $0x3d8] sm:$0xff] }
 0x16c   : > { %v1149_v45 = vpop.f32.mrb[24].mxu0  ;;  %1487 = vmatprep.mubr.f32.mxu1 %v4833_v41  ;;  %v1763_v11 = vrot.slane %v4833_v41, 2  ;;  %v2156_v54 = vrot.slane %v4833_v41, 4  ;;  %v4514_v41 = vpack.c.bf16 %v4143_v24, %v4141_v58  ;;  %v4516_v17 = vpack.c.bf16 %v4142_v21, %v4140_v56  ;;  %v4144_v58 = vld [vmem:[%s7736_s2 + $0x3c0] sm:$0xff]  ;;  %v4146_v24 = vld [vmem:[%s7736_s2 + $0x3d0] sm:$0xff] }
 0x16d   : > { %v4835_v20 = vadd.f32 %v1149_v45, %v636_v9  ;;  %v1151_v5 = vpop.f32.mrb[25].mxu0  ;;  %1488 = vmatmul.mubr.f32.gmra.mrb[58].mxu1 %v4831_v18  ;;  %v6037_v50 = vsel %vm1718_vm1, %v1757_v22, %v1761_v60  ;;  %v6040_v4 = vsel %vm2111_vm2, %v2150_v38, %v2154_v30  ;;  %v4145_v38 = vld [vmem:[%s7736_s2 + $0x3c8] sm:$0xff] }
 0x16e   : > { %7784 = vst [vmem:[#allocation21_spill] sm:$0xff] %v6040_v4  ;;  %v4837_v9 = vadd.f32 %v1151_v5, %v637_v23  ;;  %4509 = vmatpush1.bf16.msra.mxu1 %v4508_v13  ;;  %v6045_v18 = vsel %vm1718_vm1, %v1759_v61, %v1763_v11  ;;  %v6048_v19 = vsel %vm2111_vm2, %v2152_v29, %v2156_v54 }
 0x16f   : > { %7785 = vst [vmem:[#allocation22_spill] sm:$0xff] %v6048_v19  ;;  %4511 = vmatprep.subr.bf16.mxu1 %v4510_v43  ;;  %v1765_v45 = vrot.slane %v4835_v20, 2  ;;  %v2158_v52 = vrot.slane %v4835_v20, 4  ;;  %v640_v29 = vadd.f32 %v5665_v33, %v5660_v31  ;;  %v641_v31 = vadd.f32 %v5668_v34, %v5662_v32  ;;  %v4151_v32 = vld [vmem:[%s7736_s2 + $0x3f8] sm:$0xff] }
 0x170   : > { %v1155_v22 = vpop.f32.mrb[26].mxu0  ;;  %1493 = vmatprep.mubr.f32.mxu1 %v4837_v9  ;;  %v1767_v13 = vrot.slane %v4837_v9, 2  ;;  %v2160_v61 = vrot.slane %v4837_v9, 4  ;;  %v4518_v9 = vpack.c.bf16 %v4147_v27, %v4145_v38  ;;  %v4520_v19 = vpack.c.bf16 %v4146_v24, %v4144_v58  ;;  %v4148_v38 = vld [vmem:[%s7736_s2 + $0x3e0] sm:$0xff]  ;;  %v4150_v27 = vld [vmem:[%s7736_s2 + $0x3f0] sm:$0xff] }
 0x171   : > { %v4839_v23 = vadd.f32 %v1155_v22, %v638_v28  ;;  %v1157_v43 = vpop.f32.mrb[27].mxu0  ;;  %1494 = vmatmul.mubr.f32.gmra.mrb[60].mxu1 %v4835_v20  ;;  %v6065_v5 = vsel %vm1718_vm1, %v1761_v60, %v1765_v45  ;;  %v6068_v56 = vsel %vm2111_vm2, %v2154_v30, %v2158_v52  ;;  %v4149_v30 = vld [vmem:[%s7736_s2 + $0x3e8] sm:$0xff] }
 0x172   : > { %7786 = vst [vmem:[#allocation23_spill] sm:$0xff] %v6068_v56  ;;  %v4841_v28 = vadd.f32 %v1157_v43, %v639_v26  ;;  %4513 = vmatpush1.bf16.msra.mxu1 %v4512_v15  ;;  %v6073_v20 = vsel %vm1718_vm1, %v1763_v11, %v1767_v13  ;;  %v6076_v21 = vsel %vm2111_vm2, %v2156_v54, %v2160_v61 }
 0x173   : > { %7787 = vst [vmem:[#allocation24_spill] sm:$0xff] %v6076_v21  ;;  %4515 = vmatprep.subr.bf16.mxu1 %v4514_v41  ;;  %v1769_v22 = vrot.slane %v4839_v23, 2  ;;  %v2162_v4 = vrot.slane %v4839_v23, 4  ;;  %v642_v54 = vadd.f32 %v5665_v33, %v5670_v35  ;;  %v643_v35 = vadd.f32 %v5668_v34, %v5672_v36  ;;  %v4155_v36 = vld [vmem:[%s7736_s2 + $0x418] sm:$0xff] }
 0x174   : > { %v1161_v60 = vpop.f32.mrb[28].mxu0  ;;  %1499 = vmatprep.mubr.f32.mxu1 %v4841_v28  ;;  %v1771_v15 = vrot.slane %v4841_v28, 2  ;;  %v2164_v11 = vrot.slane %v4841_v28, 4  ;;  %v4522_v28 = vpack.c.bf16 %v4151_v32, %v4149_v30  ;;  %v4524_v21 = vpack.c.bf16 %v4150_v27, %v4148_v38 }
 0x175   : > { %v4843_v26 = vadd.f32 %v1161_v60, %v640_v29  ;;  %v1163_v41 = vpop.f32.mrb[29].mxu0  ;;  %1500 = vmatmul.mubr.f32.gmra.mrb[62].mxu1 %v4839_v23  ;;  %v6093_v43 = vsel %vm1718_vm1, %v1765_v45, %v1769_v22  ;;  %v6096_v58 = vsel %vm2111_vm2, %v2158_v52, %v2162_v4  ;;  %v4153_v52 = vld [vmem:[%s7736_s2 + $0x408] sm:$0xff]  ;;  %v645_v38 = vadd.f32 %v5668_v34, %v5684_v42 }
 0x176   : > { %v4845_v29 = vadd.f32 %v1163_v41, %v641_v31  ;;  %4517 = vmatpush1.bf16.msra.mxu1 %v4516_v17  ;;  %v6101_v23 = vsel %vm1718_vm1, %v1767_v13, %v1771_v15  ;;  %v6104_v24 = vsel %vm2111_vm2, %v2160_v61, %v2164_v11  ;;  %v644_v61 = vadd.f32 %v5665_v33, %v5676_v39 }
 0x177   : > { %4519 = vmatprep.subr.bf16.mxu1 %v4518_v9  ;;  %v1773_v60 = vrot.slane %v4843_v26, 2  ;;  %v2166_v56 = vrot.slane %v4843_v26, 4  ;;  %v4526_v39 = vpack.c.bf16 %v4155_v36, %v4153_v52  ;;  %v647_v52 = vadd.f32 %v5668_v34, %v5702_v55  ;;  %v1578_v36 = vld [vmem:[#allocation3 + $0x8] sm:$0xfc] }
 0x178   : > { %v1167_v45 = vpop.f32.mrb[30].mxu0  ;;  %1505 = vmatprep.mubr.f32.mxu1 %v4845_v29  ;;  %v1775_v17 = vrot.slane %v4845_v29, 2  ;;  %v2168_v13 = vrot.slane %v4845_v29, 4  ;;  %v1722_v55 = vrot.slane %v1578_v36, 2 }
 0x179   : > { %v4847_v31 = vadd.f32 %v1167_v45, %v642_v54  ;;  %v1169_v9 = vpop.f32.mrb[31].mxu0  ;;  %1506 = vmatmul.mubr.f32.gmra.mrb[64].mxu1 %v4843_v26  ;;  %v6115_v30 = vsel %vm1718_vm1, %v1769_v22, %v1773_v60  ;;  %v6118_v32 = vsel %vm2111_vm2, %v2162_v4, %v2166_v56 }
 0x17a   : > { %7788 = vst [vmem:[#allocation25_spill] sm:$0xff] %v6118_v32  ;;  %v4849_v41 = vadd.f32 %v1169_v9, %v643_v35  ;;  %4521 = vmatpush1.bf16.msra.mxu1 %v4520_v19  ;;  %v6123_v27 = vsel %vm1718_vm1, %v1771_v15, %v1775_v17  ;;  %v6126_v54 = vsel %vm2111_vm2, %v2164_v11, %v2168_v13  ;;  %v2040_v11 = vld [vmem:[#allocation3 + $0x120] sm:$0xf] }
 0x17b   : > { %4523 = vmatprep.subr.bf16.mxu1 %v4522_v28  ;;  %v1777_v26 = vrot.slane %v4847_v31, 2  ;;  %v2170_v29 = vrot.slane %v4847_v31, 4  ;;  %v646_v35 = vadd.f32 %v5665_v33, %v5694_v51 }
 0x17c   : > { %v1173_v22 = vpop.f32.mrb[32].mxu0  ;;  %1511 = vmatprep.mubr.f32.mxu1 %v4849_v41  ;;  %v1779_v45 = vrot.slane %v4849_v41, 2  ;;  %v2172_v4 = vrot.slane %v4849_v41, 4 }
 0x17d   : > { %v4851_v32 = vadd.f32 %v1173_v22, %v644_v61  ;;  %v1175_v42 = vpop.f32.mrb[33].mxu0  ;;  %1512 = vmatmul.mubr.f32.gmra.mrb[66].mxu1 %v4847_v31  ;;  %v6131_v19 = vsel %vm1718_vm1, %v1773_v60, %v1777_v26  ;;  %v6134_v15 = vsel %vm2111_vm2, %v2166_v56, %v2170_v29  ;;  %v2041_v31 = vld [vmem:[#allocation3 + $0x128] sm:$0xf] }
 0x17e   : > { %7789 = vst [vmem:[#allocation26_spill] sm:$0xff] %v6134_v15  ;;  %v4853_v28 = vadd.f32 %v1175_v42, %v645_v38  ;;  %4525 = vmatpush1.bf16.msra.mxu1 %v4524_v21  ;;  %v6139_v61 = vsel %vm1718_vm1, %v1775_v17, %v1779_v45  ;;  %v6142_v33 = vsel %vm2111_vm2, %v2168_v13, %v2172_v4  ;;  %v2182_v38 = vrot.slane %v2040_v11, 4  ;;  %v1577_v21 = vld [vmem:[#allocation3] sm:$0xfc] }
 0x17f   : > { %7790 = vst [vmem:[#allocation27_spill] sm:$0xff] %v6142_v33  ;;  %4527 = vmatprep.subr.bf16.mxu1 %v4526_v39  ;;  %v1781_v51 = vrot.slane %v4851_v32, 2  ;;  %v2174_v60 = vrot.slane %v4851_v32, 4 }
 0x180   : > { %v1179_v9 = vpop.f32.mrb[34].mxu0  ;;  %1517 = vmatprep.mubr.f32.mxu1 %v4853_v28  ;;  %v1783_v56 = vrot.slane %v4853_v28, 2  ;;  %v2176_v41 = vrot.slane %v4853_v28, 4 }
 0x181   : > { %v6144_v22 = vadd.f32 %v1179_v9, %v646_v35  ;;  %v1181_v34 = vpop.f32.mrb[35].mxu0  ;;  %1518 = vmatmul.mubr.f32.gmra.mrb[68].mxu1 %v4851_v32  ;;  %v6147_v17 = vsel %vm1718_vm1, %v1777_v26, %v1781_v51  ;;  %v6150_v13 = vsel %vm2111_vm2, %v2170_v29, %v2174_v60  ;;  %v2184_v35 = vrot.slane %v2041_v31, 4  ;;  %v4152_v32 = vld [vmem:[%s7736_s2 + $0x400] sm:$0xff]  ;;  %v4154_v26 = vld [vmem:[%s7736_s2 + $0x410] sm:$0xff] }
 0x182   : > { %7791 = vst [vmem:[#allocation28_spill] sm:$0xff] %v6150_v13  ;;  %v6152_v39 = vadd.f32 %v1181_v34, %v647_v52  ;;  %v6155_v42 = vsel %vm1718_vm1, %v1779_v45, %v1783_v56  ;;  %v6158_v28 = vsel %vm2111_vm2, %v2172_v4, %v2176_v41  ;;  %v1719_v45 = vrot.slane %v1577_v21, 2  ;;  %v4157_v4 = vld [vmem:[%s7736_s2 + $0x428] sm:$0xff]  ;;  %v4159_v52 = vld [vmem:[%s7736_s2 + $0x438] sm:$0xff] }
 0x183   : > { %7792 = vst [vmem:[#allocation29_spill] sm:$0xff] %v6158_v28  ;;  %v1785_v29 = vrot.slane %v6144_v22, 2  ;;  %v2178_v11 = vrot.slane %v6144_v22, 4  ;;  %v7793_v9 = vrot.slane %v5713_v62, 2  ;;  %v4528_v36 = vpack.c.bf16 %v4154_v26, %v4152_v32 }
 0x184   : > { %1523 = vmatprep.mubr.f32.mxu1 %v6152_v39  ;;  %v2180_v31 = vrot.slane %v6152_v39, 4  ;;  %v7794_v15 = vrot.slane %v6152_v39, 2  ;;  %v7795_v32 = vrot.slane %v5710_v59, 2 }
 0x185   : > { %1524 = vmatmul.mubr.f32.gmra.mrb[70].mxu1 %v6144_v22  ;;  %v1724_v34 = vsel %vm1718_vm1, %v1722_v55, %v7793_v9  ;;  %v6184_v21 = vsel %vm1718_vm1, %v1781_v51, %v1785_v29  ;;  %v6187_v13 = vsel %vm2111_vm2, %v2174_v60, %v2178_v11  ;;  %v6190_v28 = vsel %vm2111_vm2, %v2178_v11, %v2182_v38  ;;  %v4156_v60 = vld [vmem:[%s7736_s2 + $0x420] sm:$0xff]  ;;  %v4158_v38 = vld [vmem:[%s7736_s2 + $0x430] sm:$0xff] }
 0x186   : > { %1893 = vmatprep.mubr.f32.mxu1 %v1724_v34  ;;  %v6195_v33 = vsel %vm1718_vm1, %v1783_v56, %v7794_v15  ;;  %v6198_v55 = vsel %vm2111_vm2, %v2176_v41, %v2180_v31  ;;  %v6201_v9 = vsel %vm2111_vm2, %v2180_v31, %v2184_v35  ;;  %v4530_v51 = vpack.c.bf16 %v4159_v52, %v4157_v4  ;;  %v4161_v56 = vld [vmem:[%s7736_s2 + $0x448] sm:$0xff]  ;;  %v4163_v41 = vld [vmem:[%s7736_s2 + $0x458] sm:$0xff]  ;;  %v4160_v11 = vld [vmem:[%s7736_s2 + $0x440] sm:$0xff] }
 0x187   : > { %v1721_v15 = vsel %vm1718_vm1, %v1719_v45, %v7795_v32  ;;  %v4532_v35 = vpack.c.bf16 %v4158_v38, %v4156_v60  ;;  %v4534_v26 = vpack.c.bf16 %v4163_v41, %v4161_v56  ;;  %v4162_v45 = vld [vmem:[%s7736_s2 + $0x450] sm:$0xff]  ;;  %v4165_v4 = vld [vmem:[%s7736_s2 + $0x468] sm:$0xff]  ;;  %v4167_v52 = vld [vmem:[%s7736_s2 + $0x478] sm:$0xff] }
 0x188   : > { %v4164_v31 = vld [vmem:[%s7736_s2 + $0x460] sm:$0xff]  ;;  %v4166_v34 = vld [vmem:[%s7736_s2 + $0x470] sm:$0xff]  ;;  %v2705_v41 = vld [vmem:[%s7737_s3 + $0x8] sm:$0xff] }
 0x189   : > { %1894 = vmatmul.mubr.f32.vlgmr.msra.gmra.mrb[36].mxu1 %v1721_v15  ;;  %v4168_v38 = vld [vmem:[%s7736_s2 + $0x480] sm:$0xff]  ;;  %v4170_v32 = vld [vmem:[%s7736_s2 + $0x490] sm:$0xff]  ;;  %v4173_v15 = vld [vmem:[%s7736_s2 + $0x4a8] sm:$0xff] }
 0x18a   : > { %4529 = vmatpush1.bf16.msra.mxu1 %v4528_v36  ;;  %1899 = vmatprep.mubr.f32.mxu1 %v5786_v6  ;;  %v4536_v6 = vpack.c.bf16 %v4162_v45, %v4160_v11  ;;  %v4538_v36 = vpack.c.bf16 %v4167_v52, %v4165_v4  ;;  %v4174_v56 = vld [vmem:[%s7736_s2 + $0x4b0] sm:$0xff]  ;;  %v2709_v4 = vld [vmem:[%s7737_s3 + $0x28] sm:$0xff]  ;;  %v2711_v52 = vld [vmem:[%s7737_s3 + $0x38] sm:$0xff] }
 0x18b   : > { %4531 = vmatprep.subr.bf16.mxu1 %v4530_v51  ;;  %v4169_v51 = vld [vmem:[%s7736_s2 + $0x488] sm:$0xff]  ;;  %v2706_v45 = vld [vmem:[%s7737_s3 + $0x10] sm:$0xff] }
 0x18c   : > { %v7799_v22 = vld [vmem:[#allocation8_spill] sm:$0xff] }
 0x18d   : > { %1900 = vmatmul.mubr.f32.gmra.mrb[38].mxu1 %v5778_v37  ;;  %v4171_v37 = vld [vmem:[%s7736_s2 + $0x498] sm:$0xff] }
 0x18e   : > { %1905 = vmatprep.mubr.f32.mxu1 %v5813_v25  ;;  %4533 = vmatpush1.bf16.msra.mxu1 %v4532_v35  ;;  %v4540_v25 = vpack.c.bf16 %v4166_v34, %v4164_v31  ;;  %v4542_v60 = vpack.c.bf16 %v4171_v37, %v4169_v51  ;;  %v2707_v35 = vld [vmem:[%s7737_s3 + $0x18] sm:$0xff]  ;;  %v4594_v31 = vpack.c.bf16 %v2711_v52, %v2709_v4  ;;  %v2708_v34 = vld [vmem:[%s7737_s3 + $0x20] sm:$0xff]  ;;  %v2710_v51 = vld [vmem:[%s7737_s3 + $0x30] sm:$0xff] }
 0x18f   : > { %4535 = vmatprep.subr.bf16.mxu1 %v4534_v26  ;;  %v4544_v26 = vpack.c.bf16 %v4170_v32, %v4168_v38  ;;  %v4590_v11 = vpack.c.bf16 %v2707_v35, %v2705_v41  ;;  %v4179_v37 = vld [vmem:[%s7736_s2 + $0x4d8] sm:$0xff]  ;;  %v4596_v38 = vpack.c.bf16 %v2710_v51, %v2708_v34  ;;  %v2716_v4 = vld [vmem:[%s7737_s3 + $0x60] sm:$0xff]  ;;  %v2718_v52 = vld [vmem:[%s7737_s3 + $0x70] sm:$0xff] }
 0x190   : > { %v4183_v35 = vld [vmem:[%s7736_s2 + $0x4f8] sm:$0xff]  ;;  %v2721_v34 = vld [vmem:[%s7737_s3 + $0x88] sm:$0xff] }
 0x191   : > { %1906 = vmatmul.mubr.f32.gmra.mrb[40].mxu1 %v5808_v57  ;;  %v4175_v57 = vld [vmem:[%s7736_s2 + $0x4b8] sm:$0xff]  ;;  %4591 = vmatprep.subr.bf16.mxu0 %v4590_v11 }
 0x192   : > { %1911 = vmatprep.mubr.f32.mxu1 %v5849_v49  ;;  %4537 = vmatpush1.bf16.msra.mxu1 %v4536_v6  ;;  %v4172_v49 = vld [vmem:[%s7736_s2 + $0x4a0] sm:$0xff]  ;;  %v4546_v6 = vpack.c.bf16 %v4175_v57, %v4173_v15  ;;  %v2714_v57 = vld [vmem:[%s7737_s3 + $0x50] sm:$0xff]  ;;  %v2723_v51 = vld [vmem:[%s7737_s3 + $0x98] sm:$0xff] }
 0x193   : > { %4539 = vmatprep.subr.bf16.mxu1 %v4538_v36  ;;  %v4548_v32 = vpack.c.bf16 %v4174_v56, %v4172_v49  ;;  %v2712_v15 = vld [vmem:[%s7737_s3 + $0x40] sm:$0xff]  ;;  %v4181_v49 = vld [vmem:[%s7736_s2 + $0x4e8] sm:$0xff] }
 0x194   : > { %v4600_v11 = vpack.c.bf16 %v2714_v57, %v2712_v15  ;;  %v4189_v15 = vld [vmem:[%s7736_s2 + $0x528] sm:$0xff]  ;;  %v4606_v57 = vpack.c.bf16 %v2723_v51, %v2721_v34 }
 0x195   : > { %1912 = vmatmul.mubr.f32.gmra.mrb[42].mxu1 %v5841_v1  ;;  %v2704_v1 = vld [vmem:[%s7737_s3] sm:$0xff]  ;;  %v4197_v34 = vld [vmem:[%s7736_s2 + $0x568] sm:$0xff] }
 0x196   : > { %1917 = vmatprep.mubr.f32.mxu1 %v5877_v3  ;;  %4541 = vmatpush1.bf16.msra.mxu1 %v4540_v25  ;;  %v4177_v3 = vld [vmem:[%s7736_s2 + $0x4c8] sm:$0xff]  ;;  %v4592_v36 = vpack.c.bf16 %v2706_v45, %v2704_v1 }
 0x197   : > { %4543 = vmatprep.subr.bf16.mxu1 %v4542_v60  ;;  %v2713_v25 = vld [vmem:[%s7737_s3 + $0x48] sm:$0xff]  ;;  %v2715_v60 = vld [vmem:[%s7737_s3 + $0x58] sm:$0xff]  ;;  %v4550_v41 = vpack.c.bf16 %v4179_v37, %v4177_v3  ;;  %v4604_v37 = vpack.c.bf16 %v2718_v52, %v2716_v4 }
 0x198   : > { %4593 = vmatpush1.bf16.msra.mxu0 %v4592_v36  ;;  %v4598_v56 = vpack.c.bf16 %v2715_v60, %v2713_v25  ;;  %v2717_v1 = vld [vmem:[%s7737_s3 + $0x68] sm:$0xff]  ;;  %v2720_v60 = vld [vmem:[%s7737_s3 + $0x80] sm:$0xff]  ;;  %v4195_v4 = vld [vmem:[%s7736_s2 + $0x558] sm:$0xff] }
 0x199   : > { %1918 = vmatmul.mubr.f32.gmra.mrb[44].mxu1 %v5869_v48  ;;  %v4176_v48 = vld [vmem:[%s7736_s2 + $0x4c0] sm:$0xff]  ;;  %4595 = vmatprep.subr.bf16.mxu0 %v4594_v31  ;;  %v4185_v3 = vld [vmem:[%s7736_s2 + $0x508] sm:$0xff]  ;;  %v4187_v31 = vld [vmem:[%s7736_s2 + $0x518] sm:$0xff] }
 0x19a   : > { %1923 = vmatprep.mubr.f32.mxu1 %v5905_v40  ;;  %4545 = vmatpush1.bf16.msra.mxu1 %v4544_v26  ;;  %v4178_v40 = vld [vmem:[%s7736_s2 + $0x4d0] sm:$0xff]  ;;  %v2719_v26 = vld [vmem:[%s7737_s3 + $0x78] sm:$0xff]  ;;  %v2729_v52 = vld [vmem:[%s7737_s3 + $0xc8] sm:$0xff] }
 0x19b   : > { %4547 = vmatprep.subr.bf16.mxu1 %v4546_v6  ;;  %v4552_v45 = vpack.c.bf16 %v4178_v40, %v4176_v48  ;;  %v4554_v6 = vpack.c.bf16 %v4183_v35, %v4181_v49  ;;  %v4602_v36 = vpack.c.bf16 %v2719_v26, %v2717_v1  ;;  %v2725_v48 = vld [vmem:[%s7737_s3 + $0xa8] sm:$0xff]  ;;  %v2727_v40 = vld [vmem:[%s7737_s3 + $0xb8] sm:$0xff]  ;;  %v2724_v35 = vld [vmem:[%s7737_s3 + $0xa0] sm:$0xff] }
 0x19c   : > { %4597 = vmatpush1.bf16.msra.mxu0 %v4596_v38  ;;  %v2722_v38 = vld [vmem:[%s7737_s3 + $0x90] sm:$0xff] }
 0x19d   : > { %1924 = vmatmul.mubr.f32.gmra.mrb[46].mxu1 %v5897_v8  ;;  %v4180_v8 = vld [vmem:[%s7736_s2 + $0x4e0] sm:$0xff]  ;;  %4599 = vmatprep.subr.bf16.mxu0 %v4598_v56  ;;  %v4608_v49 = vpack.c.bf16 %v2722_v38, %v2720_v60  ;;  %v2726_v1 = vld [vmem:[%s7737_s3 + $0xb0] sm:$0xff]  ;;  %v2735_v60 = vld [vmem:[%s7737_s3 + $0xf8] sm:$0xff] }
 0x19e   : > { %1929 = vmatprep.mubr.f32.mxu1 %v5933_v10  ;;  %4549 = vmatpush1.bf16.msra.mxu1 %v4548_v32  ;;  %v4182_v10 = vld [vmem:[%s7736_s2 + $0x4f0] sm:$0xff]  ;;  %v4558_v32 = vpack.c.bf16 %v4187_v31, %v4185_v3  ;;  %v2728_v3 = vld [vmem:[%s7737_s3 + $0xc0] sm:$0xff] }
 0x19f   : > { %4551 = vmatprep.subr.bf16.mxu1 %v4550_v41  ;;  %v4556_v25 = vpack.c.bf16 %v4182_v10, %v4180_v8  ;;  %v4191_v41 = vld [vmem:[%s7736_s2 + $0x538] sm:$0xff]  ;;  %v4612_v8 = vpack.c.bf16 %v2726_v1, %v2724_v35  ;;  %v2736_v1 = vld [vmem:[%s7737_s3 + $0x100] sm:$0xff] }
 0x1a0   : > { %4601 = vmatpush1.bf16.msra.mxu0 %v4600_v11  ;;  %v4562_v26 = vpack.c.bf16 %v4191_v41, %v4189_v15  ;;  %v4193_v11 = vld [vmem:[%s7736_s2 + $0x548] sm:$0xff] }
 0x1a1   : > { %1930 = vmatmul.mubr.f32.gmra.mrb[48].mxu1 %v5925_v2  ;;  %v4184_v2 = vld [vmem:[%s7736_s2 + $0x500] sm:$0xff]  ;;  %4603 = vmatprep.subr.bf16.mxu0 %v4602_v36  ;;  %v2730_v36 = vld [vmem:[%s7737_s3 + $0xd0] sm:$0xff]  ;;  %v4566_v31 = vpack.c.bf16 %v4195_v4, %v4193_v11  ;;  %v2741_v4 = vld [vmem:[%s7737_s3 + $0x128] sm:$0xff] }
 0x1a2   : > { %1935 = vmatprep.mubr.f32.mxu1 %v5961_v12  ;;  %4553 = vmatpush1.bf16.msra.mxu1 %v4552_v45  ;;  %v4186_v12 = vld [vmem:[%s7736_s2 + $0x510] sm:$0xff]  ;;  %v4610_v45 = vpack.c.bf16 %v2727_v40, %v2725_v48  ;;  %v4616_v38 = vpack.c.bf16 %v2730_v36, %v2728_v3  ;;  %v4203_v48 = vld [vmem:[%s7736_s2 + $0x598] sm:$0xff]  ;;  %v2737_v40 = vld [vmem:[%s7737_s3 + $0x108] sm:$0xff] }
 0x1a3   : > { %4555 = vmatprep.subr.bf16.mxu1 %v4554_v6  ;;  %v4560_v56 = vpack.c.bf16 %v4186_v12, %v4184_v2  ;;  %v2731_v6 = vld [vmem:[%s7737_s3 + $0xd8] sm:$0xff]  ;;  %v2732_v2 = vld [vmem:[%s7737_s3 + $0xe0] sm:$0xff]  ;;  %v2734_v12 = vld [vmem:[%s7737_s3 + $0xf0] sm:$0xff] }
 0x1a4   : > { %4605 = vmatpush1.bf16.msra.mxu0 %v4604_v37  ;;  %v4614_v51 = vpack.c.bf16 %v2731_v6, %v2729_v52  ;;  %v4199_v37 = vld [vmem:[%s7736_s2 + $0x578] sm:$0xff]  ;;  %v2742_v3 = vld [vmem:[%s7737_s3 + $0x130] sm:$0xff] }
 0x1a5   : > { %1936 = vmatmul.mubr.f32.gmra.mrb[50].mxu1 %v5953_v47  ;;  %v4188_v47 = vld [vmem:[%s7736_s2 + $0x520] sm:$0xff]  ;;  %4607 = vmatprep.subr.bf16.mxu0 %v4606_v57  ;;  %v4570_v15 = vpack.c.bf16 %v4199_v37, %v4197_v34  ;;  %v4201_v57 = vld [vmem:[%s7736_s2 + $0x588] sm:$0xff]  ;;  %v2743_v52 = vld [vmem:[%s7737_s3 + $0x138] sm:$0xff] }
 0x1a6   : > { %1941 = vmatprep.mubr.f32.mxu1 %v5989_v14  ;;  %4557 = vmatpush1.bf16.msra.mxu1 %v4556_v25  ;;  %v4190_v14 = vld [vmem:[%s7736_s2 + $0x530] sm:$0xff]  ;;  %v2733_v25 = vld [vmem:[%s7737_s3 + $0xe8] sm:$0xff] }
 0x1a7   : > { %4559 = vmatprep.subr.bf16.mxu1 %v4558_v32  ;;  %v4564_v10 = vpack.c.bf16 %v4190_v14, %v4188_v47  ;;  %v4618_v41 = vpack.c.bf16 %v2735_v60, %v2733_v25  ;;  %v4574_v47 = vpack.c.bf16 %v4203_v48, %v4201_v57  ;;  %v4205_v14 = vld [vmem:[%s7736_s2 + $0x5a8] sm:$0xff]  ;;  %v2744_v60 = vld [vmem:[%s7737_s3 + $0x140] sm:$0xff]  ;;  %v4214_v48 = vld [vmem:[%s7736_s2 + $0x5f0] sm:$0xff] }
 0x1a8   : > { %4609 = vmatpush1.bf16.msra.mxu0 %v4608_v49  ;;  %v2739_v49 = vld [vmem:[%s7737_s3 + $0x118] sm:$0xff]  ;;  %v2745_v34 = vld [vmem:[%s7737_s3 + $0x148] sm:$0xff] }
 0x1a9   : > { %1942 = vmatmul.mubr.f32.gmra.mrb[52].mxu1 %v5981_v63  ;;  %v4192_v63 = vld [vmem:[%s7736_s2 + $0x540] sm:$0xff]  ;;  %4611 = vmatprep.subr.bf16.mxu0 %v4610_v45  ;;  %v4622_v11 = vpack.c.bf16 %v2739_v49, %v2737_v40  ;;  %v4207_v45 = vld [vmem:[%s7736_s2 + $0x5b8] sm:$0xff] }
 0x1aa   : > { %1947 = vmatprep.mubr.f32.mxu1 %v6017_v16  ;;  %4561 = vmatpush1.bf16.msra.mxu1 %v4560_v56  ;;  %v4194_v16 = vld [vmem:[%s7736_s2 + $0x550] sm:$0xff]  ;;  %v4620_v56 = vpack.c.bf16 %v2734_v12, %v2732_v2  ;;  %v4578_v36 = vpack.c.bf16 %v4207_v45, %v4205_v14  ;;  %v4213_v12 = vld [vmem:[%s7736_s2 + $0x5e8] sm:$0xff]  ;;  %v1613_v49 = vld [vmem:[#allocation3 + $0x120] sm:$0x3] }
 0x1ab   : > { %4563 = vmatprep.subr.bf16.mxu1 %v4562_v26  ;;  %v4568_v32 = vpack.c.bf16 %v4194_v16, %v4192_v63  ;;  %v2738_v26 = vld [vmem:[%s7737_s3 + $0x110] sm:$0xff]  ;;  %v4626_v63 = vpack.c.bf16 %v2743_v52, %v2741_v4  ;;  %v4211_v16 = vld [vmem:[%s7736_s2 + $0x5d8] sm:$0xff]  ;;  %v7804_v14 = vld [vmem:[#allocation11_spill] sm:$0xff] }
 0x1ac   : > { %4613 = vmatpush1.bf16.msra.mxu0 %v4612_v8  ;;  %v4624_v6 = vpack.c.bf16 %v2738_v26, %v2736_v1  ;;  %v2038_v26 = vld [vmem:[#allocation3] sm:$0xf0]  ;;  %v7811_v4 = vld [vmem:[#allocation20_spill] sm:$0xff]  ;;  %v7812_v52 = vld [vmem:[#allocation19_spill] sm:$0xff] }
 0x1ad   : > { %1948 = vmatmul.mubr.f32.gmra.mrb[54].mxu1 %v6009_v44  ;;  %v4196_v44 = vld [vmem:[%s7736_s2 + $0x560] sm:$0xff]  ;;  %4615 = vmatprep.subr.bf16.mxu0 %v4614_v51  ;;  %v2747_v51 = vld [vmem:[%s7737_s3 + $0x158] sm:$0xff] }
 0x1ae   : > { %1953 = vmatprep.mubr.f32.mxu1 %v6045_v18  ;;  %4565 = vmatpush1.bf16.msra.mxu1 %v4564_v10  ;;  %v4198_v18 = vld [vmem:[%s7736_s2 + $0x570] sm:$0xff]  ;;  %v2740_v10 = vld [vmem:[%s7737_s3 + $0x120] sm:$0xff]  ;;  %v4630_v2 = vpack.c.bf16 %v2747_v51, %v2745_v34  ;;  %v7810_v45 = vld [vmem:[#allocation17_spill] sm:$0xff] }
 0x1af   : > { %4567 = vmatprep.subr.bf16.mxu1 %v4566_v31  ;;  %v4572_v35 = vpack.c.bf16 %v4198_v18, %v4196_v44  ;;  %v4209_v31 = vld [vmem:[%s7736_s2 + $0x5c8] sm:$0xff]  ;;  %v4628_v37 = vpack.c.bf16 %v2742_v3, %v2740_v10  ;;  %v7815_v10 = vld [vmem:[#allocation24_spill] sm:$0xff]  ;;  %v4308_v34 = vld [vmem:[%s7737_s3 + $0x380] sm:$0xff] }
 0x1b0   : > { %4617 = vmatpush1.bf16.msra.mxu0 %v4616_v38  ;;  %v2746_v38 = vld [vmem:[%s7737_s3 + $0x150] sm:$0xff]  ;;  %v7816_v3 = vld [vmem:[#allocation23_spill] sm:$0xff] }
 0x1b1   : > { %1954 = vmatmul.mubr.f32.gmra.mrb[56].mxu1 %v6037_v50  ;;  %v4200_v50 = vld [vmem:[%s7736_s2 + $0x580] sm:$0xff]  ;;  %4619 = vmatprep.subr.bf16.mxu0 %v4618_v41  ;;  %v4632_v44 = vpack.c.bf16 %v2746_v38, %v2744_v60  ;;  %v4310_v51 = vld [vmem:[%s7737_s3 + $0x390] sm:$0xff]  ;;  %v7822_v60 = vlaneseq }
 0x1b2   : > { %1959 = vmatprep.mubr.f32.mxu1 %v6073_v20  ;;  %4569 = vmatpush1.bf16.msra.mxu1 %v4568_v32  ;;  %v4202_v20 = vld [vmem:[%s7736_s2 + $0x590] sm:$0xff]  ;;  %v4582_v32 = vpack.c.bf16 %v4211_v16, %v4209_v31  ;;  %v4212_v41 = vld [vmem:[%s7736_s2 + $0x5e0] sm:$0xff]  ;;  %v7820_v31 = vld [vmem:[#allocation29_spill] sm:$0xff] }
 0x1b3   : > { %4571 = vmatprep.subr.bf16.mxu1 %v4570_v15  ;;  %v4576_v8 = vpack.c.bf16 %v4202_v20, %v4200_v50  ;;  %v4215_v15 = vld [vmem:[%s7736_s2 + $0x5f8] sm:$0xff]  ;;  %v2748_v16 = vld [vmem:[%s7737_s3 + $0x160] sm:$0xff]  ;;  %vm6619_vm3 = vcmp.lt.s32.totalorder %v7822_v60, 224 }
 0x1b4   : > { %4621 = vmatpush1.bf16.msra.mxu0 %v4620_v56  ;;  %v4586_v57 = vpack.c.bf16 %v4215_v15, %v4213_v12  ;;  %v2039_v56 = vld [vmem:[#allocation3 + $0x8] sm:$0xf0]  ;;  %v7802_v20 = vld [vmem:[#allocation9_spill] sm:$0xff]  ;;  %v2754_v15 = vld [vmem:[%s7737_s3 + $0x190] sm:$0xff] }
 0x1b5   : > { %1960 = vmatmul.mubr.f32.gmra.mrb[58].mxu1 %v6065_v5  ;;  %v4204_v5 = vld [vmem:[%s7736_s2 + $0x5a0] sm:$0xff]  ;;  %4623 = vmatprep.subr.bf16.mxu0 %v4622_v11 }
 0x1b6   : > { %1965 = vmatprep.mubr.f32.mxu1 %v6101_v23  ;;  %4573 = vmatpush1.bf16.msra.mxu1 %v4572_v35  ;;  %v4206_v23 = vld [vmem:[%s7736_s2 + $0x5b0] sm:$0xff]  ;;  %v1789_v35 = vrot.slane %v1613_v49, 2  ;;  %v7805_v11 = vld [vmem:[#allocation14_spill] sm:$0xff]  ;;  %v2759_v49 = vld [vmem:[%s7737_s3 + $0x1b8] sm:$0xff] }
 0x1b7   : > { %4575 = vmatprep.subr.bf16.mxu1 %v4574_v47  ;;  %v4580_v25 = vpack.c.bf16 %v4206_v23, %v4204_v5  ;;  %v2112_v47 = vrot.slane %v2038_v26, 4  ;;  %v7818_v5 = vld [vmem:[#allocation27_spill] sm:$0xff]  ;;  %v7819_v23 = vld [vmem:[#allocation26_spill] sm:$0xff]  ;;  %v4319_v26 = vld [vmem:[%s7737_s3 + $0x3d8] sm:$0xff] }
 0x1b8   : > { %4625 = vmatpush1.bf16.msra.mxu0 %v4624_v6  ;;  %v7813_v6 = vld [vmem:[#allocation22_spill] sm:$0xff] }
 0x1b9   : > { %1966 = vmatmul.mubr.f32.gmra.mrb[60].mxu1 %v6093_v43  ;;  %v4208_v43 = vld [vmem:[%s7736_s2 + $0x5c0] sm:$0xff]  ;;  %4627 = vmatprep.subr.bf16.mxu0 %v4626_v63  ;;  %v7821_v63 = vld [vmem:[#allocation28_spill] sm:$0xff] }
 0x1ba   : > { %1971 = vmatprep.mubr.f32.mxu1 %v6123_v27  ;;  %4577 = vmatpush1.bf16.msra.mxu1 %v4576_v8  ;;  %v4210_v27 = vld [vmem:[%s7736_s2 + $0x5d0] sm:$0xff]  ;;  %v7814_v8 = vld [vmem:[#allocation21_spill] sm:$0xff]  ;;  %v2752_v12 = vld [vmem:[%s7737_s3 + $0x180] sm:$0xff] }
 0x1bb   : > { %4579 = vmatprep.subr.bf16.mxu1 %v4578_v36  ;;  %v4584_v18 = vpack.c.bf16 %v4210_v27, %v4208_v43  ;;  %v7817_v36 = vld [vmem:[#allocation25_spill] sm:$0xff]  ;;  %v4340_v60 = vld [vmem:[%s7737_s3 + $0x480] sm:$0xff] }
 0x1bc   : > { %4629 = vmatpush1.bf16.msra.mxu0 %v4628_v37  ;;  %v2755_v43 = vld [vmem:[%s7737_s3 + $0x198] sm:$0xff] }
 0x1bd   : > { %1972 = vmatmul.mubr.f32.gmra.mrb[62].mxu1 %v6115_v30  ;;  %4631 = vmatprep.subr.bf16.mxu0 %v4630_v2  ;;  %v1614_v30 = vld [vmem:[#allocation3 + $0x128] sm:$0x3]  ;;  %v6630_v27 = vld [vmem:[#allocation3 + $0x120] sm:$0xff] }
 0x1be   : > { %1977 = vmatprep.mubr.f32.mxu1 %v6139_v61  ;;  %4581 = vmatpush1.bf16.msra.mxu1 %v4580_v25  ;;  %v4588_v61 = vpack.c.bf16 %v4214_v48, %v4212_v41  ;;  %v1791_v40 = vrot.slane %v1614_v30, 2  ;;  %v6616_v25 = vpack.c.bf16 %v4310_v51, %v4308_v34  ;;  %2620 = vst.msk [vmem:[#allocation4] ss:$8 sm:$0x3] %vm6619_vm3, %v6630_v27  ;;  %v4312_v41 = vld [vmem:[%s7737_s3 + $0x3a0] sm:$0xff]  ;;  %v4314_v48 = vld [vmem:[%s7737_s3 + $0x3b0] sm:$0xff] }
 0x1bf   : > { %4583 = vmatprep.subr.bf16.mxu1 %v4582_v32  ;;  %v2753_v32 = vld [vmem:[%s7737_s3 + $0x188] sm:$0xff]  ;;  %350 = vst.msk [vmem:[#allocation4 + $0x128] sm:$0xff] %vm349_vm4, %v6630_v27  ;;  %v4343_v51 = vld [vmem:[%s7737_s3 + $0x498] sm:$0xff] }
 0x1c0   : > { %4633 = vmatpush1.bf16.msra.mxu0 %v4632_v44  ;;  %v4638_v2 = vpack.c.bf16 %v2755_v43, %v2753_v32  ;;  %v4313_v44 = vld [vmem:[%s7737_s3 + $0x3a8] sm:$0xff]  ;;  %v4342_v32 = vld [vmem:[%s7737_s3 + $0x490] sm:$0xff] }
 0x1c1   : > { %1978 = vmatmul.mubr.f32.gmra.mrb[64].mxu1 %v6131_v19  ;;  %v7796_v19 = vrot.slane %v6152_v39, 2  ;;  %v4341_v34 = vld [vmem:[%s7737_s3 + $0x488] sm:$0xff] }
 0x1c2   : > { %1983 = vmatprep.mubr.f32.mxu1 %v6155_v42  ;;  %4585 = vmatpush1.bf16.msra.mxu1 %v4584_v18  ;;  %v2115_v42 = vrot.slane %v2039_v56, 4  ;;  %v4640_v18 = vpack.c.bf16 %v2754_v15, %v2752_v12  ;;  %v6800_v43 = vpack.c.bf16 %v4343_v51, %v4341_v34  ;;  %v4345_v12 = vld [vmem:[%s7737_s3 + $0x4a8] sm:$0xff]  ;;  %v4347_v15 = vld [vmem:[%s7737_s3 + $0x4b8] sm:$0xff] }
 0x1c3   : > { %4587 = vmatprep.subr.bf16.mxu1 %v4586_v57  ;;  %v1792_v1 = vsel %vm1718_vm1, %v7796_v19, %v1791_v40  ;;  %v4315_v57 = vld [vmem:[%s7737_s3 + $0x3b8] sm:$0xff]  ;;  %v2757_v40 = vld [vmem:[%s7737_s3 + $0x1a8] sm:$0xff]  ;;  %v2758_v19 = vld [vmem:[%s7737_s3 + $0x1b0] sm:$0xff] }
 0x1c4   : > { %v6656_v30 = vpack.c.bf16 %v4315_v57, %v4313_v44  ;;  %v4642_v56 = vpack.c.bf16 %v2759_v49, %v2757_v40  ;;  %v6812_v44 = vpack.c.bf16 %v4347_v15, %v4345_v12  ;;  %v4346_v57 = vld [vmem:[%s7737_s3 + $0x4b0] sm:$0xff]  ;;  %v4351_v40 = vld [vmem:[%s7737_s3 + $0x4d8] sm:$0xff] }
 0x1c5   : > { %1984 = vmatmul.mubr.f32.gmra.mrb[66].mxu1 %v6147_v17  ;;  %v1790_v17 = vsel %vm1718_vm1, %v1785_v29, %v1789_v35  ;;  %v7800_v29 = vld [vmem:[#allocation7_spill] sm:$0xff]  ;;  %v2756_v35 = vld [vmem:[%s7737_s3 + $0x1a0] sm:$0xff] }
 0x1c6   : > { %1989 = vmatprep.mubr.f32.mxu1 %v6195_v33  ;;  %4589 = vmatpush1.bf16.msra.mxu1 %v4588_v61  ;;  %v7797_v33 = vrot.slane %v5713_v62, 4  ;;  %v7801_v62 = vld [vmem:[#allocation10_spill] sm:$0xff]  ;;  %v6658_v61 = vpack.c.bf16 %v4314_v48, %v4312_v41  ;;  %7826 = vst [vmem:[#allocation7_spill] sm:$0xff] %v6800_v43  ;;  %7828 = vst [vmem:[#allocation9_spill] sm:$0xff] %v6812_v44  ;;  %v4349_v48 = vld [vmem:[%s7737_s3 + $0x4c8] sm:$0xff] }
 0x1c7   : > { %v6830_v49 = vpack.c.bf16 %v4351_v40, %v4349_v48 }
 0x1c8   : > { %v2117_v50 = vsel %vm2111_vm2, %v2115_v42, %v7797_v33  ;;  %v4644_v42 = vpack.c.bf16 %v2758_v19, %v2756_v35  ;;  %v4350_v35 = vld [vmem:[%s7737_s3 + $0x4d0] sm:$0xff] }
 0x1c9   : > { %1990 = vmatmul.mubr.f32.gmra.mrb[68].mxu1 %v6184_v21  ;;  %v7798_v21 = vrot.slane %v5710_v59, 4  ;;  %v7803_v59 = vld [vmem:[#allocation12_spill] sm:$0xff]  ;;  %7830 = vst [vmem:[#allocation11_spill] sm:$0xff] %v6830_v49 }
 0x1ca   : > { %1995 = vmatprep.mubr.f32.mxu1 %v1792_v1  ;;  %v4317_v1 = vld [vmem:[%s7737_s3 + $0x3c8] sm:$0xff] }
 0x1cb   : > { %v2114_v39 = vsel %vm2111_vm2, %v2112_v47, %v7798_v21  ;;  %v4318_v47 = vld [vmem:[%s7737_s3 + $0x3d0] sm:$0xff]  ;;  %v6686_v33 = vpack.c.bf16 %v4319_v26, %v4317_v1  ;;  %v4321_v21 = vld [vmem:[%s7737_s3 + $0x3e8] sm:$0xff] }
 0x1cc   : > { %v4353_v1 = vld [vmem:[%s7737_s3 + $0x4e8] sm:$0xff] }
 0x1cd   : > { %1996 = vmatmul.mubr.f32.gmra.mrb[70].mxu1 %v1790_v17  ;;  %v4316_v17 = vld [vmem:[%s7737_s3 + $0x3c0] sm:$0xff] }
 0x1ce   : > { %2286 = vmatprep.mubr.f32.mxu1 %v2117_v50  ;;  %v6688_v50 = vpack.c.bf16 %v4318_v47, %v4316_v17  ;;  %v4352_v17 = vld [vmem:[%s7737_s3 + $0x4e0] sm:$0xff]  ;;  %v4354_v47 = vld [vmem:[%s7737_s3 + $0x4f0] sm:$0xff] }
 0x1d1   : > { %2287 = vmatmul.mubr.f32.vlgmr.msra.gmra.mrb[36].mxu1 %v2114_v39  ;;  %v4323_v39 = vld [vmem:[%s7737_s3 + $0x3f8] sm:$0xff] }
 0x1d2   : > { %2292 = vmatprep.mubr.f32.mxu1 %v5795_v46  ;;  %v7806_v46 = vld [vmem:[#allocation13_spill] sm:$0xff] }
 0x1d5   : > { %2293 = vmatmul.mubr.f32.gmra.mrb[38].mxu1 %v5818_v7  ;;  %v7807_v7 = vld [vmem:[#allocation16_spill] sm:$0xff] }
 0x1d6   : > { %2298 = vmatprep.mubr.f32.mxu1 %v5821_v53  ;;  %v7808_v53 = vld [vmem:[#allocation15_spill] sm:$0xff] }
 0x1d9   : > { %2299 = vmatmul.mubr.f32.gmra.mrb[40].mxu1 %v5824_v0  ;;  %v7809_v0 = vld [vmem:[#allocation18_spill] sm:$0xff] }
 0x1da   : > { %2304 = vmatprep.mubr.f32.mxu1 %v7799_v22  ;;  %v6698_v22 = vpack.c.bf16 %v4323_v39, %v4321_v21  ;;  %v6856_v21 = vpack.c.bf16 %v4354_v47, %v4352_v17  ;;  %v4357_v39 = vld [vmem:[%s7737_s3 + $0x508] sm:$0xff] }
 0x1db   : > { %v4239_v47 = vld [vmem:[%s7737_s3 + $0x1e8] sm:$0xff] }
 0x1dc   : > { %7833 = vst [vmem:[#allocation16_spill] sm:$0xff] %v6856_v21 }
 0x1dd   : > { %2305 = vmatmul.mubr.f32.gmra.mrb[42].mxu1 %v7800_v29  ;;  %v4320_v29 = vld [vmem:[%s7737_s3 + $0x3e0] sm:$0xff] }
 0x1de   : > { %2310 = vmatprep.mubr.f32.mxu1 %v7801_v62  ;;  %v4322_v62 = vld [vmem:[%s7737_s3 + $0x3f0] sm:$0xff] }
 0x1e1   : > { %2311 = vmatmul.mubr.f32.gmra.mrb[44].mxu1 %v7802_v20  ;;  %v6706_v20 = vpack.c.bf16 %v4322_v62, %v4320_v29  ;;  %v4359_v29 = vld [vmem:[%s7737_s3 + $0x518] sm:$0xff]  ;;  %v4356_v62 = vld [vmem:[%s7737_s3 + $0x500] sm:$0xff] }
 0x1e2   : > { %2316 = vmatprep.mubr.f32.mxu1 %v7803_v59  ;;  %v4235_v59 = vld [vmem:[%s7737_s3 + $0x1c8] sm:$0xff] }
 0x1e5   : > { %2317 = vmatmul.mubr.f32.gmra.mrb[46].mxu1 %v7804_v14  ;;  %v4237_v14 = vld [vmem:[%s7737_s3 + $0x1d8] sm:$0xff] }
 0x1e6   : > { %2322 = vmatprep.mubr.f32.mxu1 %v7805_v11  ;;  %v4325_v11 = vld [vmem:[%s7737_s3 + $0x408] sm:$0xff] }
 0x1e9   : > { %2323 = vmatmul.mubr.f32.gmra.mrb[48].mxu1 %v7806_v46  ;;  %v4646_v46 = vpack.c.bf16 %v4237_v14, %v4235_v59  ;;  %v4358_v59 = vld [vmem:[%s7737_s3 + $0x510] sm:$0xff]  ;;  %v6872_v14 = vpack.c.bf16 %v4359_v29, %v4357_v39  ;;  %v4241_v39 = vld [vmem:[%s7737_s3 + $0x1f8] sm:$0xff] }
 0x1ea   : > { %2328 = vmatprep.mubr.f32.mxu1 %v7807_v7  ;;  %v4327_v7 = vld [vmem:[%s7737_s3 + $0x418] sm:$0xff] }
 0x1eb   : > { %7834 = vst [vmem:[#allocation15_spill] sm:$0xff] %v6872_v14 }
 0x1ed   : > { %2329 = vmatmul.mubr.f32.gmra.mrb[50].mxu1 %v7808_v53  ;;  %v4324_v53 = vld [vmem:[%s7737_s3 + $0x400] sm:$0xff] }
 0x1ee   : > { %2334 = vmatprep.mubr.f32.mxu1 %v7809_v0  ;;  %v4326_v0 = vld [vmem:[%s7737_s3 + $0x410] sm:$0xff] }
 0x1f1   : > { %2335 = vmatmul.mubr.f32.gmra.mrb[52].mxu1 %v7810_v45  ;;  %v6728_v45 = vpack.c.bf16 %v4327_v7, %v4325_v11  ;;  %v6874_v11 = vpack.c.bf16 %v4358_v59, %v4356_v62  ;;  %v4363_v7 = vld [vmem:[%s7737_s3 + $0x538] sm:$0xff] }
 0x1f2   : > { %2340 = vmatprep.mubr.f32.mxu1 %v7811_v4  ;;  %v6730_v4 = vpack.c.bf16 %v4326_v0, %v4324_v53  ;;  %v4360_v53 = vld [vmem:[%s7737_s3 + $0x520] sm:$0xff]  ;;  %v4362_v0 = vld [vmem:[%s7737_s3 + $0x530] sm:$0xff] }
 0x1f3   : > { %7835 = vst [vmem:[#allocation18_spill] sm:$0xff] %v6874_v11 }
 0x1f5   : > { %2341 = vmatmul.mubr.f32.gmra.mrb[54].mxu1 %v7812_v52  ;;  %v4329_v52 = vld [vmem:[%s7737_s3 + $0x428] sm:$0xff] }
 0x1f6   : > { %2346 = vmatprep.mubr.f32.mxu1 %v7813_v6  ;;  %v4331_v6 = vld [vmem:[%s7737_s3 + $0x438] sm:$0xff] }
 0x1f9   : > { %2347 = vmatmul.mubr.f32.gmra.mrb[56].mxu1 %v7814_v8  ;;  %v6740_v8 = vpack.c.bf16 %v4331_v6, %v4329_v52  ;;  %v6892_v6 = vpack.c.bf16 %v4362_v0, %v4360_v53 }
 0x1fa   : > { %2352 = vmatprep.mubr.f32.mxu1 %v7815_v10  ;;  %v4328_v10 = vld [vmem:[%s7737_s3 + $0x420] sm:$0xff] }
 0x1fb   : > { %7837 = vst [vmem:[#allocation20_spill] sm:$0xff] %v6892_v6 }
 0x1fd   : > { %2353 = vmatmul.mubr.f32.gmra.mrb[58].mxu1 %v7816_v3  ;;  %v4330_v3 = vld [vmem:[%s7737_s3 + $0x430] sm:$0xff] }
 0x1fe   : > { %2358 = vmatprep.mubr.f32.mxu1 %v6104_v24  ;;  %v2751_v24 = vld [vmem:[%s7737_s3 + $0x178] sm:$0xff] }
 0x201   : > { %2359 = vmatmul.mubr.f32.gmra.mrb[60].mxu1 %v6096_v58  ;;  %v2749_v58 = vld [vmem:[%s7737_s3 + $0x168] sm:$0xff] }
 0x202   : > { %2364 = vmatprep.mubr.f32.mxu1 %v6126_v54  ;;  %v4634_v54 = vpack.c.bf16 %v2751_v24, %v2749_v58  ;;  %v4334_v58 = vld [vmem:[%s7737_s3 + $0x450] sm:$0xff] }
 0x204   : > { %4635 = vmatprep.subr.bf16.mxu0 %v4634_v54  ;;  %v4337_v54 = vld [vmem:[%s7737_s3 + $0x468] sm:$0xff] }
 0x205   : > { %2365 = vmatmul.mubr.f32.gmra.mrb[62].mxu1 %v7817_v36  ;;  %v6749_v36 = vpack.c.bf16 %v4330_v3, %v4328_v10  ;;  %v1256_v10 = vld [vmem:[%s7739_s5] sm:$0x3]  ;;  %v7838_v3 = vld [vmem:[#allocation5_spill] sm:$0xff] }
 0x206   : > { %2370 = vmatprep.mubr.f32.mxu1 %v7818_v5  ;;  %v4333_v5 = vld [vmem:[%s7737_s3 + $0x448] sm:$0xff] }
 0x209   : > { %2371 = vmatmul.mubr.f32.gmra.mrb[64].mxu1 %v7819_v23  ;;  %v4335_v23 = vld [vmem:[%s7737_s3 + $0x458] sm:$0xff] }
 0x20a   : > { %2376 = vmatprep.mubr.f32.mxu1 %v7820_v31  ;;  %v6758_v31 = vpack.c.bf16 %v4335_v23, %v4333_v5  ;;  %v6900_v5 = vrot.slane %v1256_v10, %v7838_v3  ;;  %v7839_v23 = vld [vmem:[#allocation6_spill] sm:$0xff] }
 0x20d   : > { %2377 = vmatmul.mubr.f32.gmra.mrb[66].mxu1 %v7821_v63  ;;  %v4332_v63 = vld [vmem:[%s7737_s3 + $0x440] sm:$0xff] }
 0x20e   : > { %2382 = vmatprep.mubr.f32.mxu1 %v6198_v55  ;;  %v6766_v24 = vpack.c.bf16 %v4334_v58, %v4332_v63  ;;  %v6903_v63 = vrot.slane %v1256_v10, %v7839_v23 }
 0x211   : > { %2383 = vmatmul.mubr.f32.gmra.mrb[68].mxu1 %v6187_v13  ;;  %v2750_v13 = vld [vmem:[%s7737_s3 + $0x170] sm:$0xff] }
 0x212   : > { %2388 = vmatprep.mubr.f32.mxu1 %v6201_v9  ;;  %v4636_v55 = vpack.c.bf16 %v2750_v13, %v2748_v16  ;;  %v4311_v9 = vld [vmem:[%s7737_s3 + $0x398] sm:$0xff]  ;;  %v4336_v13 = vld [vmem:[%s7737_s3 + $0x460] sm:$0xff] }
 0x213   : > { %v4339_v16 = vld [vmem:[%s7737_s3 + $0x478] sm:$0xff] }
 0x214   : > { %4637 = vmatpush1.bf16.msra.mxu0 %v4636_v55  ;;  %v6782_v55 = vpack.c.bf16 %v4339_v16, %v4337_v54 }
 0x215   : > { %2389 = vmatmul.mubr.f32.gmra.mrb[70].mxu1 %v6190_v28  ;;  %v4309_v28 = vld [vmem:[%s7737_s3 + $0x388] sm:$0xff]  ;;  %4639 = vmatprep.subr.bf16.mxu0 %v4638_v2  ;;  %v6802_v2 = vpack.c.bf16 %v4342_v32, %v4340_v60 }
 0x216   : > { %v6614_v37 = vpack.c.bf16 %v4311_v9, %v4309_v28  ;;  %v4338_v28 = vld [vmem:[%s7737_s3 + $0x470] sm:$0xff] }
 0x217   : > { %v6784_v9 = vpack.c.bf16 %v4338_v28, %v4336_v13  ;;  %7827 = vst [vmem:[#allocation10_spill] sm:$0xff] %v6802_v2 }
 0x218   : > { %4758 = vmatprep.subr.bf16.mxu1 %v6614_v37  ;;  %4641 = vmatpush1.bf16.msra.mxu0 %v4640_v18  ;;  %v4344_v18 = vld [vmem:[%s7737_s3 + $0x4a0] sm:$0xff] }
 0x219   : > { %4772 = vmatpush1.bf16.msra.mxu1 %v6616_v25  ;;  %4643 = vmatprep.subr.bf16.mxu0 %v4642_v56  ;;  %7825 = vst [vmem:[#allocation8_spill] sm:$0xff] %v6784_v9  ;;  %v6820_v41 = vpack.c.bf16 %v4346_v57, %v4344_v18  ;;  %v4348_v56 = vld [vmem:[%s7737_s3 + $0x4c0] sm:$0xff] }
 0x21a   : > { %4759 = vmatprep.subr.bf16.mxu1 %v6656_v30  ;;  %v6838_v19 = vpack.c.bf16 %v4350_v35, %v4348_v56  ;;  %v4234_v35 = vld [vmem:[%s7737_s3 + $0x1c0] sm:$0xff] }
 0x21b   : > { %7829 = vst [vmem:[#allocation12_spill] sm:$0xff] %v6820_v41 }
 0x21c   : > { %4645 = vmatpush1.bf16.msra.mxu0 %v4644_v42  ;;  %7831 = vst [vmem:[#allocation14_spill] sm:$0xff] %v6838_v19  ;;  %v4355_v42 = vld [vmem:[%s7737_s3 + $0x4f8] sm:$0xff] }
 0x21d   : > { %4773 = vmatpush1.bf16.msra.mxu1 %v6658_v61  ;;  %4647 = vmatprep.subr.bf16.mxu0 %v4646_v46  ;;  %v6848_v26 = vpack.c.bf16 %v4355_v42, %v4353_v1  ;;  %v4361_v46 = vld [vmem:[%s7737_s3 + $0x528] sm:$0xff]  ;;  %v4236_v1 = vld [vmem:[%s7737_s3 + $0x1d0] sm:$0xff] }
 0x21e   : > { %4760 = vmatprep.subr.bf16.mxu1 %v6686_v33  ;;  %v6890_v52 = vpack.c.bf16 %v4363_v7, %v4361_v46  ;;  %v4648_v46 = vpack.c.bf16 %v4236_v1, %v4234_v35  ;;  %v4242_v35 = vld [vmem:[%s7737_s3 + $0x200] sm:$0xff]  ;;  %v4244_v1 = vld [vmem:[%s7737_s3 + $0x210] sm:$0xff] }
 0x21f   : > { %7832 = vst [vmem:[#allocation13_spill] sm:$0xff] %v6848_v26 }
 0x220   : > { %7836 = vst [vmem:[#allocation17_spill] sm:$0xff] %v6890_v52 }
 0x221   : > { %4774 = vmatpush1.bf16.msra.mxu1 %v6688_v50 }
 0x222   : > { %4761 = vmatprep.subr.bf16.mxu1 %v6698_v22 }
 0x225   : > { %4775 = vmatpush1.bf16.msra.mxu1 %v6706_v20 }
 0x226   : > { %4762 = vmatprep.subr.bf16.mxu1 %v6728_v45 }
 0x229   : > { %4776 = vmatpush1.bf16.msra.mxu1 %v6730_v4 }
 0x22a   : > { %4763 = vmatprep.subr.bf16.mxu1 %v6740_v8 }
 0x22d   : > { %4777 = vmatpush1.bf16.msra.mxu1 %v6749_v36 }
 0x22e   : > { %4764 = vmatprep.subr.bf16.mxu1 %v6758_v31 }
 0x231   : > { %4778 = vmatpush1.bf16.msra.mxu1 %v6766_v24 }
 0x232   : > { %4765 = vmatprep.subr.bf16.mxu1 %v6782_v55 }
 0x235   : > { %4779 = vmatpush1.bf16.msra.mxu1 %v6784_v9 }
 0x236   : > { %4766 = vmatprep.subr.bf16.mxu1 %v6800_v43  ;;  %v4278_v43 = vld [vmem:[%s7737_s3 + $0x320] sm:$0xff] }
 0x239   : > { %4780 = vmatpush1.bf16.msra.mxu1 %v6802_v2 }
 0x23a   : > { %4767 = vmatprep.subr.bf16.mxu1 %v6812_v44 }
 0x23d   : > { %4781 = vmatpush1.bf16.msra.mxu1 %v6820_v41 }
 0x23e   : > { %4768 = vmatprep.subr.bf16.mxu1 %v6830_v49 }
 0x241   : > { %4782 = vmatpush1.bf16.msra.mxu1 %v6838_v19 }
 0x242   : > { %4769 = vmatprep.subr.bf16.mxu1 %v6848_v26 }
 0x245   : > { %4783 = vmatpush1.bf16.msra.mxu1 %v6856_v21 }
 0x246   : > { %4770 = vmatprep.subr.bf16.mxu1 %v6872_v14  ;;  %v4267_v14 = vld [vmem:[%s7737_s3 + $0x2c8] sm:$0xff] }
 0x249   : > { %4784 = vmatpush1.bf16.msra.mxu1 %v6874_v11  ;;  %v4262_v11 = vld [vmem:[%s7737_s3 + $0x2a0] sm:$0xff] }
 0x24a   : > { %4771 = vmatprep.subr.bf16.mxu1 %v6890_v52 }
 0x24d   : > { %4785 = vmatpush1.bf16.msra.mxu1 %v6892_v6 }
 0x2a4   : > { %v2288_v58 = vpop.f32.mrb[36].mxu1 }
 0x2a5   : > { %v4858_v54 = vadd.f32 %v2288_v58, %v6900_v5  ;;  %v2290_v16 = vpop.f32.mrb[37].mxu1  ;;  %v4650_v58 = vpack.c.bf16 %v4241_v39, %v4239_v47  ;;  %v4247_v47 = vld [vmem:[%s7737_s3 + $0x228] sm:$0xff]  ;;  %v4249_v39 = vld [vmem:[%s7737_s3 + $0x238] sm:$0xff] }
 0x2a6   : > { %v4859_v13 = vadd.f32 %v2290_v16, %v6903_v63  ;;  %v4240_v16 = vld [vmem:[%s7737_s3 + $0x1f0] sm:$0xff] }
 0x2a7   : > { %v2468_v28 = vrot.slane %v4858_v54, 7  ;;  %v4238_v54 = vld [vmem:[%s7737_s3 + $0x1e0] sm:$0xff] }
 0x2a8   : > { %v2469_v34 = vrot.slane %v4859_v13, 7  ;;  %v2294_v51 = vpop.f32.mrb[38].mxu1 }
 0x2a9   : > { %2576 = vst [vmem:[#allocation4] sm:$0xfe] %v2468_v28  ;;  %v4860_v60 = vadd.f32 %v2294_v51, %v6900_v5  ;;  %v2296_v32 = vpop.f32.mrb[39].mxu1  ;;  %v4243_v51 = vld [vmem:[%s7737_s3 + $0x208] sm:$0xff] }
 0x2aa   : > { %2578 = vst.msk [vmem:[#allocation4 + $0x8] sm:$0xfe] %vm2577_vm5, %v2469_v34  ;;  %v4861_v12 = vadd.f32 %v2296_v32, %v6903_v63 }
 0x2ab   : > { %v2470_v15 = vrot.slane %v4860_v60, 7  ;;  %v4245_v60 = vld [vmem:[%s7737_s3 + $0x218] sm:$0xff] }
 0x2ac   : > { %v2472_v18 = vrot.slane %v4861_v12, 7  ;;  %v2300_v57 = vpop.f32.mrb[40].mxu1 }
 0x2ad   : > { %v2471_v48 = vsel %vm2467_vm6, %v2468_v28, %v2470_v15  ;;  %v4862_v40 = vadd.f32 %v2300_v57, %v6900_v5  ;;  %v2302_v56 = vpop.f32.mrb[41].mxu1 }
 0x2ae   : > { %2579 = vst [vmem:[#allocation4 + $0x10] sm:$0xff] %v2471_v48  ;;  %v2473_v42 = vsel %vm2467_vm6, %v2469_v34, %v2472_v18  ;;  %v4863_v17 = vadd.f32 %v2302_v56, %v6903_v63  ;;  %v4654_v56 = vpack.c.bf16 %v4245_v60, %v4243_v51 }
 0x2af   : > { %2580 = vst.msk [vmem:[#allocation4 + $0x18] sm:$0xff] %vm349_vm4, %v2473_v42  ;;  %v2474_v29 = vrot.slane %v4862_v40, 7 }
 0x2b0   : > { %2623 = vst.msk [vmem:[#allocation4 + $0x15] ss:$8 sm:$0x3] %vm6619_vm3, %v6630_v27  ;;  %v2476_v62 = vrot.slane %v4863_v17, 7  ;;  %v2306_v59 = vpop.f32.mrb[42].mxu1  ;;  %v2668_v34 = vld [vmem:[#allocation4] sm:$0xff] }
 0x2b1   : > { %v2475_v7 = vsel %vm2467_vm6, %v2470_v15, %v2474_v29  ;;  %v4864_v53 = vadd.f32 %v2306_v59, %v6900_v5  ;;  %v2308_v0 = vpop.f32.mrb[43].mxu1  ;;  %v2669_v10 = vld [vmem:[#allocation4 + $0x8] sm:$0xff] }
 0x2b2   : > { %2581 = vst [vmem:[#allocation4 + $0x20] sm:$0xff] %v2475_v7  ;;  %v2477_v13 = vsel %vm2467_vm6, %v2472_v18, %v2476_v62  ;;  %v4865_v28 = vadd.f32 %v2308_v0, %v6903_v63  ;;  %4216 = vmatprep.mubr.msk.f32.mxu0 %vm349_vm4, %v2669_v10  ;;  %v4652_v18 = vpack.c.bf16 %v4240_v16, %v4238_v54  ;;  %v4248_v10 = vld [vmem:[%s7737_s3 + $0x230] sm:$0xff]  ;;  %v4253_v54 = vld [vmem:[%s7737_s3 + $0x258] sm:$0xff] }
 0x2b3   : > { %2582 = vst.msk [vmem:[#allocation4 + $0x28] sm:$0xff] %vm349_vm4, %v2477_v13  ;;  %v2478_v32 = vrot.slane %v4864_v53, 7  ;;  %2879 = vmatmul.mubr.f32.vlgmr.msra.gmra.mrb[36].mxu0 %v2668_v34  ;;  %v4656_v0 = vpack.c.bf16 %v4244_v1, %v4242_v35  ;;  %v4658_v34 = vpack.c.bf16 %v4249_v39, %v4247_v47 }
 0x2b4   : > { %2626 = vst.msk [vmem:[#allocation4 + $0x22] ss:$8 sm:$0x3] %vm6619_vm3, %v6630_v27  ;;  %v2480_v12 = vrot.slane %v4865_v28, 7  ;;  %v2312_v15 = vpop.f32.mrb[44].mxu1  ;;  %4649 = vmatpush1.bf16.msra.mxu0 %v4648_v46 }
 0x2b5   : > { %v2479_v57 = vsel %vm2467_vm6, %v2474_v29, %v2478_v32  ;;  %v4866_v48 = vadd.f32 %v2312_v15, %v6900_v5  ;;  %v2314_v40 = vpop.f32.mrb[45].mxu1  ;;  %4651 = vmatprep.subr.bf16.mxu0 %v4650_v58  ;;  %v4251_v58 = vld [vmem:[%s7737_s3 + $0x248] sm:$0xff] }
 0x2b6   : > { %2583 = vst [vmem:[#allocation4 + $0x30] sm:$0xff] %v2479_v57  ;;  %v2481_v42 = vsel %vm2467_vm6, %v2476_v62, %v2480_v12  ;;  %v4867_v17 = vadd.f32 %v2314_v40, %v6903_v63  ;;  %v4246_v62 = vld [vmem:[%s7737_s3 + $0x220] sm:$0xff] }
 0x2b7   : > { %2584 = vst.msk [vmem:[#allocation4 + $0x38] sm:$0xff] %vm349_vm4, %v2481_v42  ;;  %v2482_v29 = vrot.slane %v4866_v48, 7  ;;  %v6967_v59 = vld [vmem:[#allocation4 + $0x18] sm:$0xff]  ;;  %v6969_v46 = vld [vmem:[#allocation4 + $0x10] sm:$0xff]  ;;  %v4662_v48 = vpack.c.bf16 %v4253_v54, %v4251_v58  ;;  %v4255_v54 = vld [vmem:[%s7737_s3 + $0x268] sm:$0xff] }
 0x2b8   : > { %2629 = vst.msk [vmem:[#allocation4 + $0x37] ss:$8 sm:$0x3] %vm6619_vm3, %v6630_v27  ;;  %v2484_v7 = vrot.slane %v4867_v17, 7  ;;  %v2318_v53 = vpop.f32.mrb[46].mxu1  ;;  %4217 = vmatprep.mubr.msk.f32.mxu0 %vm349_vm4, %v6967_v59  ;;  %4653 = vmatpush1.bf16.msra.mxu0 %v4652_v18  ;;  %v7751_v40 = vrot.slane %v6969_v46, 1 }
 0x2b9   : > { %v2483_v16 = vsel %vm2467_vm6, %v2478_v32, %v2482_v29  ;;  %v4868_v13 = vadd.f32 %v2318_v53, %v6900_v5  ;;  %v2320_v28 = vpop.f32.mrb[47].mxu1  ;;  %2885 = vmatmul.mubr.f32.gmra.mrb[38].mxu0 %v6969_v46  ;;  %4655 = vmatprep.subr.bf16.mxu0 %v4654_v56  ;;  %v4660_v32 = vpack.c.bf16 %v4248_v10, %v4246_v62  ;;  %v7752_v1 = vrot.slane %v6967_v59, 2  ;;  %v4250_v62 = vld [vmem:[%s7737_s3 + $0x240] sm:$0xff]  ;;  %v4252_v53 = vld [vmem:[%s7737_s3 + $0x250] sm:$0xff] }
 0x2ba   : > { %2585 = vst [vmem:[#allocation4 + $0x40] sm:$0xff] %v2483_v16  ;;  %v2485_v51 = vsel %vm2467_vm6, %v2480_v12, %v2484_v7  ;;  %v4869_v60 = vadd.f32 %v2320_v28, %v6903_v63  ;;  %v4257_v16 = vld [vmem:[%s7737_s3 + $0x278] sm:$0xff] }
 0x2bb   : > { %2586 = vst.msk [vmem:[#allocation4 + $0x48] sm:$0xff] %vm349_vm4, %v2485_v51  ;;  %v2486_v15 = vrot.slane %v4868_v13, 7  ;;  %v6994_v18 = vld [vmem:[#allocation4 + $0x28] sm:$0xff]  ;;  %v2672_v57 = vld [vmem:[#allocation4 + $0x20] sm:$0xff] }
 0x2bc   : > { %2632 = vst.msk [vmem:[#allocation4 + $0x44] ss:$8 sm:$0x3] %vm6619_vm3, %v6630_v27  ;;  %v2488_v56 = vrot.slane %v4869_v60, 7  ;;  %v2324_v35 = vpop.f32.mrb[48].mxu1  ;;  %4218 = vmatprep.mubr.msk.f32.mxu0 %vm349_vm4, %v6994_v18  ;;  %4657 = vmatpush1.bf16.msra.mxu0 %v4656_v0  ;;  %v3174_v12 = vrot.slane %v2672_v57, 1 }
 0x2bd   : > { %v3578_v42 = vrot.slane %v6994_v18, 2  ;;  %v7005_v17 = vsel %vm2467_vm6, %v2482_v29, %v2486_v15  ;;  %v4870_v47 = vadd.f32 %v2324_v35, %v6900_v5  ;;  %v2326_v39 = vpop.f32.mrb[49].mxu1  ;;  %2891 = vmatmul.mubr.f32.gmra.mrb[40].mxu0 %v2672_v57  ;;  %4659 = vmatprep.subr.bf16.mxu0 %v4658_v34  ;;  %v7753_v0 = vrot.slane %v6969_v46, 2 }
 0x2be   : > { %v3576_v10 = vrot.slane %v2672_v57, 2  ;;  %2587 = vst [vmem:[#allocation4 + $0x50] sm:$0xff] %v7005_v17  ;;  %v2489_v29 = vsel %vm2467_vm6, %v2484_v7, %v2488_v56  ;;  %v4871_v58 = vadd.f32 %v2326_v39, %v6903_v63  ;;  %v7027_v13 = vsel %vm3167_vm7, %v7751_v40, %v3174_v12 }
 0x2bf   : > { %2588 = vst.msk [vmem:[#allocation4 + $0x58] sm:$0xff] %vm349_vm4, %v2489_v29  ;;  %v2490_v28 = vrot.slane %v4870_v47, 7  ;;  %v7030_v34 = vld [vmem:[#allocation4 + $0x38] sm:$0xff]  ;;  %v7032_v7 = vld [vmem:[#allocation4 + $0x30] sm:$0xff]  ;;  %v7037_v51 = vsel %vm1718_vm1, %v7752_v1, %v3578_v42  ;;  %v4664_v47 = vpack.c.bf16 %v4252_v53, %v4250_v62 }
 0x2c0   : > { %7840 = vst [vmem:[#allocation19_spill] sm:$0xff] %v7037_v51  ;;  %v7042_v60 = vsel %vm1718_vm1, %v7753_v0, %v3576_v10  ;;  %v2492_v57 = vrot.slane %v4871_v58, 7  ;;  %v2330_v35 = vpop.f32.mrb[50].mxu1  ;;  %4219 = vmatprep.mubr.msk.f32.mxu0 %vm349_vm4, %v7030_v34  ;;  %4661 = vmatpush1.bf16.msra.mxu0 %v4660_v32  ;;  %v3178_v39 = vrot.slane %v7032_v7, 1  ;;  %v3582_v29 = vrot.slane %v7030_v34, 2  ;;  %v4254_v58 = vld [vmem:[%s7737_s3 + $0x260] sm:$0xff] }
 0x2c1   : > { %7841 = vst [vmem:[#allocation22_spill] sm:$0xff] %v7042_v60  ;;  %v2491_v40 = vsel %vm2467_vm6, %v2486_v15, %v2490_v28  ;;  %v4872_v1 = vadd.f32 %v2330_v35, %v6900_v5  ;;  %v2332_v23 = vpop.f32.mrb[51].mxu1  ;;  %2897 = vmatmul.mubr.f32.gmra.mrb[42].mxu0 %v7032_v7  ;;  %4663 = vmatprep.subr.bf16.mxu0 %v4662_v48  ;;  %v4256_v32 = vld [vmem:[%s7737_s3 + $0x270] sm:$0xff]  ;;  %v3580_v62 = vrot.slane %v7032_v7, 2  ;;  %v4259_v48 = vld [vmem:[%s7737_s3 + $0x288] sm:$0xff] }
 0x2c2   : > { %v4666_v0 = vpack.c.bf16 %v4257_v16, %v4255_v54  ;;  %2589 = vst [vmem:[#allocation4 + $0x60] sm:$0xff] %v2491_v40  ;;  %v2493_v15 = vsel %vm2467_vm6, %v2488_v56, %v2492_v57  ;;  %v4873_v53 = vadd.f32 %v2332_v23, %v6903_v63  ;;  %v4261_v54 = vld [vmem:[%s7737_s3 + $0x298] sm:$0xff]  ;;  %v7067_v16 = vsel %vm3167_vm7, %v3174_v12, %v3178_v39 }
 0x2c3   : > { %2590 = vst.msk [vmem:[#allocation4 + $0x68] sm:$0xff] %vm349_vm4, %v2493_v15  ;;  %v2494_v35 = vrot.slane %v4872_v1, 7  ;;  %v7070_v7 = vld [vmem:[#allocation4 + $0x48] sm:$0xff]  ;;  %v7072_v40 = vld [vmem:[#allocation4 + $0x40] sm:$0xff]  ;;  %v7075_v23 = vsel %vm1718_vm1, %v3578_v42, %v3582_v29  ;;  %v7078_v56 = vsel %vm1718_vm1, %v3576_v10, %v3580_v62  ;;  %v4668_v15 = vpack.c.bf16 %v4256_v32, %v4254_v58  ;;  %v4258_v42 = vld [vmem:[%s7737_s3 + $0x280] sm:$0xff] }
 0x2c4   : > { %7842 = vst [vmem:[#allocation21_spill] sm:$0xff] %v7075_v23  ;;  %7843 = vst [vmem:[#allocation24_spill] sm:$0xff] %v7078_v56  ;;  %v2496_v12 = vrot.slane %v4873_v53, 7  ;;  %v2336_v1 = vpop.f32.mrb[52].mxu1  ;;  %4220 = vmatprep.mubr.msk.f32.mxu0 %vm349_vm4, %v7070_v7  ;;  %4665 = vmatpush1.bf16.msra.mxu0 %v4664_v47  ;;  %v4260_v10 = vld [vmem:[%s7737_s3 + $0x290] sm:$0xff]  ;;  %v3586_v56 = vrot.slane %v7070_v7, 2  ;;  %v4670_v47 = vpack.c.bf16 %v4261_v54, %v4259_v48 }
 0x2c5   : > { %2635 = vst.msk [vmem:[#allocation4 + $0x61] ss:$8 sm:$0x3] %vm6619_vm3, %v6630_v27  ;;  %2638 = vst.msk [vmem:[#allocation4 + $0x66] ss:$8 sm:$0x3] %vm6619_vm3, %v6630_v27  ;;  %v7097_v53 = vsel %vm2467_vm6, %v2490_v28, %v2494_v35  ;;  %v4874_v23 = vadd.f32 %v2336_v1, %v6900_v5  ;;  %2903 = vmatmul.mubr.f32.gmra.mrb[44].mxu0 %v7072_v40  ;;  %4667 = vmatprep.subr.bf16.mxu0 %v4666_v0 }
 0x2c6   : > { %v2338_v60 = vpop.f32.mrb[53].mxu1  ;;  %v4263_v58 = vld [vmem:[%s7737_s3 + $0x2a8] sm:$0xff]  ;;  %v3584_v32 = vrot.slane %v7072_v40, 2  ;;  %v2497_v3 = vsel %vm2467_vm6, %v2492_v57, %v2496_v12  ;;  %v7107_v6 = vld [vmem:[#allocation4 + $0x58] sm:$0xff]  ;;  %v4265_v28 = vld [vmem:[%s7737_s3 + $0x2b8] sm:$0xff]  ;;  %v7844_v1 = vrot.slane %v7072_v40, 1 }
 0x2c7   : > { %v4875_v51 = vadd.f32 %v2338_v60, %v6903_v63  ;;  %v7117_v48 = vld [vmem:[#allocation4 + $0x50] sm:$0xff]  ;;  %2592 = vst.msk [vmem:[#allocation4 + $0x78] sm:$0xff] %vm349_vm4, %v2497_v3  ;;  %v2498_v54 = vrot.slane %v4874_v23, 7  ;;  %4221 = vmatprep.mubr.msk.f32.mxu0 %vm349_vm4, %v7107_v6  ;;  %v4672_v60 = vpack.c.bf16 %v4260_v10, %v4258_v42  ;;  %v3590_v23 = vrot.slane %v7107_v6, 2 }
 0x2c8   : > { %v7115_v0 = vsel %vm3167_vm7, %v3178_v39, %v7844_v1  ;;  %v2342_v52 = vpop.f32.mrb[54].mxu1  ;;  %4669 = vmatpush1.bf16.msra.mxu0 %v4668_v15  ;;  %v4264_v39 = vld [vmem:[%s7737_s3 + $0x2b0] sm:$0xff]  ;;  %v7129_v1 = vsel %vm1718_vm1, %v3582_v29, %v3586_v56  ;;  %v7132_v3 = vsel %vm1718_vm1, %v3580_v62, %v3584_v32  ;;  %v4674_v10 = vpack.c.bf16 %v4265_v28, %v4263_v58  ;;  %v4269_v29 = vld [vmem:[%s7737_s3 + $0x2d8] sm:$0xff] }
 0x2c9   : > { %v2500_v57 = vrot.slane %v4875_v51, 7  ;;  %7845 = vst [vmem:[#allocation23_spill] sm:$0xff] %v7129_v1  ;;  %7846 = vst [vmem:[#allocation25_spill] sm:$0xff] %v7132_v3  ;;  %v2499_v51 = vsel %vm2467_vm6, %v2494_v35, %v2498_v54  ;;  %v4876_v15 = vadd.f32 %v2342_v52, %v6900_v5  ;;  %v2344_v42 = vpop.f32.mrb[55].mxu1  ;;  %2909 = vmatmul.mubr.f32.gmra.mrb[46].mxu0 %v7005_v17  ;;  %4671 = vmatprep.subr.bf16.mxu0 %v4670_v47 }
 0x2ca   : > { %v3588_v62 = vrot.slane %v7117_v48, 2  ;;  %2593 = vst [vmem:[#allocation4 + $0x80] sm:$0xff] %v2499_v51  ;;  %v4877_v52 = vadd.f32 %v2344_v42, %v6903_v63  ;;  %v7148_v3 = vsel %vm1718_vm1, %v3586_v56, %v3590_v23  ;;  %v4676_v28 = vpack.c.bf16 %v4264_v39, %v4262_v11  ;;  %v4268_v11 = vld [vmem:[%s7737_s3 + $0x2d0] sm:$0xff] }
 0x2cb   : > { %v2501_v35 = vsel %vm2467_vm6, %v2496_v12, %v2500_v57  ;;  %7847 = vst [vmem:[#allocation27_spill] sm:$0xff] %v7148_v3  ;;  %v2502_v17 = vrot.slane %v4876_v15, 7  ;;  %v4678_v56 = vpack.c.bf16 %v4269_v29, %v4267_v14  ;;  %v4266_v15 = vld [vmem:[%s7737_s3 + $0x2c0] sm:$0xff] }
 0x2cc   : > { %2594 = vst.msk [vmem:[#allocation4 + $0x88] sm:$0xff] %vm349_vm4, %v2501_v35  ;;  %v7151_v47 = vld [vmem:[#allocation4 + $0x68] sm:$0xff]  ;;  %v7153_v58 = vld [vmem:[#allocation4 + $0x60] sm:$0xff]  ;;  %v7156_v1 = vsel %vm1718_vm1, %v3584_v32, %v3588_v62  ;;  %v2504_v12 = vrot.slane %v4877_v52, 7  ;;  %v2348_v51 = vpop.f32.mrb[56].mxu1  ;;  %4673 = vmatpush1.bf16.msra.mxu0 %v4672_v60 }
 0x2cd   : > { %7848 = vst [vmem:[#allocation26_spill] sm:$0xff] %v7156_v1  ;;  %2641 = vst.msk [vmem:[#allocation4 + $0x83] ss:$8 sm:$0x3] %vm6619_vm3, %v6630_v27  ;;  %4222 = vmatprep.mubr.msk.f32.mxu0 %vm349_vm4, %v7151_v47  ;;  %v3594_v39 = vrot.slane %v7151_v47, 2  ;;  %v2503_v42 = vsel %vm2467_vm6, %v2498_v54, %v2502_v17  ;;  %v4878_v35 = vadd.f32 %v2348_v51, %v6900_v5  ;;  %v2350_v52 = vpop.f32.mrb[57].mxu1  ;;  %4675 = vmatprep.subr.bf16.mxu0 %v4674_v10 }
 0x2ce   : > { %2915 = vmatmul.mubr.f32.gmra.mrb[48].mxu0 %v7153_v58  ;;  %v3592_v60 = vrot.slane %v7153_v58, 2  ;;  %2595 = vst [vmem:[#allocation4 + $0x90] sm:$0xff] %v2503_v42  ;;  %v2505_v29 = vsel %vm2467_vm6, %v2500_v57, %v2504_v12  ;;  %v4879_v1 = vadd.f32 %v2350_v52, %v6903_v63  ;;  %v7178_v32 = vld [vmem:[#allocation4 + $0x78] sm:$0xff]  ;;  %v4271_v54 = vld [vmem:[%s7737_s3 + $0x2e8] sm:$0xff]  ;;  %v4273_v51 = vld [vmem:[%s7737_s3 + $0x2f8] sm:$0xff]  ;;  %v3596_v10 = vrot.slane %v7097_v53, 2 }
 0x2cf   : > { %2596 = vst.msk [vmem:[#allocation4 + $0x98] sm:$0xff] %vm349_vm4, %v2505_v29  ;;  %v2506_v14 = vrot.slane %v4878_v35, 7  ;;  %4223 = vmatprep.mubr.msk.f32.mxu0 %vm349_vm4, %v7178_v32  ;;  %v4680_v57 = vpack.c.bf16 %v4268_v11, %v4266_v15  ;;  %v7849_v42 = vrot.slane %v7097_v53, 1  ;;  %v7850_v52 = vrot.slane %v7153_v58, 1 }
 0x2d0   : > { %v7198_v21 = vsel %vm1718_vm1, %v3590_v23, %v3594_v39  ;;  %2644 = vst.msk [vmem:[#allocation4 + $0x90] ss:$8 sm:$0x3] %vm6619_vm3, %v6630_v27  ;;  %v2508_v29 = vrot.slane %v4879_v1, 7  ;;  %v2354_v35 = vpop.f32.mrb[58].mxu1  ;;  %4677 = vmatpush1.bf16.msra.mxu0 %v4676_v28  ;;  %v7204_v26 = vsel %vm1718_vm1, %v3588_v62, %v3592_v60  ;;  %v3598_v15 = vrot.slane %v7178_v32, 2 }
 0x2d1   : > { %v7195_v3 = vsel %vm3167_vm7, %v7850_v52, %v7849_v42  ;;  %7851 = vst [vmem:[#allocation29_spill] sm:$0xff] %v7198_v21  ;;  %7852 = vst [vmem:[#allocation28_spill] sm:$0xff] %v7204_v26  ;;  %v7208_v11 = vsel %vm1718_vm1, %v3592_v60, %v3596_v10  ;;  %v2507_v42 = vsel %vm2467_vm6, %v2502_v17, %v2506_v14  ;;  %v2356_v52 = vpop.f32.mrb[59].mxu1  ;;  %4679 = vmatprep.subr.bf16.mxu0 %v4678_v56  ;;  %v4270_v1 = vld [vmem:[%s7737_s3 + $0x2e0] sm:$0xff]  ;;  %v4272_v62 = vld [vmem:[%s7737_s3 + $0x2f0] sm:$0xff] }
 0x2d2   : > { %7853 = vst [vmem:[#allocation30_spill] sm:$0xff] %v7208_v11  ;;  %v4880_v23 = vadd.f32 %v2354_v35, %v6900_v5  ;;  %2921 = vmatmul.mubr.f32.gmra.mrb[50].mxu0 %v7097_v53  ;;  %v4682_v21 = vpack.c.bf16 %v4273_v51, %v4271_v54  ;;  %2597 = vst [vmem:[#allocation4 + $0xa0] sm:$0xff] %v2507_v42  ;;  %v2509_v28 = vsel %vm2467_vm6, %v2504_v12, %v2508_v29  ;;  %v4275_v60 = vld [vmem:[%s7737_s3 + $0x308] sm:$0xff]  ;;  %v4277_v56 = vld [vmem:[%s7737_s3 + $0x318] sm:$0xff] }
 0x2d3   : > { %v4881_v17 = vadd.f32 %v2356_v52, %v6903_v63  ;;  %v7228_v54 = vsel %vm1718_vm1, %v3594_v39, %v3598_v15  ;;  %2598 = vst.msk [vmem:[#allocation4 + $0xa8] sm:$0xff] %vm349_vm4, %v2509_v28  ;;  %v4684_v11 = vpack.c.bf16 %v4272_v62, %v4270_v1  ;;  %v4686_v19 = vpack.c.bf16 %v4277_v56, %v4275_v60 }
 0x2d4   : > { %7854 = vst [vmem:[#allocation31_spill] sm:$0xff] %v7228_v54  ;;  %v2510_v51 = vrot.slane %v4880_v23, 7  ;;  %v7231_v35 = vld [vmem:[#allocation4 + $0x88] sm:$0xff]  ;;  %v2684_v42 = vld [vmem:[#allocation4 + $0x80] sm:$0xff]  ;;  %v2360_v52 = vpop.f32.mrb[60].mxu1  ;;  %4681 = vmatpush1.bf16.msra.mxu0 %v4680_v57  ;;  %v7855_v60 = vrot.slane %v7097_v53, 1 }
 0x2d5   : > { %2647 = vst.msk [vmem:[#allocation4 + $0xa5] ss:$8 sm:$0x3] %vm6619_vm3, %v6630_v27  ;;  %v2512_v12 = vrot.slane %v4881_v17, 7  ;;  %4224 = vmatprep.mubr.msk.f32.mxu0 %vm349_vm4, %v7231_v35  ;;  %v3198_v26 = vrot.slane %v2684_v42, 1  ;;  %v3602_v39 = vrot.slane %v7231_v35, 2  ;;  %v4882_v23 = vadd.f32 %v2360_v52, %v6900_v5  ;;  %4683 = vmatprep.subr.bf16.mxu0 %v4682_v21 }
 0x2d6   : > { %v2511_v28 = vsel %vm2467_vm6, %v2506_v14, %v2510_v51  ;;  %v2362_v54 = vpop.f32.mrb[61].mxu1  ;;  %2927 = vmatmul.mubr.f32.gmra.mrb[52].mxu0 %v2684_v42  ;;  %v4274_v17 = vld [vmem:[%s7737_s3 + $0x300] sm:$0xff]  ;;  %v4276_v57 = vld [vmem:[%s7737_s3 + $0x310] sm:$0xff]  ;;  %v3600_v1 = vrot.slane %v2684_v42, 2  ;;  %v4279_v52 = vld [vmem:[%s7737_s3 + $0x328] sm:$0xff] }
 0x2d7   : > { %2599 = vst [vmem:[#allocation4 + $0xb0] sm:$0xff] %v2511_v28  ;;  %v2513_v62 = vsel %vm2467_vm6, %v2508_v29, %v2512_v12  ;;  %v4883_v14 = vadd.f32 %v2362_v54, %v6903_v63  ;;  %v4281_v21 = vld [vmem:[%s7737_s3 + $0x338] sm:$0xff]  ;;  %v7258_v56 = vsel %vm3167_vm7, %v7855_v60, %v3198_v26  ;;  %v2514_v42 = vrot.slane %v4882_v23, 7  ;;  %v7261_v28 = vld [vmem:[#allocation4 + $0x98] sm:$0xff] }
 0x2d8   : > { %2600 = vst.msk [vmem:[#allocation4 + $0xb8] sm:$0xff] %vm349_vm4, %v2513_v62  ;;  %v2686_v29 = vld [vmem:[#allocation4 + $0x90] sm:$0xff]  ;;  %v7264_v54 = vsel %vm1718_vm1, %v3598_v15, %v3602_v39  ;;  %v7267_v49 = vsel %vm1718_vm1, %v3596_v10, %v3600_v1  ;;  %v2366_v41 = vpop.f32.mrb[62].mxu1  ;;  %4225 = vmatprep.mubr.msk.f32.mxu0 %vm349_vm4, %v7261_v28  ;;  %v3606_v23 = vrot.slane %v7261_v28, 2  ;;  %4685 = vmatpush1.bf16.msra.mxu0 %v4684_v11  ;;  %v4280_v11 = vld [vmem:[%s7737_s3 + $0x330] sm:$0xff] }
 0x2d9   : > { %7856 = vst [vmem:[#allocation32_spill] sm:$0xff] %v7264_v54  ;;  %7857 = vst [vmem:[#allocation33_spill] sm:$0xff] %v7267_v49  ;;  %v2516_v53 = vrot.slane %v4883_v14, 7  ;;  %v3604_v62 = vrot.slane %v2686_v29, 2  ;;  %v4688_v60 = vpack.c.bf16 %v4276_v57, %v4274_v17  ;;  %v2515_v15 = vsel %vm2467_vm6, %v2510_v51, %v2514_v42  ;;  %v2368_v10 = vpop.f32.mrb[63].mxu1  ;;  %4687 = vmatprep.subr.bf16.mxu0 %v4686_v19 }
 0x2da   : > { %2650 = vst.msk [vmem:[#allocation4 + $0xb2] ss:$8 sm:$0x3] %vm6619_vm3, %v6630_v27  ;;  %v4884_v54 = vadd.f32 %v2366_v41, %v6900_v5  ;;  %2933 = vmatmul.mubr.f32.gmra.mrb[54].mxu0 %v2686_v29  ;;  %v4690_v49 = vpack.c.bf16 %v4281_v21, %v4279_v52  ;;  %v3202_v44 = vrot.slane %v2686_v29, 1  ;;  %2601 = vst [vmem:[#allocation4 + $0xc0] sm:$0xff] %v2515_v15 }
 0x2db   : > { %v2517_v14 = vsel %vm2467_vm6, %v2512_v12, %v2516_v53  ;;  %v4885_v2 = vadd.f32 %v2368_v10, %v6903_v63  ;;  %v7286_v41 = vsel %vm1718_vm1, %v3602_v39, %v3606_v23  ;;  %v7297_v57 = vsel %vm1718_vm1, %v3600_v1, %v3604_v62  ;;  %v4285_v1 = vld [vmem:[%s7737_s3 + $0x358] sm:$0xff] }
 0x2dc   : > { %7858 = vst [vmem:[#allocation34_spill] sm:$0xff] %v7286_v41  ;;  %2602 = vst.msk [vmem:[#allocation4 + $0xc8] sm:$0xff] %vm349_vm4, %v2517_v14  ;;  %v2518_v19 = vrot.slane %v4884_v54, 7  ;;  %v7289_v51 = vld [vmem:[#allocation4 + $0xa8] sm:$0xff]  ;;  %v7291_v17 = vld [vmem:[#allocation4 + $0xa0] sm:$0xff]  ;;  %v7294_v12 = vsel %vm3167_vm7, %v3198_v26, %v3202_v44  ;;  %v2372_v39 = vpop.f32.mrb[64].mxu1  ;;  %4689 = vmatpush1.bf16.msra.mxu0 %v4688_v60  ;;  %v4692_v10 = vpack.c.bf16 %v4280_v11, %v4278_v43 }
 0x2dd   : > { %7859 = vst [vmem:[#allocation35_spill] sm:$0xff] %v7294_v12  ;;  %7860 = vst [vmem:[#allocation36_spill] sm:$0xff] %v7297_v57  ;;  %v2520_v52 = vrot.slane %v4885_v2, 7  ;;  %4226 = vmatprep.mubr.msk.f32.mxu0 %vm349_vm4, %v7289_v51  ;;  %v3610_v21 = vrot.slane %v7289_v51, 2  ;;  %v3608_v29 = vrot.slane %v7291_v17, 2  ;;  %v4283_v26 = vld [vmem:[%s7737_s3 + $0x348] sm:$0xff]  ;;  %v4886_v2 = vadd.f32 %v2372_v39, %v6900_v5  ;;  %4691 = vmatprep.subr.bf16.mxu0 %v4690_v49 }
 0x2de   : > { %2653 = vst.msk [vmem:[#allocation4 + $0xc7] ss:$8 sm:$0x3] %vm6619_vm3, %v6630_v27  ;;  %v2519_v54 = vsel %vm2467_vm6, %v2514_v42, %v2518_v19  ;;  %v2374_v15 = vpop.f32.mrb[65].mxu1  ;;  %2939 = vmatmul.mubr.f32.gmra.mrb[56].mxu0 %v7291_v17  ;;  %v3206_v14 = vrot.slane %v7291_v17, 1  ;;  %v4282_v42 = vld [vmem:[%s7737_s3 + $0x340] sm:$0xff]  ;;  %v4694_v17 = vpack.c.bf16 %v4285_v1, %v4283_v26 }
 0x2df   : > { %2603 = vst [vmem:[#allocation4 + $0xd0] sm:$0xff] %v2519_v54  ;;  %v2521_v60 = vsel %vm2467_vm6, %v2516_v53, %v2520_v52  ;;  %v4887_v57 = vadd.f32 %v2374_v15, %v6903_v63  ;;  %v3611_v41 = vsel %vm1718_vm1, %v3606_v23, %v3610_v21  ;;  %v3609_v12 = vsel %vm1718_vm1, %v3604_v62, %v3608_v29  ;;  %v4284_v49 = vld [vmem:[%s7737_s3 + $0x350] sm:$0xff]  ;;  %v4287_v26 = vld [vmem:[%s7737_s3 + $0x368] sm:$0xff] }
 0x2e0   : > { %2604 = vst.msk [vmem:[#allocation4 + $0xd8] sm:$0xff] %vm349_vm4, %v2521_v60  ;;  %v2522_v43 = vrot.slane %v4886_v2, 7  ;;  %4373 = vmatprep.mubr.msk.f32.mxu1 %vm349_vm4, %v3611_v41  ;;  %v7331_v23 = vsel %vm3167_vm7, %v3202_v44, %v3206_v14  ;;  %v2378_v39 = vpop.f32.mrb[66].mxu1  ;;  %v4289_v44 = vld [vmem:[%s7737_s3 + $0x378] sm:$0xff]  ;;  %v4696_v2 = vpack.c.bf16 %v4284_v49, %v4282_v42  ;;  %4693 = vmatpush1.bf16.msra.mxu0 %v4692_v10 }
 0x2e1   : > { %v7328_v53 = vld [vmem:[#allocation4 + $0xb8] sm:$0xff]  ;;  %v2690_v11 = vld [vmem:[#allocation4 + $0xb0] sm:$0xff]  ;;  %7862 = vst [vmem:[#allocation38_spill] sm:$0xff] %v7331_v23  ;;  %2656 = vst.msk [vmem:[#allocation4 + $0xd4] ss:$8 sm:$0x3] %vm6619_vm3, %v6630_v27  ;;  %3817 = vmatmul.mubr.f32.vlgmr.msra.gmra.mrb[72].mxu1 %v3609_v12  ;;  %v4888_v27 = vadd.f32 %v2378_v39, %v6900_v5  ;;  %4695 = vmatprep.subr.bf16.mxu0 %v4694_v17 }
 0x2e2   : > { %7861 = vst [vmem:[#allocation37_spill] sm:$0xff] %v7328_v53  ;;  %v2524_v62 = vrot.slane %v4887_v57, 7  ;;  %4227 = vmatprep.mubr.msk.f32.mxu0 %vm349_vm4, %v7328_v53  ;;  %v3614_v54 = vrot.slane %v7328_v53, 2  ;;  %v3612_v41 = vrot.slane %v2690_v11, 2  ;;  %v7346_v1 = vsel %vm2467_vm6, %v2518_v19, %v2522_v43  ;;  %v2380_v57 = vpop.f32.mrb[67].mxu1  ;;  %v4286_v19 = vld [vmem:[%s7737_s3 + $0x360] sm:$0xff] }
 0x2e3   : > { %2945 = vmatmul.mubr.f32.gmra.mrb[58].mxu0 %v2690_v11  ;;  %v3210_v12 = vrot.slane %v2690_v11, 1  ;;  %v4889_v60 = vadd.f32 %v2380_v57, %v6903_v63  ;;  %v4288_v39 = vld [vmem:[%s7737_s3 + $0x370] sm:$0xff]  ;;  %v2526_v42 = vrot.slane %v4888_v27, 7 }
 0x2e4   : > { %v2525_v15 = vsel %vm2467_vm6, %v2520_v52, %v2524_v62  ;;  %v3615_v23 = vsel %vm1718_vm1, %v3610_v21, %v3614_v54  ;;  %v3613_v53 = vsel %vm1718_vm1, %v3608_v29, %v3612_v41  ;;  %v4698_v21 = vpack.c.bf16 %v4289_v44, %v4287_v26  ;;  %v2384_v11 = vpop.f32.mrb[68].mxu1  ;;  %4697 = vmatpush1.bf16.msra.mxu0 %v4696_v2 }
 0x2e5   : > { %2606 = vst.msk [vmem:[#allocation4 + $0xe8] sm:$0xff] %vm349_vm4, %v2525_v15  ;;  %4374 = vmatprep.mubr.msk.f32.mxu1 %vm349_vm4, %v3615_v23  ;;  %v7361_v52 = vld [vmem:[#allocation4 + $0xc8] sm:$0xff]  ;;  %v2692_v49 = vld [vmem:[#allocation4 + $0xc0] sm:$0xff]  ;;  %v7364_v29 = vsel %vm3167_vm7, %v3206_v14, %v3210_v12  ;;  %v2528_v10 = vrot.slane %v4889_v60, 7  ;;  %v2527_v27 = vsel %vm2467_vm6, %v2522_v43, %v2526_v42  ;;  %v4890_v23 = vadd.f32 %v2384_v11, %v6900_v5  ;;  %v2386_v9 = vpop.f32.mrb[69].mxu1 }
 0x2e6   : > { %7863 = vst [vmem:[#allocation39_spill] sm:$0xff] %v7364_v29  ;;  %4228 = vmatprep.mubr.msk.f32.mxu0 %vm349_vm4, %v7361_v52  ;;  %3823 = vmatmul.mubr.f32.gmra.mrb[74].mxu1 %v3613_v53  ;;  %v3618_v57 = vrot.slane %v7361_v52, 2  ;;  %v3616_v15 = vrot.slane %v2692_v49, 2  ;;  %v4700_v17 = vpack.c.bf16 %v4288_v39, %v4286_v19  ;;  %v3214_v26 = vrot.slane %v2692_v49, 1  ;;  %2607 = vst [vmem:[#allocation4 + $0xf0] sm:$0xff] %v2527_v27 }
 0x2e7   : > { %2951 = vmatmul.mubr.f32.gmra.mrb[60].mxu0 %v2692_v49  ;;  %v2529_v14 = vsel %vm2467_vm6, %v2524_v62, %v2528_v10  ;;  %v4891_v44 = vadd.f32 %v2386_v9, %v6903_v63  ;;  %v2530_v29 = vrot.slane %v4890_v23, 7  ;;  %4699 = vmatprep.subr.bf16.mxu0 %v4698_v21  ;;  %v5120_v62 = vld [vmem:[#allocation3 + $0x120] sm:$0xff] }
 0x2e8   : > { %v3619_v60 = vsel %vm1718_vm1, %v3614_v54, %v3618_v57  ;;  %v3617_v53 = vsel %vm1718_vm1, %v3612_v41, %v3616_v15  ;;  %2608 = vst.msk [vmem:[#allocation4 + $0xf8] sm:$0xff] %vm349_vm4, %v2529_v14  ;;  %v7377_v43 = vld [vmem:[#allocation4 + $0xd8] sm:$0xff]  ;;  %v2694_v11 = vld [vmem:[#allocation4 + $0xd0] sm:$0xff]  ;;  %v7380_v19 = vsel %vm3167_vm7, %v3210_v12, %v3214_v26  ;;  %v2390_v54 = vpop.f32.mrb[70].mxu1  ;;  %4701 = vmatpush1.bf16.msra.mxu0 %v4700_v17 }
 0x2e9   : > { %4375 = vmatprep.mubr.msk.f32.mxu1 %vm349_vm4, %v3619_v60  ;;  %2659 = vst.msk [vmem:[#allocation4 + $0xf1] ss:$8 sm:$0x3] %vm6619_vm3, %v5120_v62  ;;  %2662 = vst.msk [vmem:[#allocation4 + $0xf6] ss:$8 sm:$0x3] %vm6619_vm3, %v5120_v62  ;;  %4229 = vmatprep.mubr.msk.f32.mxu0 %vm349_vm4, %v7377_v43  ;;  %v7390_v39 = vsel %vm2467_vm6, %v2526_v42, %v2530_v29  ;;  %v4892_v12 = vadd.f32 %v2390_v54, %v6900_v5 }
 0x2ea   : > { %v2532_v9 = vrot.slane %v4891_v44, 7  ;;  %3829 = vmatmul.mubr.f32.gmra.mrb[76].mxu1 %v3617_v53  ;;  %v3622_v41 = vrot.slane %v7377_v43, 2  ;;  %v3620_v2 = vrot.slane %v2694_v11, 2  ;;  %v2392_v49 = vpop.f32.mrb[71].mxu1  ;;  %v3218_v21 = vrot.slane %v2694_v11, 1  ;;  %4703 = vmatprep.subr.bf16.mxu0 %v6614_v37 }
 0x2eb   : > { %2957 = vmatmul.mubr.f32.gmra.mrb[62].mxu0 %v2694_v11  ;;  %v4893_v23 = vadd.f32 %v2392_v49, %v6903_v63  ;;  %v2534_v42 = vrot.slane %v4892_v12, 7  ;;  %v3222_v63 = vrot.slane %v7346_v1, 1  ;;  %v3624_v53 = vrot.slane %v7346_v1, 2 }
 0x2ec   : > { %v2533_v27 = vsel %vm2467_vm6, %v2528_v10, %v2532_v9  ;;  %v7395_v14 = vld [vmem:[#allocation4 + $0xe8] sm:$0xff]  ;;  %v3623_v44 = vsel %vm1718_vm1, %v3618_v57, %v3622_v41  ;;  %v3621_v60 = vsel %vm1718_vm1, %v3616_v15, %v3620_v2  ;;  %v7407_v57 = vsel %vm3167_vm7, %v3214_v26, %v3218_v21 }
 0x2ed   : > { %2610 = vst.msk [vmem:[#allocation4 + $0x108] sm:$0xff] %vm349_vm4, %v2533_v27  ;;  %4230 = vmatprep.mubr.msk.f32.mxu0 %vm349_vm4, %v7395_v14  ;;  %4376 = vmatprep.mubr.msk.f32.mxu1 %vm349_vm4, %v3623_v44  ;;  %v3626_v5 = vrot.slane %v7395_v14, 2  ;;  %v2536_v10 = vrot.slane %v4893_v23, 7  ;;  %v2535_v15 = vsel %vm2467_vm6, %v2530_v29, %v2534_v42  ;;  %2613 = vst [vmem:[#allocation4 + $0x120] sm:$0x1] %v2534_v42  ;;  %v3230_v12 = vrot.slane %v7390_v39, 1 }
 0x2ee   : > { %3835 = vmatmul.mubr.f32.gmra.mrb[78].mxu1 %v3621_v60  ;;  %v7414_v11 = vsel %vm3167_vm7, %v3218_v21, %v3222_v63  ;;  %2611 = vst [vmem:[#allocation4 + $0x110] sm:$0xff] %v2535_v15  ;;  %v3625_v29 = vsel %vm1718_vm1, %v3620_v2, %v3624_v53  ;;  %v3035_v23 = vld [vmem:[#allocation4 + $0x8] sm:$0xfe]  ;;  %v3632_v60 = vrot.slane %v7390_v39, 2  ;;  %v3172_v42 = vrot.slane %v6967_v59, 1 }
 0x2ef   : > { %2963 = vmatmul.mubr.f32.gmra.mrb[64].mxu0 %v7346_v1  ;;  %v3627_v17 = vsel %vm1718_vm1, %v3622_v41, %v3626_v5  ;;  %v2537_v54 = vsel %vm2467_vm6, %v2532_v9, %v2536_v10  ;;  %2615 = vst.msk [vmem:[#allocation4 + $0x128] sm:$0x1] %vm2614_vm8, %v2536_v10 }
 0x2f0   : > { %4377 = vmatprep.mubr.msk.f32.mxu1 %vm349_vm4, %v3627_v17  ;;  %2612 = vst.msk [vmem:[#allocation4 + $0x118] sm:$0xff] %vm349_vm4, %v2537_v54  ;;  %v7420_v37 = vld [vmem:[#allocation4 + $0xf8] sm:$0xff]  ;;  %v2698_v26 = vld [vmem:[#allocation4 + $0xf0] sm:$0xff]  ;;  %v3171_v17 = vrot.slane %v3035_v23, 1 }
 0x2f1   : > { %2665 = vst.msk [vmem:[#allocation4 + $0x113] ss:$8 sm:$0x3] %vm6619_vm3, %v5120_v62  ;;  %4231 = vmatprep.mubr.msk.f32.mxu0 %vm349_vm4, %v7420_v37  ;;  %v3630_v1 = vrot.slane %v7420_v37, 2  ;;  %v3628_v9 = vrot.slane %v2698_v26, 2  ;;  %v3226_v41 = vrot.slane %v2698_v26, 1 }
 0x2f2   : > { %3841 = vmatmul.mubr.f32.gmra.mrb[80].mxu1 %v3625_v29 }
 0x2f3   : > { %2969 = vmatmul.mubr.f32.gmra.mrb[66].mxu0 %v2698_v26  ;;  %v3631_v21 = vsel %vm1718_vm1, %v3626_v5, %v3630_v1  ;;  %v3629_v2 = vsel %vm1718_vm1, %v3624_v53, %v3628_v9  ;;  %v7438_v62 = vsel %vm3167_vm7, %v3222_v63, %v3226_v41  ;;  %v7441_v27 = vsel %vm3167_vm7, %v3226_v41, %v3230_v12  ;;  %v3034_v5 = vld [vmem:[#allocation4] sm:$0xfe] }
 0x2f4   : > { %v7429_v49 = vld [vmem:[#allocation4 + $0x108] sm:$0xff]  ;;  %4378 = vmatprep.mubr.msk.f32.mxu1 %vm349_vm4, %v3631_v21  ;;  %v3633_v63 = vsel %vm1718_vm1, %v3628_v9, %v3632_v60  ;;  %v3173_v26 = vsel %vm3167_vm7, %v3171_v17, %v3172_v42  ;;  %v3168_v21 = vrot.slane %v3034_v5, 1  ;;  %v3507_v23 = vld [vmem:[#allocation4 + $0x120] sm:$0x3]  ;;  %v3180_v5 = vrot.slane %v7030_v34, 1 }
 0x2f5   : > { %4232 = vmatprep.mubr.msk.f32.mxu0 %vm349_vm4, %v7429_v49  ;;  %v3634_v38 = vrot.slane %v7429_v49, 2  ;;  %v3188_v34 = vrot.slane %v7107_v6, 1  ;;  %v7865_v6 = vrot.slane %v7072_v40, 1 }
 0x2f6   : > { %3847 = vmatmul.mubr.f32.gmra.mrb[82].mxu1 %v3629_v2  ;;  %v3508_v53 = vld [vmem:[#allocation4 + $0x128] sm:$0x3] }
 0x2f7   : > { %2975 = vmatmul.mubr.f32.gmra.mrb[68].mxu0 %v7390_v39  ;;  %v3635_v44 = vsel %vm1718_vm1, %v3630_v1, %v3634_v38  ;;  %v3176_v1 = vrot.slane %v6994_v18, 1  ;;  %v3642_v2 = vrot.slane %v3508_v53, 2 }
 0x2f8   : > { %4379 = vmatprep.mubr.msk.f32.mxu1 %vm349_vm4, %v3635_v44  ;;  %v7448_v10 = vld [vmem:[#allocation4 + $0x118] sm:$0xff]  ;;  %v7451_v15 = vld [vmem:[#allocation4 + $0x110] sm:$0xff] }
 0x2f9   : > { %4233 = vmatprep.mubr.msk.f32.mxu0 %vm349_vm4, %v7448_v10  ;;  %v3638_v54 = vrot.slane %v7448_v10, 2  ;;  %v3636_v39 = vrot.slane %v7451_v15, 2  ;;  %v3234_v29 = vrot.slane %v7451_v15, 1  ;;  %v3181_v53 = vsel %vm3167_vm7, %v3176_v1, %v3180_v5 }
 0x2fa   : > { %3853 = vmatmul.mubr.f32.gmra.mrb[84].mxu1 %v3633_v63  ;;  %v7864_v63 = vrot.slane %v6969_v46, 1 }
 0x2fb   : > { %2981 = vmatmul.mubr.f32.gmra.mrb[70].mxu0 %v7451_v15  ;;  %v3639_v9 = vsel %vm1718_vm1, %v3634_v38, %v3638_v54  ;;  %v3637_v41 = vsel %vm1718_vm1, %v3632_v60, %v3636_v39  ;;  %v7468_v44 = vsel %vm3167_vm7, %v3230_v12, %v3234_v29  ;;  %v3643_v17 = vsel %vm1718_vm1, %v3638_v54, %v3642_v2  ;;  %v7880_v2 = vld [vmem:[#allocation15_spill] sm:$0xff]  ;;  %v7888_v15 = vld [vmem:[#allocation21_spill] sm:$0xff] }
 0x2fc   : > { %4290 = vmatprep.mubr.msk.f32.mxu0 %vm349_vm4, %v3173_v26  ;;  %4380 = vmatprep.mubr.msk.f32.mxu1 %vm349_vm4, %v3639_v9  ;;  %v3170_v18 = vsel %vm3167_vm7, %v3168_v21, %v7864_v63  ;;  %v3177_v38 = vsel %vm3167_vm7, %v3172_v42, %v3176_v1  ;;  %v3640_v60 = vrot.slane %v3507_v23, 2  ;;  %v3184_v54 = vrot.slane %v7070_v7, 1  ;;  %v7876_v42 = vld [vmem:[#allocation39_spill] sm:$0xff]  ;;  %v7877_v1 = vld [vmem:[#allocation14_spill] sm:$0xff]  ;;  %v7878_v9 = vld [vmem:[#allocation13_spill] sm:$0xff] }
 0x2fd   : > { %v3200_v7 = vrot.slane %v7231_v35, 1  ;;  %v3220_v26 = vrot.slane %v7377_v43, 1  ;;  %v7879_v21 = vld [vmem:[#allocation16_spill] sm:$0xff]  ;;  %v3228_v23 = vrot.slane %v7420_v37, 1  ;;  %v7881_v63 = vld [vmem:[#allocation18_spill] sm:$0xff]  ;;  %v3236_v37 = vrot.slane %v7448_v10, 1 }
 0x2fe   : > { %3859 = vmatmul.mubr.f32.gmra.mrb[86].mxu1 %v3637_v41  ;;  %v3641_v12 = vsel %vm1718_vm1, %v3636_v39, %v3640_v60  ;;  %v3224_v41 = vrot.slane %v7395_v14, 1  ;;  %v3070_v60 = vld [vmem:[#allocation4 + $0x120] sm:$0x1] }
 0x2ff   : > { %3361 = vmatmul.mubr.f32.vlgmr.msra.gmra.mrb[36].mxu0 %v3170_v18  ;;  %4381 = vmatprep.mubr.msk.f32.mxu1 %vm349_vm4, %v3643_v17  ;;  %v3232_v18 = vrot.slane %v7429_v49, 1  ;;  %v7883_v17 = vld [vmem:[#allocation20_spill] sm:$0xff] }
 0x300   : > { %4705 = vmatpush1.bf16.msra.mxu0 %v6616_v25  ;;  %4291 = vmatprep.mubr.msk.f32.mxu0 %vm349_vm4, %v3177_v38  ;;  %v3185_v25 = vsel %vm3167_vm7, %v3180_v5, %v3184_v54  ;;  %v3225_v43 = vsel %vm3167_vm7, %v3220_v26, %v3224_v41  ;;  %v3229_v14 = vsel %vm3167_vm7, %v3224_v41, %v3228_v23  ;;  %v3071_v38 = vld [vmem:[#allocation4 + $0x128] sm:$0x1]  ;;  %v3506_v5 = vld [vmem:[#allocation4 + $0x8] sm:$0xfc]  ;;  %v7903_v41 = vld [vmem:[#allocation6_spill] sm:$0xff] }
 0x301   : > { %4707 = vmatprep.subr.bf16.mxu0 %v6656_v30  ;;  %v3186_v30 = vrot.slane %v7117_v48, 1  ;;  %v7869_v48 = vld [vmem:[#allocation35_spill] sm:$0xff]  ;;  %v3240_v49 = vrot.slane %v3071_v38, 1  ;;  %v3573_v10 = vrot.slane %v3506_v5, 2 }
 0x302   : > { %3865 = vmatmul.mubr.f32.gmra.mrb[88].mxu1 %v3641_v12  ;;  %v3238_v12 = vrot.slane %v3070_v60, 1 }
 0x303   : > { %3367 = vmatmul.mubr.f32.gmra.mrb[38].mxu0 %v7027_v13  ;;  %v3196_v13 = vrot.slane %v7178_v32, 1  ;;  %v7873_v32 = vld [vmem:[#allocation38_spill] sm:$0xff] }
 0x304   : > { %4292 = vmatprep.mubr.msk.f32.mxu0 %vm349_vm4, %v3181_v53  ;;  %4709 = vmatpush1.bf16.msra.mxu0 %v6658_v61  ;;  %v3189_v61 = vsel %vm3167_vm7, %v3184_v54, %v3188_v34  ;;  %v3505_v53 = vld [vmem:[#allocation4] sm:$0xfc]  ;;  %v7884_v54 = vrot.slane %v6967_v59, 2 }
 0x305   : > { %4711 = vmatprep.subr.bf16.mxu0 %v6686_v33  ;;  %v3192_v33 = vrot.slane %v7151_v47, 1  ;;  %v7870_v47 = vld [vmem:[#allocation37_spill] sm:$0xff]  ;;  %v7890_v59 = vld [vmem:[#allocation23_spill] sm:$0xff] }
 0x307   : > { %3373 = vmatmul.mubr.f32.gmra.mrb[40].mxu0 %v7067_v16  ;;  %v7866_v16 = vrot.slane %v7153_v58, 1  ;;  %v7872_v58 = vld [vmem:[#allocation9_spill] sm:$0xff] }
 0x308   : > { %4293 = vmatprep.mubr.msk.f32.mxu0 %vm349_vm4, %v3185_v25  ;;  %4713 = vmatpush1.bf16.msra.mxu0 %v6688_v50  ;;  %v3187_v50 = vsel %vm3167_vm7, %v7865_v6, %v3186_v30  ;;  %v3575_v25 = vsel %vm1718_vm1, %v3573_v10, %v7884_v54  ;;  %v7891_v6 = vld [vmem:[#allocation25_spill] sm:$0xff] }
 0x309   : > { %4715 = vmatprep.subr.bf16.mxu0 %v6698_v22  ;;  %v3193_v22 = vsel %vm3167_vm7, %v3188_v34, %v3192_v33  ;;  %v3570_v34 = vrot.slane %v3505_v53, 2 }
 0x30b   : > { %3379 = vmatmul.mubr.f32.gmra.mrb[42].mxu0 %v7115_v0  ;;  %v7868_v0 = vld [vmem:[#allocation7_spill] sm:$0xff] }
 0x30c   : > { %4294 = vmatprep.mubr.msk.f32.mxu0 %vm349_vm4, %v3189_v61  ;;  %4717 = vmatpush1.bf16.msra.mxu0 %v6706_v20  ;;  %v3191_v20 = vsel %vm3167_vm7, %v3186_v30, %v7866_v16  ;;  %v7886_v61 = vld [vmem:[#allocation19_spill] sm:$0xff] }
 0x30d   : > { %4719 = vmatprep.subr.bf16.mxu0 %v6728_v45  ;;  %v3197_v45 = vsel %vm3167_vm7, %v3192_v33, %v3196_v13  ;;  %v7887_v33 = vld [vmem:[#allocation22_spill] sm:$0xff]  ;;  %v7896_v16 = vld [vmem:[#allocation31_spill] sm:$0xff] }
 0x30f   : > { %3385 = vmatmul.mubr.f32.gmra.mrb[44].mxu0 %v3187_v50  ;;  %v7892_v50 = vld [vmem:[#allocation27_spill] sm:$0xff] }
 0x310   : > { %4295 = vmatprep.mubr.msk.f32.mxu0 %vm349_vm4, %v3193_v22  ;;  %4721 = vmatpush1.bf16.msra.mxu0 %v6730_v4  ;;  %v3201_v4 = vsel %vm3167_vm7, %v3196_v13, %v3200_v7  ;;  %v7894_v22 = vld [vmem:[#allocation29_spill] sm:$0xff]  ;;  %v7895_v13 = vld [vmem:[#allocation28_spill] sm:$0xff] }
 0x311   : > { %4723 = vmatprep.subr.bf16.mxu0 %v6740_v8  ;;  %v3204_v8 = vrot.slane %v7261_v28, 1  ;;  %v7874_v28 = vld [vmem:[#allocation12_spill] sm:$0xff] }
 0x313   : > { %3391 = vmatmul.mubr.f32.gmra.mrb[46].mxu0 %v3191_v20  ;;  %v3205_v40 = vsel %vm3167_vm7, %v3200_v7, %v3204_v8  ;;  %v7897_v20 = vld [vmem:[#allocation30_spill] sm:$0xff]  ;;  %v7899_v7 = vld [vmem:[#allocation33_spill] sm:$0xff] }
 0x314   : > { %4296 = vmatprep.mubr.msk.f32.mxu0 %vm349_vm4, %v3197_v45  ;;  %4725 = vmatpush1.bf16.msra.mxu0 %v6749_v36  ;;  %v3208_v36 = vrot.slane %v7289_v51, 1  ;;  %v7875_v51 = vld [vmem:[#allocation11_spill] sm:$0xff]  ;;  %v7898_v45 = vld [vmem:[#allocation32_spill] sm:$0xff] }
 0x315   : > { %4727 = vmatprep.subr.bf16.mxu0 %v6758_v31  ;;  %v7867_v31 = vld [vmem:[#allocation8_spill] sm:$0xff] }
 0x317   : > { %3397 = vmatmul.mubr.f32.gmra.mrb[48].mxu0 %v7195_v3  ;;  %v3209_v3 = vsel %vm3167_vm7, %v3204_v8, %v3208_v36  ;;  %v7901_v8 = vld [vmem:[#allocation36_spill] sm:$0xff] }
 0x318   : > { %4297 = vmatprep.mubr.msk.f32.mxu0 %vm349_vm4, %v3201_v4  ;;  %4729 = vmatpush1.bf16.msra.mxu0 %v6766_v24  ;;  %v3212_v24 = vrot.slane %v7870_v47, 1  ;;  %v7900_v4 = vld [vmem:[#allocation34_spill] sm:$0xff] }
 0x319   : > { %4731 = vmatprep.subr.bf16.mxu0 %v6782_v55  ;;  %v7871_v55 = vld [vmem:[#allocation10_spill] sm:$0xff] }
 0x31a   : > { %v3213_v35 = vsel %vm3167_vm7, %v3208_v36, %v3212_v24 }
 0x31b   : > { %3403 = vmatmul.mubr.f32.gmra.mrb[50].mxu0 %v7258_v56  ;;  %v3216_v56 = vrot.slane %v7361_v52, 1 }
 0x31c   : > { %4298 = vmatprep.mubr.msk.f32.mxu0 %vm349_vm4, %v3205_v40  ;;  %4733 = vmatpush1.bf16.msra.mxu0 %v7867_v31 }
 0x31d   : > { %4735 = vmatprep.subr.bf16.mxu0 %v7868_v0  ;;  %v3217_v39 = vsel %vm3167_vm7, %v3212_v24, %v3216_v56  ;;  %v3221_v52 = vsel %vm3167_vm7, %v3216_v56, %v3220_v26 }
 0x31f   : > { %3409 = vmatmul.mubr.f32.gmra.mrb[52].mxu0 %v7869_v48 }
 0x320   : > { %4299 = vmatprep.mubr.msk.f32.mxu0 %vm349_vm4, %v3209_v3  ;;  %4737 = vmatpush1.bf16.msra.mxu0 %v7871_v55 }
 0x321   : > { %4739 = vmatprep.subr.bf16.mxu0 %v7872_v58 }
 0x323   : > { %3415 = vmatmul.mubr.f32.gmra.mrb[54].mxu0 %v7873_v32 }
 0x324   : > { %4300 = vmatprep.mubr.msk.f32.mxu0 %vm349_vm4, %v3213_v35  ;;  %4741 = vmatpush1.bf16.msra.mxu0 %v7874_v28 }
 0x325   : > { %4743 = vmatprep.subr.bf16.mxu0 %v7875_v51 }
 0x327   : > { %3421 = vmatmul.mubr.f32.gmra.mrb[56].mxu0 %v7876_v42 }
 0x328   : > { %4301 = vmatprep.mubr.msk.f32.mxu0 %vm349_vm4, %v3217_v39  ;;  %4745 = vmatpush1.bf16.msra.mxu0 %v7877_v1  ;;  %v2667_v1 = vld [vmem:[%s7740_s6] sm:$0x3] }
 0x329   : > { %4747 = vmatprep.subr.bf16.mxu0 %v7878_v9  ;;  %v7902_v9 = vld [vmem:[#allocation5_spill] sm:$0xff] }
 0x32b   : > { %3427 = vmatmul.mubr.f32.gmra.mrb[58].mxu0 %v7380_v19  ;;  %v7882_v19 = vld [vmem:[#allocation17_spill] sm:$0xff] }
 0x32c   : > { %4302 = vmatprep.mubr.msk.f32.mxu0 %vm349_vm4, %v3221_v52  ;;  %4749 = vmatpush1.bf16.msra.mxu0 %v7879_v21  ;;  %v7625_v52 = vrot.slane %v2667_v1, %v7902_v9  ;;  %v7628_v21 = vrot.slane %v2667_v1, %v7903_v41 }
 0x32d   : > { %4751 = vmatprep.subr.bf16.mxu0 %v7880_v2 }
 0x32f   : > { %3433 = vmatmul.mubr.f32.gmra.mrb[60].mxu0 %v7407_v57  ;;  %v3233_v57 = vsel %vm3167_vm7, %v3228_v23, %v3232_v18 }
 0x330   : > { %4303 = vmatprep.mubr.msk.f32.mxu0 %vm349_vm4, %v3225_v43  ;;  %4753 = vmatpush1.bf16.msra.mxu0 %v7881_v63 }
 0x331   : > { %4755 = vmatprep.subr.bf16.mxu0 %v7882_v19 }
 0x333   : > { %3439 = vmatmul.mubr.f32.gmra.mrb[62].mxu0 %v7414_v11  ;;  %v3237_v11 = vsel %vm3167_vm7, %v3232_v18, %v3236_v37 }
 0x334   : > { %4304 = vmatprep.mubr.msk.f32.mxu0 %vm349_vm4, %v3229_v14  ;;  %4757 = vmatpush1.bf16.msra.mxu0 %v7883_v17 }
 0x337   : > { %3445 = vmatmul.mubr.f32.gmra.mrb[64].mxu0 %v7438_v62  ;;  %v3241_v62 = vsel %vm3167_vm7, %v3236_v37, %v3240_v49 }
 0x338   : > { %4305 = vmatprep.mubr.msk.f32.mxu0 %vm349_vm4, %v3233_v57 }
 0x33b   : > { %3451 = vmatmul.mubr.f32.gmra.mrb[66].mxu0 %v7441_v27  ;;  %v3239_v27 = vsel %vm3167_vm7, %v3234_v29, %v3238_v12  ;;  %v7889_v29 = vld [vmem:[#allocation24_spill] sm:$0xff] }
 0x33c   : > { %4306 = vmatprep.mubr.msk.f32.mxu0 %vm349_vm4, %v3237_v11 }
 0x33f   : > { %3457 = vmatmul.mubr.f32.gmra.mrb[68].mxu0 %v7468_v44  ;;  %v7885_v44 = vrot.slane %v6969_v46, 2  ;;  %v7893_v46 = vld [vmem:[#allocation26_spill] sm:$0xff] }
 0x340   : > { %4307 = vmatprep.mubr.msk.f32.mxu0 %vm349_vm4, %v3241_v62 }
 0x341   : > { %v3572_v30 = vsel %vm1718_vm1, %v3570_v34, %v7885_v44 }
 0x343   : > { %3463 = vmatmul.mubr.f32.gmra.mrb[70].mxu0 %v3239_v27 }
 0x344   : > { %4364 = vmatprep.mubr.msk.f32.mxu0 %vm349_vm4, %v3575_v25 }
 0x347   : > { %3763 = vmatmul.mubr.f32.vlgmr.msra.gmra.mrb[36].mxu0 %v3572_v30 }
 0x348   : > { %4365 = vmatprep.mubr.msk.f32.mxu0 %vm349_vm4, %v7886_v61 }
 0x34b   : > { %3769 = vmatmul.mubr.f32.gmra.mrb[38].mxu0 %v7887_v33 }
 0x34c   : > { %4366 = vmatprep.mubr.msk.f32.mxu0 %vm349_vm4, %v7888_v15 }
 0x34f   : > { %3775 = vmatmul.mubr.f32.gmra.mrb[40].mxu0 %v7889_v29 }
 0x350   : > { %4367 = vmatprep.mubr.msk.f32.mxu0 %vm349_vm4, %v7890_v59 }
 0x353   : > { %3781 = vmatmul.mubr.f32.gmra.mrb[42].mxu0 %v7891_v6 }
 0x354   : > { %4368 = vmatprep.mubr.msk.f32.mxu0 %vm349_vm4, %v7892_v50 }
 0x357   : > { %3787 = vmatmul.mubr.f32.gmra.mrb[44].mxu0 %v7893_v46 }
 0x358   : > { %4369 = vmatprep.mubr.msk.f32.mxu0 %vm349_vm4, %v7894_v22 }
 0x35b   : > { %3793 = vmatmul.mubr.f32.gmra.mrb[46].mxu0 %v7895_v13 }
 0x35c   : > { %4370 = vmatprep.mubr.msk.f32.mxu0 %vm349_vm4, %v7896_v16 }
 0x35f   : > { %3799 = vmatmul.mubr.f32.gmra.mrb[48].mxu0 %v7897_v20 }
 0x360   : > { %4371 = vmatprep.mubr.msk.f32.mxu0 %vm349_vm4, %v7898_v45 }
 0x363   : > { %3805 = vmatmul.mubr.f32.gmra.mrb[50].mxu0 %v7899_v7 }
 0x364   : > { %4372 = vmatprep.mubr.msk.f32.mxu0 %vm349_vm4, %v7900_v4 }
 0x367   : > { %3811 = vmatmul.mubr.f32.gmra.mrb[52].mxu0 %v7901_v8 }
 0x3b4   : > { %v3818_v40 = vpop.f32.mrb[72].mxu1 }
 0x3b5   : > { %v3820_v36 = vpop.f32.mrb[73].mxu1 }
 0x3b9   : > { %v3824_v31 = vpop.f32.mrb[74].mxu1 }
 0x3ba   : > { %v3826_v0 = vpop.f32.mrb[75].mxu1 }
 0x3bd   : > { %v3830_v48 = vpop.f32.mrb[76].mxu1 }
 0x3be   : > { %v3832_v3 = vpop.f32.mrb[77].mxu1 }
 0x3c1   : > { %v3836_v47 = vpop.f32.mrb[78].mxu1 }
 0x3c2   : > { %v3838_v24 = vpop.f32.mrb[79].mxu1 }
 0x3c5   : > { %v3842_v55 = vpop.f32.mrb[80].mxu1 }
 0x3c6   : > { %v3844_v58 = vpop.f32.mrb[81].mxu1 }
 0x3c9   : > { %v3848_v32 = vpop.f32.mrb[82].mxu1 }
 0x3ca   : > { %v3850_v35 = vpop.f32.mrb[83].mxu1 }
 0x3cd   : > { %v7607_v56 = vpop.f32.mrb[84].mxu1 }
 0x3ce   : > { %v7609_v28 = vpop.f32.mrb[85].mxu1 }
 0x3d1   : > { %v7611_v51 = vpop.f32.mrb[86].mxu1 }
 0x3d2   : > { %v7613_v42 = vpop.f32.mrb[87].mxu1 }
 0x3d5   : > { %v7615_v39 = vpop.f32.mrb[88].mxu1 }
 0x3d6   : > { %v7617_v26 = vpop.f32.mrb[89].mxu1 }
 0x3f6   : > { %v3416_v2 = vpop.f32.mrb[54].mxu0 }
 0x3f7   : > { %v4912_v43 = vadd.f32 %v3416_v2, %v7625_v52  ;;  %v3418_v23 = vpop.f32.mrb[55].mxu0 }
 0x3f8   : > { %v4914_v63 = vadd.f32 %v3418_v23, %v7628_v21 }
 0x3f9   : > { %v4913_v19 = vadd.f32 %v4912_v43, %v3818_v40 }
 0x3fa   : > { %v4915_v14 = vadd.f32 %v4914_v63, %v3820_v36  ;;  %v3422_v18 = vpop.f32.mrb[56].mxu0 }
 0x3fb   : > { %3926 = vst [vmem:[%s7634_s25 + $0x90] sm:$0xff] %v4913_v19  ;;  %v4916_v17 = vadd.f32 %v3422_v18, %v7625_v52  ;;  %v3424_v57 = vpop.f32.mrb[57].mxu0 }
 0x3fc   : > { %3927 = vst.msk [vmem:[%s7634_s25 + $0x98] sm:$0xff] %vm3908_vm9, %v4915_v14  ;;  %v4918_v37 = vadd.f32 %v3424_v57, %v7628_v21 }
 0x3fd   : > { %v4917_v38 = vadd.f32 %v4916_v17, %v3824_v31 }
 0x3fe   : > { %v4919_v11 = vadd.f32 %v4918_v37, %v3826_v0  ;;  %v3428_v49 = vpop.f32.mrb[58].mxu0 }
 0x3ff   : > { %3928 = vst [vmem:[%s7634_s25 + $0xa0] sm:$0xff] %v4917_v38  ;;  %v4920_v60 = vadd.f32 %v3428_v49, %v7625_v52  ;;  %v3430_v5 = vpop.f32.mrb[59].mxu0 }
 0x400   : > { %3929 = vst.msk [vmem:[%s7634_s25 + $0xa8] sm:$0xff] %vm3908_vm9, %v4919_v11  ;;  %v4922_v62 = vadd.f32 %v3430_v5, %v7628_v21 }
 0x401   : > { %v4921_v12 = vadd.f32 %v4920_v60, %v3830_v48 }
 0x402   : > { %v4923_v10 = vadd.f32 %v4922_v62, %v3832_v3  ;;  %v3434_v53 = vpop.f32.mrb[60].mxu0 }
 0x403   : > { %3930 = vst [vmem:[%s7634_s25 + $0xb0] sm:$0xff] %v4921_v12  ;;  %v4924_v27 = vadd.f32 %v3434_v53, %v7625_v52  ;;  %v3436_v54 = vpop.f32.mrb[61].mxu0 }
 0x404   : > { %3931 = vst.msk [vmem:[%s7634_s25 + $0xb8] sm:$0xff] %vm3908_vm9, %v4923_v10  ;;  %v4926_v25 = vadd.f32 %v3436_v54, %v7628_v21 }
 0x405   : > { %v4925_v34 = vadd.f32 %v4924_v27, %v3836_v47 }
 0x406   : > { %v4927_v44 = vadd.f32 %v4926_v25, %v3838_v24  ;;  %v3440_v30 = vpop.f32.mrb[62].mxu0 }
 0x407   : > { %3932 = vst [vmem:[%s7634_s25 + $0xc0] sm:$0xff] %v4925_v34  ;;  %v4928_v61 = vadd.f32 %v3440_v30, %v7625_v52  ;;  %v3442_v33 = vpop.f32.mrb[63].mxu0 }
 0x408   : > { %3933 = vst.msk [vmem:[%s7634_s25 + $0xc8] sm:$0xff] %vm3908_vm9, %v4927_v44  ;;  %v4930_v15 = vadd.f32 %v3442_v33, %v7628_v21 }
 0x409   : > { %v4929_v29 = vadd.f32 %v4928_v61, %v3842_v55 }
 0x40a   : > { %v4931_v59 = vadd.f32 %v4930_v15, %v3844_v58  ;;  %v3446_v6 = vpop.f32.mrb[64].mxu0 }
 0x40b   : > { %3934 = vst [vmem:[%s7634_s25 + $0xd0] sm:$0xff] %v4929_v29  ;;  %v4932_v50 = vadd.f32 %v3446_v6, %v7625_v52  ;;  %v3448_v46 = vpop.f32.mrb[65].mxu0 }
 0x40c   : > { %3935 = vst.msk [vmem:[%s7634_s25 + $0xd8] sm:$0xff] %vm3908_vm9, %v4931_v59  ;;  %v4934_v22 = vadd.f32 %v3448_v46, %v7628_v21 }
 0x40d   : > { %v4933_v13 = vadd.f32 %v4932_v50, %v3848_v32 }
 0x40e   : > { %v4935_v16 = vadd.f32 %v4934_v22, %v3850_v35  ;;  %v3452_v20 = vpop.f32.mrb[66].mxu0 }
 0x40f   : > { %3936 = vst [vmem:[%s7634_s25 + $0xe0] sm:$0xff] %v4933_v13  ;;  %v4936_v45 = vadd.f32 %v3452_v20, %v7625_v52  ;;  %v3454_v7 = vpop.f32.mrb[67].mxu0 }
 0x410   : > { %3937 = vst.msk [vmem:[%s7634_s25 + $0xe8] sm:$0xff] %vm3908_vm9, %v4935_v16  ;;  %v4938_v4 = vadd.f32 %v3454_v7, %v7628_v21 }
 0x411   : > { %v4937_v8 = vadd.f32 %v4936_v45, %v7607_v56 }
 0x412   : > { %v4939_v40 = vadd.f32 %v4938_v4, %v7609_v28  ;;  %v3458_v36 = vpop.f32.mrb[68].mxu0 }
 0x413   : > { %3938 = vst [vmem:[%s7634_s25 + $0xf0] sm:$0xff] %v4937_v8  ;;  %v4940_v31 = vadd.f32 %v3458_v36, %v7625_v52  ;;  %v3460_v0 = vpop.f32.mrb[69].mxu0 }
 0x414   : > { %3939 = vst.msk [vmem:[%s7634_s25 + $0xf8] sm:$0xff] %vm3908_vm9, %v4939_v40  ;;  %v4942_v48 = vadd.f32 %v3460_v0, %v7628_v21 }
 0x415   : > { %v4941_v3 = vadd.f32 %v4940_v31, %v7611_v51 }
 0x416   : > { %v4943_v47 = vadd.f32 %v4942_v48, %v7613_v42  ;;  %v3464_v24 = vpop.f32.mrb[70].mxu0 }
 0x417   : > { %3940 = vst [vmem:[%s7634_s25 + $0x100] sm:$0xff] %v4941_v3  ;;  %v4944_v55 = vadd.f32 %v3464_v24, %v7625_v52  ;;  %v3466_v58 = vpop.f32.mrb[71].mxu0 }
 0x418   : > { %3941 = vst.msk [vmem:[%s7634_s25 + $0x108] sm:$0xff] %vm3908_vm9, %v4943_v47  ;;  %v4946_v32 = vadd.f32 %v3466_v58, %v7628_v21 }
 0x419   : > { %v4945_v35 = vadd.f32 %v4944_v55, %v7615_v39 }
 0x41a   : > { %v4947_v56 = vadd.f32 %v4946_v32, %v7617_v26  ;;  %v3764_v28 = vpop.f32.mrb[36].mxu0 }
 0x41b   : > { %3942 = vst [vmem:[%s7634_s25 + $0x110] sm:$0xff] %v4945_v35  ;;  %v4894_v51 = vadd.f32 %v3764_v28, %v7625_v52  ;;  %v3766_v42 = vpop.f32.mrb[37].mxu0 }
 0x41c   : > { %3943 = vst.msk [vmem:[%s7634_s25 + $0x118] sm:$0xff] %vm3908_vm9, %v4947_v56  ;;  %v4895_v1 = vadd.f32 %v3766_v42, %v7628_v21 }
 0x41d   : > { %3907 = vst [vmem:[%s7634_s25] sm:$0xff] %v4894_v51 }
 0x41e   : > { %3909 = vst.msk [vmem:[%s7634_s25 + $0x8] sm:$0xff] %vm3908_vm9, %v4895_v1  ;;  %v3770_v9 = vpop.f32.mrb[38].mxu0 }
 0x41f   : > { %v4896_v39 = vadd.f32 %v3770_v9, %v7625_v52  ;;  %v3772_v26 = vpop.f32.mrb[39].mxu0 }
 0x420   : > { %v4897_v41 = vadd.f32 %v3772_v26, %v7628_v21 }
 0x421   : > { %3910 = vst [vmem:[%s7634_s25 + $0x10] sm:$0xff] %v4896_v39 }
 0x422   : > { %3911 = vst.msk [vmem:[%s7634_s25 + $0x18] sm:$0xff] %vm3908_vm9, %v4897_v41  ;;  %v3776_v2 = vpop.f32.mrb[40].mxu0 }
 0x423   : > { %v4898_v43 = vadd.f32 %v3776_v2, %v7625_v52  ;;  %v3778_v23 = vpop.f32.mrb[41].mxu0 }
 0x424   : > { %v4899_v63 = vadd.f32 %v3778_v23, %v7628_v21 }
 0x425   : > { %3912 = vst [vmem:[%s7634_s25 + $0x20] sm:$0xff] %v4898_v43 }
 0x426   : > { %3913 = vst.msk [vmem:[%s7634_s25 + $0x28] sm:$0xff] %vm3908_vm9, %v4899_v63  ;;  %v3782_v19 = vpop.f32.mrb[42].mxu0 }
 0x427   : > { %v4900_v14 = vadd.f32 %v3782_v19, %v7625_v52  ;;  %v3784_v18 = vpop.f32.mrb[43].mxu0 }
 0x428   : > { %v4901_v17 = vadd.f32 %v3784_v18, %v7628_v21 }
 0x429   : > { %3914 = vst [vmem:[%s7634_s25 + $0x30] sm:$0xff] %v4900_v14 }
 0x42a   : > { %3915 = vst.msk [vmem:[%s7634_s25 + $0x38] sm:$0xff] %vm3908_vm9, %v4901_v17  ;;  %v3788_v57 = vpop.f32.mrb[44].mxu0 }
 0x42b   : > { %v4902_v37 = vadd.f32 %v3788_v57, %v7625_v52  ;;  %v3790_v38 = vpop.f32.mrb[45].mxu0 }
 0x42c   : > { %v4903_v11 = vadd.f32 %v3790_v38, %v7628_v21 }
 0x42d   : > { %3916 = vst [vmem:[%s7634_s25 + $0x40] sm:$0xff] %v4902_v37 }
 0x42e   : > { %3917 = vst.msk [vmem:[%s7634_s25 + $0x48] sm:$0xff] %vm3908_vm9, %v4903_v11  ;;  %v3794_v49 = vpop.f32.mrb[46].mxu0 }
 0x42f   : > { %v4904_v60 = vadd.f32 %v3794_v49, %v7625_v52  ;;  %v3796_v5 = vpop.f32.mrb[47].mxu0 }
 0x430   : > { %v4905_v62 = vadd.f32 %v3796_v5, %v7628_v21 }
 0x431   : > { %3918 = vst [vmem:[%s7634_s25 + $0x50] sm:$0xff] %v4904_v60 }
 0x432   : > { %3919 = vst.msk [vmem:[%s7634_s25 + $0x58] sm:$0xff] %vm3908_vm9, %v4905_v62  ;;  %v3800_v12 = vpop.f32.mrb[48].mxu0 }
 0x433   : > { %v4906_v10 = vadd.f32 %v3800_v12, %v7625_v52  ;;  %v3802_v53 = vpop.f32.mrb[49].mxu0 }
 0x434   : > { %v4907_v27 = vadd.f32 %v3802_v53, %v7628_v21 }
 0x435   : > { %3920 = vst [vmem:[%s7634_s25 + $0x60] sm:$0xff] %v4906_v10 }
 0x436   : > { %3921 = vst.msk [vmem:[%s7634_s25 + $0x68] sm:$0xff] %vm3908_vm9, %v4907_v27  ;;  %v3806_v54 = vpop.f32.mrb[50].mxu0 }
 0x437   : > { %v4908_v25 = vadd.f32 %v3806_v54, %v7625_v52  ;;  %v3808_v34 = vpop.f32.mrb[51].mxu0 }
 0x438   : > { %v4909_v44 = vadd.f32 %v3808_v34, %v7628_v21 }
 0x439   : > { %3922 = vst [vmem:[%s7634_s25 + $0x70] sm:$0xff] %v4908_v25 }
 0x43a   : > { %3923 = vst.msk [vmem:[%s7634_s25 + $0x78] sm:$0xff] %vm3908_vm9, %v4909_v44  ;;  %v3812_v30 = vpop.f32.mrb[52].mxu0 }
 0x43b   : > { %v4910_v61 = vadd.f32 %v3812_v30, %v7625_v52  ;;  %v3814_v33 = vpop.f32.mrb[53].mxu0 }
 0x43c   : > { %v4911_v15 = vadd.f32 %v3814_v33, %v7628_v21 }
 0x43d   : > { %3924 = vst [vmem:[%s7634_s25 + $0x80] sm:$0xff] %v4910_v61 }
 0x43e   : > { %3925 = vst.msk [vmem:[%s7634_s25 + $0x88] sm:$0xff] %vm3908_vm9, %v4911_v15 }
 0x43f PF: > { %s17_s24 = sadd.s32 1, %s5127_s24  }
 0x440   : > { %p14_p5 = scmp.ge.s32.totalorder %s17_s24, 4  }
 0x442   :  { %16 = sbr.rel (!%p14_p5) target bundleno = 1 (0x1), region = 106 }

</bundles_post_ra>
